<compile_context>
chip_gen: v7x
topology: tpu7x:2x2x1
jax: 0.10.0
libtpu: 0.0.40
codegen_flags: <defaults>
</compile_context>

<pallas_src>
import numpy as np
import jax
import jax.numpy as jnp
from jax import lax
from jax.experimental import pallas as pl
from jax.experimental.pallas import tpu as pltpu


# ----------------------- fused conv1 -> maxpool -> conv2 ---------------------

def _conv_pool_conv_kernel(x_ref, w1_ref, b1_ref, w2_ref, b2_ref, o_ref):
    """TB samples: conv1(3x3,pad2) -> maxpool(2x2) -> conv2(3x3,pad2), in VMEM."""
    TB, H, W, C = x_ref.shape          # (TB, 8, 14, Cfeat)
    H1, W1 = H + 2, W + 2              # conv1 output spatial (10, 16)
    Hp, Wp = H1 // 2, W1 // 2          # pooled spatial       (5, 8)
    H2, W2 = Hp + 2, Wp + 2            # conv2 output spatial (7, 10)
    W2A = 16                           # 8-aligned conv2 row width (>= W2)
    WPAD = W2A + 2                     # padded pooled-map width
    f32, bf16 = jnp.float32, jnp.bfloat16

    # ---- zero-pad the input feature map (pad=2) -----------------------------
    x = x_ref[...]
    zw = jnp.zeros((TB, H, 2, C), f32)
    xp = jnp.concatenate([zw, x, zw], axis=2)               # (TB, H, W+4, C)
    zh = jnp.zeros((TB, 2, W + 4, C), f32)
    xp = jnp.concatenate([zh, xp, zh], axis=1)              # (TB, H+4, W+4, C)

    # ---- conv1: ONE im2col matmul, K = 9*C ----------------------------------
    taps1 = [xp[:, kh:kh + H1, kw:kw + W1, :]               # 9 x (TB, H1, W1, C)
             for kh in range(3) for kw in range(3)]
    lhs1 = jnp.concatenate(taps1, axis=-1)                  # (TB, H1, W1, 9*C)
    lhs1 = lhs1.reshape(TB * H1 * W1, 9 * C).astype(bf16)   # W1=16 -> aligned collapse
    acc1 = jnp.dot(lhs1, w1_ref[...],
                   preferred_element_type=f32) + b1_ref[...]        # (TB*160, 128) f32
    # F.relu(x) in the reference is not assigned -> intentionally no ReLU here.

    # ---- 2x2 maxpool: lane-preserving reshapes + two VPU max reductions -----
    a = acc1.reshape(TB, H1, Wp, 2, 128)
    a = jnp.max(a, axis=3)                                  # (TB, H1, Wp, 128)
    a = a.reshape(TB, Hp, 2, Wp, 128)
    pooled = jnp.max(a, axis=2)                             # (TB, Hp, Wp, 128)

    # ---- pad pooled map: 2 left/top (conv pad=2); right-pad to WPAD so every
    #      tap window is a 16-wide, 8-aligned slab ---------------------------
    zl = jnp.zeros((TB, Hp, 2, 128), f32)
    zr = jnp.zeros((TB, Hp, WPAD - Wp - 2, 128), f32)
    pp = jnp.concatenate([zl, pooled, zr], axis=2)          # (TB, Hp, WPAD, 128)
    zt = jnp.zeros((TB, 2, WPAD, 128), f32)
    pp = jnp.concatenate([zt, pp, zt], axis=1)              # (TB, Hp+4, WPAD, 128)

    # ---- conv2: ONE im2col matmul, K = 9*128 = 1152 --------------------------
    taps2 = [pp[:, kh:kh + H2, kw:kw + W2A, :]              # 9 x (TB, H2, 16, 128)
             for kh in range(3) for kw in range(3)]
    lhs2 = jnp.concatenate(taps2, axis=-1)                  # (TB, H2, 16, 1152)
    lhs2 = lhs2.reshape(TB * H2 * W2A, 9 * 128).astype(bf16)
    acc2 = jnp.dot(lhs2, w2_ref[...],
                   preferred_element_type=f32) + b2_ref[...]        # (TB*H2*16, 32)
    acc2 = acc2.reshape(TB, H2, W2A, 32)[:, :, :W2, :]      # drop 6 alignment cols
    o_ref[...] = acc2.astype(o_ref.dtype)                   # (TB, 7, 10, 32) bf16


def _pick_block_batch(n):
    """Largest divisor of n that keeps >=2 grid steps (v7x megacore) and a small
    per-step working set; v5e/v6e simply get fewer, fatter steps for larger n."""
    cap = max(1, min(n // 2, 8))
    for tb in range(cap, 0, -1):
        if n % tb == 0:
            return tb
    return 1


def fused_conv_pool_conv(x_nhwc, w1_flat, b1, w2_flat, b2):
    """x:(N,H,W,C) f32 -> (N, 7, 10, 32) bf16 conv2 output (NHWC)."""
    N, H, W, C = x_nhwc.shape
    H1, W1 = H + 2, W + 2
    Hp, Wp = H1 // 2, W1 // 2
    H2, W2 = Hp + 2, Wp + 2
    tb = _pick_block_batch(N)
    return pl.pallas_call(
        _conv_pool_conv_kernel,
        out_shape=jax.ShapeDtypeStruct((N, H2, W2, 32), jnp.bfloat16),
        grid=(N // tb,),
        in_specs=[
            pl.BlockSpec((tb, H, W, C), lambda b: (b, 0, 0, 0)),
            # weights/biases: constant index_map -> VMEM-resident across steps
            pl.BlockSpec((9 * C, 128), lambda b: (0, 0)),
            pl.BlockSpec((1, 128), lambda b: (0, 0)),
            pl.BlockSpec((9 * 128, 32), lambda b: (0, 0)),
            pl.BlockSpec((1, 32), lambda b: (0, 0)),
        ],
        out_specs=pl.BlockSpec((tb, H2, W2, 32), lambda b: (b, 0, 0, 0)),
        compiler_params=pltpu.CompilerParams(
            dimension_semantics=("parallel",)),   # v7x: both TCs split the batch
    )(x_nhwc, w1_flat, b1, w2_flat, b2)


# ----------------------- fused linear1 + relu + critic ----------------------

def _head_kernel(x_ref, w1_ref, b1_ref, wc_ref, bc_ref, h_ref, v_ref):
    # linear1 (bf16 x / bf16 weight, f32 accumulation) -> relu -> critic.
    h = jnp.dot(x_ref[...], w1_ref[...],
                preferred_element_type=jnp.float32) + b1_ref[...]
    h = jnp.maximum(h, 0.0)
    h_ref[...] = h
    # critic_linear (512->1) as a VPU multiply + lane reduction; a 1-column MXU
    # matmul would waste 255/256 output columns and an extra weight push.
    v_ref[...] = jnp.sum(h * wc_ref[...], axis=-1, keepdims=True) + bc_ref[...]


def head(x_flat, w1_t, b1, wc_row, bc):
    """x_flat:(N,2240) bf16 -> (hidden:(N,512) f32, value:(N,1) f32)."""
    M, K = x_flat.shape
    Hd = w1_t.shape[1]
    # Single-shot whole-batch matmul: at small M the head is weight-streaming
    # bound; for large rollout batches, tile over M with a constant weight spec.
    return pl.pallas_call(
        _head_kernel,
        out_shape=(
            jax.ShapeDtypeStruct((M, Hd), jnp.float32),
            jax.ShapeDtypeStruct((M, 1), jnp.float32),
        ),
        grid=(1,),
        in_specs=[
            pl.BlockSpec((M, K), lambda i: (0, 0)),
            pl.BlockSpec((K, Hd), lambda i: (0, 0)),
            pl.BlockSpec((1, Hd), lambda i: (0, 0)),
            pl.BlockSpec((1, Hd), lambda i: (0, 0)),
            pl.BlockSpec((1, 1), lambda i: (0, 0)),
        ],
        out_specs=(
            pl.BlockSpec((M, Hd), lambda i: (0, 0)),
            pl.BlockSpec((M, 1), lambda i: (0, 0)),
        ),
    )(x_flat, w1_t, b1, wc_row, bc)


# ------------------------------ parameters ----------------------------------

def orthogonal(key, shape, gain=1.0):
    """Deterministic stand-in for torch.nn.init.orthogonal_ on weight `shape`."""
    rows = shape[0]
    cols = int(np.prod(shape[1:]))
    big, small = max(rows, cols), min(rows, cols)
    a = jax.random.normal(key, (big, small), dtype=jnp.float32)
    q, r = jnp.linalg.qr(a)
    signs = jnp.where(jnp.diagonal(r) >= 0, 1.0, -1.0)
    q = q * signs[None, :]
    if rows < cols:
        q = q.T
    return (gain * q[:rows, :cols]).reshape(shape).astype(jnp.float32)


def init_params(key, c_feat):
    k1, k2, k3, k4 = jax.random.split(key, 4)
    relu_gain = float(np.sqrt(2.0))  # nn.init.calculate_gain('relu')
    w_conv1 = orthogonal(k1, (128, c_feat, 3, 3))            # torch OIHW
    w_conv2 = orthogonal(k2, (32, 128, 3, 3))
    w_lin1 = orthogonal(k3, (512, 32 * 7 * 10)) * relu_gain
    w_crit = orthogonal(k4, (1, 512))

    # Conv weights pre-flattened for the in-kernel im2col matmuls:
    # (Cout, Cin, kh, kw) -> (kh, kw, Cin, Cout) -> (9*Cin, Cout), stored bf16
    # (MXU-native operands; f32 accumulation happens in-kernel).
    w1_flat = jnp.transpose(w_conv1, (2, 3, 1, 0)).reshape(9 * c_feat, 128)
    w2_flat = jnp.transpose(w_conv2, (2, 3, 1, 0)).reshape(9 * 128, 32)

    # PyTorch flattens NCHW (index = c*70 + h*10 + w); the kernel emits NHWC
    # (h*320 + w*32 + c).  Permute linear1's columns ONCE here so the math
    # matches the reference exactly.
    w_lin1_nhwc = (
        w_lin1.reshape(512, 32, 7, 10).transpose(0, 2, 3, 1).reshape(512, 2240)
    )
    return dict(
        w1_flat=jnp.asarray(w1_flat, dtype=jnp.bfloat16),
        b1=jnp.zeros((1, 128), jnp.float32),
        w2_flat=jnp.asarray(w2_flat, dtype=jnp.bfloat16),
        b2=jnp.zeros((1, 32), jnp.float32),
        # bf16 weight for the dominant matmul (f32 accumulation in-kernel).
        w_lin1_t=jnp.asarray(w_lin1_nhwc.T, dtype=jnp.bfloat16),
        b_lin1=jnp.zeros((1, 512), jnp.float32),
        w_critic_row=jnp.asarray(w_crit, dtype=jnp.float32),   # (1, 512)
        b_critic=jnp.zeros((1, 1), jnp.float32),
    )


# ------------------------------ forward pass ---------------------------------

def cnn_policy_forward(tdid_features_nhwc, states, masks, params):
    # TODO(synk): the TDID feature extractor (self.tdid, external module, not
    # provided) is not implemented; its output feature map is taken as input.
    conv_out = fused_conv_pool_conv(
        tdid_features_nhwc, params["w1_flat"], params["b1"],
        params["w2_flat"], params["b2"])                       # (N, 7, 10, 32) bf16
    n = conv_out.shape[0]
    # Free row-major metadata reshape; NHWC order matches the permuted linear1
    # weight (reproduces PyTorch's x.view(-1, 32*7*10) exactly).
    x_flat = conv_out.reshape(n, -1)                           # (N, 2240) bf16
    hidden, value = head(
        x_flat, params["w_lin1_t"], params["b_lin1"],
        params["w_critic_row"], params["b_critic"])
    del masks  # only used with GRU in the original module (not present here)
    return value, hidden, states


forward_jit = jax.jit(cnn_policy_forward)


# ---------------------- pure-JAX reference (sanity check) --------------------

def reference_forward(x_nhwc, params):
    c_feat = x_nhwc.shape[-1]
    w1 = params["w1_flat"].astype(jnp.float32).reshape(3, 3, c_feat, 128)
    w2 = params["w2_flat"].astype(jnp.float32).reshape(3, 3, 128, 32)
    dn = ("NHWC", "HWIO", "NHWC")
    y = lax.conv_general_dilated(x_nhwc, w1, (1, 1), [(2, 2), (2, 2)],
                                 dimension_numbers=dn)
    y = y + params["b1"].reshape(1, 1, 1, 128)
    y = lax.reduce_window(y, -jnp.inf, lax.max, (1, 2, 2, 1), (1, 2, 2, 1), "VALID")
    y = lax.conv_general_dilated(y, w2, (1, 1), [(2, 2), (2, 2)],
                                 dimension_numbers=dn)
    y = y + params["b2"].reshape(1, 1, 1, 32)
    flat = y.reshape(y.shape[0], -1)
    h = jnp.maximum(flat @ params["w_lin1_t"].astype(jnp.float32)
                    + params["b_lin1"], 0.0)
    v = h @ params["w_critic_row"].astype(jnp.float32).T + params["b_critic"]
    return v, h


# ---------------------------------- main --------------------------------------

if __name__ == "__main__":
    key = jax.random.PRNGKey(0)
    # Shapes implied by the module: linear1 expects 32*7*10, so the TDID feature
    # map must be spatially (8, 14): (8,14) -conv1,pad2-> (10,16) -pool2-> (5,8)
    # -conv2,pad2-> (7,10).  Small synthetic tdid.num_feature_channels = 8.
    N, Hf, Wf, Cfeat = 2, 8, 14, 8
    k_feat, k_par = jax.random.split(key)
    params = init_params(k_par, Cfeat)
    tdid_feat = jax.random.normal(k_feat, (N, Hf, Wf, Cfeat), dtype=jnp.float32)
    states = jnp.zeros((N, 1), dtype=jnp.float32)   # state_size == 1 (no GRU)
    masks = jnp.ones((N, 1), dtype=jnp.float32)

    value, hidden, states_out = forward_jit(tdid_feat, states, masks, params)
    jax.block_until_ready((value, hidden, states_out))

    assert value.shape == (N, 1)
    assert hidden.shape == (N, 512)
    assert states_out.shape == states.shape

    # Sanity check against a pure-JAX f32 reference using the same (bf16-rounded)
    # weights; tolerance covers the bf16 activation rounding in the kernel path.
    v_ref, h_ref = reference_forward(tdid_feat, params)
    np.testing.assert_allclose(np.asarray(hidden), np.asarray(h_ref),
                               rtol=5e-2, atol=5e-2)
    np.testing.assert_allclose(np.asarray(value), np.asarray(v_ref),
                               rtol=5e-2, atol=5e-2)

    print("KERNEL_OK")
</pallas_src>

<mosaic_0001>
module attributes {stable_mosaic.version = 11 : i64} {
  func.func @_conv_pool_conv_kernel(%arg0: i32, %arg1: memref<1x8x14x8xf32, #tpu.memory_space<vmem>>, %arg2: memref<72x128xbf16, #tpu.memory_space<vmem>>, %arg3: memref<1x128xf32, #tpu.memory_space<vmem>>, %arg4: memref<1152x32xbf16, #tpu.memory_space<vmem>>, %arg5: memref<1x32xf32, #tpu.memory_space<vmem>>, %arg6: memref<1x7x10x32xbf16, #tpu.memory_space<vmem>>) attributes {dimension_semantics = [#tpu.dimension_semantics<parallel>], iteration_bounds = array<i64: 2>, scalar_prefetch = 0 : i64, scratch_operands = 0 : i64, tpu.core_type = #tpu.core_type<tc>, window_params = [{transform_indices = @transform_0, window_bounds = array<i64: 1, 8, 14, 8>}, {pipeline_mode = #tpu.pipeline_mode<synchronous>, transform_indices = @transform_1, window_bounds = array<i64: 72, 128>}, {pipeline_mode = #tpu.pipeline_mode<synchronous>, transform_indices = @transform_2, window_bounds = array<i64: 1, 128>}, {pipeline_mode = #tpu.pipeline_mode<synchronous>, transform_indices = @transform_3, window_bounds = array<i64: 1152, 32>}, {pipeline_mode = #tpu.pipeline_mode<synchronous>, transform_indices = @transform_4, window_bounds = array<i64: 1, 32>}, {transform_indices = @transform_5, window_bounds = array<i64: 1, 7, 10, 32>}]} {
    %c0 = arith.constant 0 : index
    %c0_0 = arith.constant 0 : index
    %c0_1 = arith.constant 0 : index
    %c0_2 = arith.constant 0 : index
    %0 = vector.load %arg1[%c0, %c0_0, %c0_1, %c0_2] : memref<1x8x14x8xf32, #tpu.memory_space<vmem>>, vector<1x8x14x8xf32>
    %cst = arith.constant 0.000000e+00 : f32
    %1 = vector.broadcast %cst : f32 to vector<1x8x2x8xf32>
    %2 = tpu.concatenate %1, %0, %1 in 2 : vector<1x8x2x8xf32>, vector<1x8x14x8xf32>, vector<1x8x2x8xf32> -> vector<1x8x18x8xf32>
    %cst_3 = arith.constant 0.000000e+00 : f32
    %3 = vector.broadcast %cst_3 : f32 to vector<1x2x18x8xf32>
    %4 = tpu.concatenate %3, %2, %3 in 1 : vector<1x2x18x8xf32>, vector<1x8x18x8xf32>, vector<1x2x18x8xf32> -> vector<1x12x18x8xf32>
    %5 = vector.extract_strided_slice %4 {offsets = [0, 0, 0, 0], sizes = [1, 10, 16, 8], strides = [1, 1, 1, 1]} : vector<1x12x18x8xf32> to vector<1x10x16x8xf32>
    %6 = vector.extract_strided_slice %4 {offsets = [0, 0, 1, 0], sizes = [1, 10, 16, 8], strides = [1, 1, 1, 1]} : vector<1x12x18x8xf32> to vector<1x10x16x8xf32>
    %7 = vector.extract_strided_slice %4 {offsets = [0, 0, 2, 0], sizes = [1, 10, 16, 8], strides = [1, 1, 1, 1]} : vector<1x12x18x8xf32> to vector<1x10x16x8xf32>
    %8 = vector.extract_strided_slice %4 {offsets = [0, 1, 0, 0], sizes = [1, 10, 16, 8], strides = [1, 1, 1, 1]} : vector<1x12x18x8xf32> to vector<1x10x16x8xf32>
    %9 = vector.extract_strided_slice %4 {offsets = [0, 1, 1, 0], sizes = [1, 10, 16, 8], strides = [1, 1, 1, 1]} : vector<1x12x18x8xf32> to vector<1x10x16x8xf32>
    %10 = vector.extract_strided_slice %4 {offsets = [0, 1, 2, 0], sizes = [1, 10, 16, 8], strides = [1, 1, 1, 1]} : vector<1x12x18x8xf32> to vector<1x10x16x8xf32>
    %11 = vector.extract_strided_slice %4 {offsets = [0, 2, 0, 0], sizes = [1, 10, 16, 8], strides = [1, 1, 1, 1]} : vector<1x12x18x8xf32> to vector<1x10x16x8xf32>
    %12 = vector.extract_strided_slice %4 {offsets = [0, 2, 1, 0], sizes = [1, 10, 16, 8], strides = [1, 1, 1, 1]} : vector<1x12x18x8xf32> to vector<1x10x16x8xf32>
    %13 = vector.extract_strided_slice %4 {offsets = [0, 2, 2, 0], sizes = [1, 10, 16, 8], strides = [1, 1, 1, 1]} : vector<1x12x18x8xf32> to vector<1x10x16x8xf32>
    %14 = tpu.concatenate %5, %6, %7, %8, %9, %10, %11, %12, %13 in 3 : vector<1x10x16x8xf32>, vector<1x10x16x8xf32>, vector<1x10x16x8xf32>, vector<1x10x16x8xf32>, vector<1x10x16x8xf32>, vector<1x10x16x8xf32>, vector<1x10x16x8xf32>, vector<1x10x16x8xf32>, vector<1x10x16x8xf32> -> vector<1x10x16x72xf32>
    %15 = vector.shape_cast %14 : vector<1x10x16x72xf32> to vector<160x72xf32>
    %16 = arith.truncf %15 : vector<160x72xf32> to vector<160x72xbf16>
    %c0_4 = arith.constant 0 : index
    %c0_5 = arith.constant 0 : index
    %17 = vector.load %arg2[%c0_4, %c0_5] : memref<72x128xbf16, #tpu.memory_space<vmem>>, vector<72x128xbf16>
    %cst_6 = arith.constant dense<0.000000e+00> : vector<160x128xf32>
    %18 = tpu.matmul %16, %17, %cst_6 {dimension_numbers = #tpu.dot_dimension_numbers<[1], [0], [0], [1], [0, 0, 1, 1], [], []>} : vector<160x72xbf16>, vector<72x128xbf16>, vector<160x128xf32> -> vector<160x128xf32>
    %c0_7 = arith.constant 0 : index
    %c0_8 = arith.constant 0 : index
    %19 = vector.load %arg3[%c0_7, %c0_8] : memref<1x128xf32, #tpu.memory_space<vmem>>, vector<1x128xf32>
    %20 = vector.broadcast %19 : vector<1x128xf32> to vector<160x128xf32>
    %21 = arith.addf %18, %20 : vector<160x128xf32>
    %22 = vector.shape_cast %21 : vector<160x128xf32> to vector<1x10x8x2x128xf32>
    %cst_9 = arith.constant dense<0xFF800000> : vector<1x10x8x128xf32>
    %23 = vector.multi_reduction <maximumf>, %22, %cst_9 [3] : vector<1x10x8x2x128xf32> to vector<1x10x8x128xf32>
    %24 = vector.shape_cast %23 : vector<1x10x8x128xf32> to vector<1x5x2x8x128xf32>
    %cst_10 = arith.constant dense<0xFF800000> : vector<1x5x8x128xf32>
    %25 = vector.multi_reduction <maximumf>, %24, %cst_10 [2] : vector<1x5x2x8x128xf32> to vector<1x5x8x128xf32>
    %cst_11 = arith.constant 0.000000e+00 : f32
    %26 = vector.broadcast %cst_11 : f32 to vector<1x5x2x128xf32>
    %cst_12 = arith.constant 0.000000e+00 : f32
    %27 = vector.broadcast %cst_12 : f32 to vector<1x5x8x128xf32>
    %28 = tpu.concatenate %26, %25, %27 in 2 : vector<1x5x2x128xf32>, vector<1x5x8x128xf32>, vector<1x5x8x128xf32> -> vector<1x5x18x128xf32>
    %cst_13 = arith.constant 0.000000e+00 : f32
    %29 = vector.broadcast %cst_13 : f32 to vector<1x2x18x128xf32>
    %30 = tpu.concatenate %29, %28, %29 in 1 : vector<1x2x18x128xf32>, vector<1x5x18x128xf32>, vector<1x2x18x128xf32> -> vector<1x9x18x128xf32>
    %31 = vector.extract_strided_slice %30 {offsets = [0, 0, 0, 0], sizes = [1, 7, 16, 128], strides = [1, 1, 1, 1]} : vector<1x9x18x128xf32> to vector<1x7x16x128xf32>
    %32 = vector.extract_strided_slice %30 {offsets = [0, 0, 1, 0], sizes = [1, 7, 16, 128], strides = [1, 1, 1, 1]} : vector<1x9x18x128xf32> to vector<1x7x16x128xf32>
    %33 = vector.extract_strided_slice %30 {offsets = [0, 0, 2, 0], sizes = [1, 7, 16, 128], strides = [1, 1, 1, 1]} : vector<1x9x18x128xf32> to vector<1x7x16x128xf32>
    %34 = vector.extract_strided_slice %30 {offsets = [0, 1, 0, 0], sizes = [1, 7, 16, 128], strides = [1, 1, 1, 1]} : vector<1x9x18x128xf32> to vector<1x7x16x128xf32>
    %35 = vector.extract_strided_slice %30 {offsets = [0, 1, 1, 0], sizes = [1, 7, 16, 128], strides = [1, 1, 1, 1]} : vector<1x9x18x128xf32> to vector<1x7x16x128xf32>
    %36 = vector.extract_strided_slice %30 {offsets = [0, 1, 2, 0], sizes = [1, 7, 16, 128], strides = [1, 1, 1, 1]} : vector<1x9x18x128xf32> to vector<1x7x16x128xf32>
    %37 = vector.extract_strided_slice %30 {offsets = [0, 2, 0, 0], sizes = [1, 7, 16, 128], strides = [1, 1, 1, 1]} : vector<1x9x18x128xf32> to vector<1x7x16x128xf32>
    %38 = vector.extract_strided_slice %30 {offsets = [0, 2, 1, 0], sizes = [1, 7, 16, 128], strides = [1, 1, 1, 1]} : vector<1x9x18x128xf32> to vector<1x7x16x128xf32>
    %39 = vector.extract_strided_slice %30 {offsets = [0, 2, 2, 0], sizes = [1, 7, 16, 128], strides = [1, 1, 1, 1]} : vector<1x9x18x128xf32> to vector<1x7x16x128xf32>
    %40 = tpu.concatenate %31, %32, %33, %34, %35, %36, %37, %38, %39 in 3 : vector<1x7x16x128xf32>, vector<1x7x16x128xf32>, vector<1x7x16x128xf32>, vector<1x7x16x128xf32>, vector<1x7x16x128xf32>, vector<1x7x16x128xf32>, vector<1x7x16x128xf32>, vector<1x7x16x128xf32>, vector<1x7x16x128xf32> -> vector<1x7x16x1152xf32>
    %41 = vector.shape_cast %40 : vector<1x7x16x1152xf32> to vector<112x1152xf32>
    %42 = arith.truncf %41 : vector<112x1152xf32> to vector<112x1152xbf16>
    %c0_14 = arith.constant 0 : index
    %c0_15 = arith.constant 0 : index
    %43 = vector.load %arg4[%c0_14, %c0_15] : memref<1152x32xbf16, #tpu.memory_space<vmem>>, vector<1152x32xbf16>
    %cst_16 = arith.constant dense<0.000000e+00> : vector<112x32xf32>
    %44 = tpu.matmul %42, %43, %cst_16 {dimension_numbers = #tpu.dot_dimension_numbers<[1], [0], [0], [1], [0, 0, 1, 1], [], []>} : vector<112x1152xbf16>, vector<1152x32xbf16>, vector<112x32xf32> -> vector<112x32xf32>
    %c0_17 = arith.constant 0 : index
    %c0_18 = arith.constant 0 : index
    %45 = vector.load %arg5[%c0_17, %c0_18] : memref<1x32xf32, #tpu.memory_space<vmem>>, vector<1x32xf32>
    %46 = vector.broadcast %45 : vector<1x32xf32> to vector<112x32xf32>
    %47 = arith.addf %44, %46 : vector<112x32xf32>
    %48 = vector.shape_cast %47 : vector<112x32xf32> to vector<1x7x16x32xf32>
    %49 = vector.extract_strided_slice %48 {offsets = [0, 0, 0, 0], sizes = [1, 7, 10, 32], strides = [1, 1, 1, 1]} : vector<1x7x16x32xf32> to vector<1x7x10x32xf32>
    %50 = arith.truncf %49 : vector<1x7x10x32xf32> to vector<1x7x10x32xbf16>
    %c0_19 = arith.constant 0 : index
    %c0_20 = arith.constant 0 : index
    %c0_21 = arith.constant 0 : index
    %c0_22 = arith.constant 0 : index
    %51 = vector.load %arg6[%c0_19, %c0_20, %c0_21, %c0_22] : memref<1x7x10x32xbf16, #tpu.memory_space<vmem>>, vector<1x7x10x32xbf16>
    tpu.vector_store %arg6[%c0_19, %c0_20, %c0_21, %c0_22], %50 {strides = array<i32>} : memref<1x7x10x32xbf16, #tpu.memory_space<vmem>>, vector<1x7x10x32xbf16>,
    return
  }
  func.func @transform_0(%arg0: i32) -> (i32, i32, i32, i32) {
    %c0_i32 = arith.constant 0 : i32
    %c0_i32_0 = arith.constant 0 : i32
    %c0_i32_1 = arith.constant 0 : i32
    %c0_i32_2 = arith.constant 0 : i32
    return %arg0, %c0_i32, %c0_i32_0, %c0_i32_1 : i32, i32, i32, i32
  }
  func.func @transform_1(%arg0: i32) -> (i32, i32) {
    %c0_i32 = arith.constant 0 : i32
    %c0_i32_0 = arith.constant 0 : i32
    %c0_i32_1 = arith.constant 0 : i32
    return %c0_i32, %c0_i32_0 : i32, i32
  }
  func.func @transform_2(%arg0: i32) -> (i32, i32) {
    %c0_i32 = arith.constant 0 : i32
    %c0_i32_0 = arith.constant 0 : i32
    %c0_i32_1 = arith.constant 0 : i32
    return %c0_i32, %c0_i32_0 : i32, i32
  }
  func.func @transform_3(%arg0: i32) -> (i32, i32) {
    %c0_i32 = arith.constant 0 : i32
    %c0_i32_0 = arith.constant 0 : i32
    %c0_i32_1 = arith.constant 0 : i32
    return %c0_i32, %c0_i32_0 : i32, i32
  }
  func.func @transform_4(%arg0: i32) -> (i32, i32) {
    %c0_i32 = arith.constant 0 : i32
    %c0_i32_0 = arith.constant 0 : i32
    %c0_i32_1 = arith.constant 0 : i32
    return %c0_i32, %c0_i32_0 : i32, i32
  }
  func.func @transform_5(%arg0: i32) -> (i32, i32, i32, i32) {
    %c0_i32 = arith.constant 0 : i32
    %c0_i32_0 = arith.constant 0 : i32
    %c0_i32_1 = arith.constant 0 : i32
    %c0_i32_2 = arith.constant 0 : i32
    return %arg0, %c0_i32, %c0_i32_0, %c0_i32_1 : i32, i32, i32, i32
  }
}

module attributes {stable_mosaic.version = 11 : i64} {
  func.func @_head_kernel(%arg0: i32, %arg1: memref<2x2240xbf16, #tpu.memory_space<vmem>>, %arg2: memref<2240x512xbf16, #tpu.memory_space<vmem>>, %arg3: memref<1x512xf32, #tpu.memory_space<vmem>>, %arg4: memref<1x512xf32, #tpu.memory_space<vmem>>, %arg5: memref<1x1xf32, #tpu.memory_space<vmem>>, %arg6: memref<2x512xf32, #tpu.memory_space<vmem>>, %arg7: memref<2x1xf32, #tpu.memory_space<vmem>>) attributes {dimension_semantics = [#tpu.dimension_semantics<arbitrary>], iteration_bounds = array<i64: 1>, scalar_prefetch = 0 : i64, scratch_operands = 0 : i64, tpu.core_type = #tpu.core_type<tc>, window_params = [{pipeline_mode = #tpu.pipeline_mode<synchronous>, transform_indices = @transform_0, window_bounds = array<i64: 2, 2240>}, {pipeline_mode = #tpu.pipeline_mode<synchronous>, transform_indices = @transform_1, window_bounds = array<i64: 2240, 512>}, {pipeline_mode = #tpu.pipeline_mode<synchronous>, transform_indices = @transform_2, window_bounds = array<i64: 1, 512>}, {pipeline_mode = #tpu.pipeline_mode<synchronous>, transform_indices = @transform_3, window_bounds = array<i64: 1, 512>}, {pipeline_mode = #tpu.pipeline_mode<synchronous>, transform_indices = @transform_4, window_bounds = array<i64: 1, 1>}, {pipeline_mode = #tpu.pipeline_mode<synchronous>, transform_indices = @transform_5, window_bounds = array<i64: 2, 512>}, {pipeline_mode = #tpu.pipeline_mode<synchronous>, transform_indices = @transform_6, window_bounds = array<i64: 2, 1>}]} {
    %c0 = arith.constant 0 : index
    %c0_0 = arith.constant 0 : index
    %0 = vector.load %arg1[%c0, %c0_0] : memref<2x2240xbf16, #tpu.memory_space<vmem>>, vector<2x2240xbf16>
    %c0_1 = arith.constant 0 : index
    %c0_2 = arith.constant 0 : index
    %1 = vector.load %arg2[%c0_1, %c0_2] : memref<2240x512xbf16, #tpu.memory_space<vmem>>, vector<2240x512xbf16>
    %cst = arith.constant dense<0.000000e+00> : vector<2x512xf32>
    %2 = tpu.matmul %0, %1, %cst {dimension_numbers = #tpu.dot_dimension_numbers<[1], [0], [0], [1], [0, 0, 1, 1], [], []>} : vector<2x2240xbf16>, vector<2240x512xbf16>, vector<2x512xf32> -> vector<2x512xf32>
    %c0_3 = arith.constant 0 : index
    %c0_4 = arith.constant 0 : index
    %3 = vector.load %arg3[%c0_3, %c0_4] : memref<1x512xf32, #tpu.memory_space<vmem>>, vector<1x512xf32>
    %4 = vector.broadcast %3 : vector<1x512xf32> to vector<2x512xf32>
    %5 = arith.addf %2, %4 : vector<2x512xf32>
    %cst_5 = arith.constant 0.000000e+00 : f32
    %6 = vector.broadcast %cst_5 : f32 to vector<2x512xf32>
    %7 = arith.maximumf %5, %6 : vector<2x512xf32>
    %c0_6 = arith.constant 0 : index
    %c0_7 = arith.constant 0 : index
    %8 = vector.load %arg6[%c0_6, %c0_7] : memref<2x512xf32, #tpu.memory_space<vmem>>, vector<2x512xf32>
    tpu.vector_store %arg6[%c0_6, %c0_7], %7 {strides = array<i32>} : memref<2x512xf32, #tpu.memory_space<vmem>>, vector<2x512xf32>,
    %c0_8 = arith.constant 0 : index
    %c0_9 = arith.constant 0 : index
    %9 = vector.load %arg4[%c0_8, %c0_9] : memref<1x512xf32, #tpu.memory_space<vmem>>, vector<1x512xf32>
    %10 = vector.broadcast %9 : vector<1x512xf32> to vector<2x512xf32>
    %11 = arith.mulf %7, %10 : vector<2x512xf32>
    %cst_10 = arith.constant dense<0.000000e+00> : vector<2xf32>
    %12 = vector.multi_reduction <add>, %11, %cst_10 [1] : vector<2x512xf32> to vector<2xf32>
    %13 = vector.shape_cast %12 : vector<2xf32> to vector<2x1xf32>
    %c0_11 = arith.constant 0 : index
    %c0_12 = arith.constant 0 : index
    %14 = vector.load %arg5[%c0_11, %c0_12] : memref<1x1xf32, #tpu.memory_space<vmem>>, vector<1x1xf32>
    %15 = vector.broadcast %14 : vector<1x1xf32> to vector<2x1xf32>
    %16 = arith.addf %13, %15 : vector<2x1xf32>
    %c0_13 = arith.constant 0 : index
    %c0_14 = arith.constant 0 : index
    %17 = vector.load %arg7[%c0_13, %c0_14] : memref<2x1xf32, #tpu.memory_space<vmem>>, vector<2x1xf32>
    tpu.vector_store %arg7[%c0_13, %c0_14], %16 {strides = array<i32>} : memref<2x1xf32, #tpu.memory_space<vmem>>, vector<2x1xf32>,
    return
  }
  func.func @transform_0(%arg0: i32) -> (i32, i32) {
    %c0_i32 = arith.constant 0 : i32
    %c0_i32_0 = arith.constant 0 : i32
    %c0_i32_1 = arith.constant 0 : i32
    return %c0_i32, %c0_i32_0 : i32, i32
  }
  func.func @transform_1(%arg0: i32) -> (i32, i32) {
    %c0_i32 = arith.constant 0 : i32
    %c0_i32_0 = arith.constant 0 : i32
    %c0_i32_1 = arith.constant 0 : i32
    return %c0_i32, %c0_i32_0 : i32, i32
  }
  func.func @transform_2(%arg0: i32) -> (i32, i32) {
    %c0_i32 = arith.constant 0 : i32
    %c0_i32_0 = arith.constant 0 : i32
    %c0_i32_1 = arith.constant 0 : i32
    return %c0_i32, %c0_i32_0 : i32, i32
  }
  func.func @transform_3(%arg0: i32) -> (i32, i32) {
    %c0_i32 = arith.constant 0 : i32
    %c0_i32_0 = arith.constant 0 : i32
    %c0_i32_1 = arith.constant 0 : i32
    return %c0_i32, %c0_i32_0 : i32, i32
  }
  func.func @transform_4(%arg0: i32) -> (i32, i32) {
    %c0_i32 = arith.constant 0 : i32
    %c0_i32_0 = arith.constant 0 : i32
    %c0_i32_1 = arith.constant 0 : i32
    return %c0_i32, %c0_i32_0 : i32, i32
  }
  func.func @transform_5(%arg0: i32) -> (i32, i32) {
    %c0_i32 = arith.constant 0 : i32
    %c0_i32_0 = arith.constant 0 : i32
    %c0_i32_1 = arith.constant 0 : i32
    return %c0_i32, %c0_i32_0 : i32, i32
  }
  func.func @transform_6(%arg0: i32) -> (i32, i32) {
    %c0_i32 = arith.constant 0 : i32
    %c0_i32_0 = arith.constant 0 : i32
    %c0_i32_1 = arith.constant 0 : i32
    return %c0_i32, %c0_i32_0 : i32, i32
  }
}

</mosaic_0001>

<bundles_post_ra>
// kernel: cnn_policy_forward.2
= control target key start
LH: loop header
LB: loop body
LE: loop exit
PB: predicated region body
PF: predicated region fallthrough
CT: control target
= control target key end

     0   :  { %10 = vsyncpa [#allocation3], 0  ;;  %s6464_s0 = inlined_call_operand.vmem [shape: f32[2,8,14,8], index: 0, kind: input, shape index: {}]   ;;  %s6465_s1 = inlined_call_operand.hbm [shape: bf16[72,128], index: 1, kind: input, shape index: {}]   ;;  %s6466_s2 = inlined_call_operand.hbm [shape: f32[1,128], index: 2, kind: input, shape index: {}]   ;;  %s6467_s3 = inlined_call_operand.vmem [shape: bf16[1152,32], index: 3, kind: input, shape index: {}]   ;;  %s6468_s4 = inlined_call_operand.hbm [shape: f32[1,32], index: 4, kind: input, shape index: {}]   ;;  %s6469_s5 = inlined_call_operand.vmem [shape: bf16[2,7,10,32], index: 5, kind: output, shape index: {}]  }
   0x1   :  { %11 = vsyncpa [#allocation5], 0  ;;  %s4752_s18 = smov 0  }
   0x2 LB: > { %s4705_s19 = smov [#allocation4]   ;;  %s4758_s21 = sadd.s32 4294967295, %s4703_s18   ;;  %s4703_s18 = sphi %s4752_s18, %s17_s18  }
   0x3   : > { %s184_s20 = sshll.u32 %s4705_s19, 4  ;;  %p3608_p0 = scmp.ge.s32.totalorder %s4703_s18, 1  ;;  %s185_s20 = int_to_ptr.vmem [resolvable:$true] %s184_s20 }
   0x4   : > { %p158_p1 = scmp.lt.s32.totalorder %s4703_s18, 3  ;;  %p6470_p2 = scmp.eq.s32.totalorder %s4758_s21, 0 }
   0x5   : > { %s4706_s23 = smov [#allocation2]   ;;  %s4707_s26 = smov [#allocation6]  }
   0x6   : > { %p4763_p3 = pnand %p3608_p0, %p158_p1  ;;  %s170_s24 = sshll.u32 %s4706_s23, 4  ;;  %s4775_s24 = int_to_ptr.vmem [resolvable:$true] %s170_s24 }
   0x7   : > { %s198_s27 = sshll.u32 %s4707_s26, 4  ;;  %s4605_s30 = scalar_lea.hbm %s6466_s2, 16  ;;  %s4777_s27 = int_to_ptr.vmem [resolvable:$true] %s198_s27 }
   0x8   : > { %s6484_s22 = scalar_select %p4763_p3, 1, 0 }
   0x9   : > { %p4166_p4 = pneg %p4763_p3  ;;  %p4606_p6 = scmp.ne.s32.totalorder %s6466_s2, %s4605_s30 }
   0xa   : > { %p4612_p10 = scmp.lt.u32.totalorder %s4605_s30, %s6466_s2 }
   0xb   : > { %p4771_p5 = pnand %p6470_p2, %p4166_p4 }
   0xd   : > { %p4787_p7 = pneg %p4771_p5 }
   0xf   : > { %p4608_p8 = pnand %p4787_p7, %p4606_p6 }
  0x11   : > { %p4609_p9 = pneg %p4608_p8 }
  0x13   : > { %p4614_p11 = pnand %p4612_p10, %p4609_p9 }
  0x15   : > { %4617 = shalt.err (!%p4614_p11)
}
  0x16   : > { %s4618_s11 = scalar_lea.vmem %s185_s20, 16  ;;  %s4625_s12 = scalar_lea.vmem %s185_s20, 32 }
  0x17   : > { %p4619_p12 = scmp.ne.s32.totalorder %s185_s20, %s4618_s11  ;;  %p4626_p1 = scmp.lt.s32.totalorder %s185_s20, %s185_s20 }
  0x18   : > { %p4627_p4 = scmp.lt.s32.totalorder %s4625_s12, %s4618_s11 }
  0x19   : > { %p4621_p13 = pnand %p4619_p12, %p4787_p7 }
  0x1a   : > { %p4628_p2 = por %p4627_p4, %p4626_p1 }
  0x1b   : > { %p4622_p0 = pneg %p4621_p13 }
  0x1d   : > { %p4629_p3 = pnand %p4628_p2, %p4622_p0 }
  0x1f   : > { %4632 = shalt.err (!%p4629_p3)
}
  0x20   : > { %4172 = dma.hbm_to_vmem [thread:$0]  (!%p4771_p5), %s6466_s2, 16, %s185_s20, [#allocation5]  }
  0x21   : > { %s4633_s17 = scalar_lea.hbm %s6465_s1, 576 }
  0x22   : > { %p4634_p6 = scmp.ne.s32.totalorder %s6465_s1, %s4633_s17  ;;  %p4640_p2 = scmp.lt.u32.totalorder %s4633_s17, %s6465_s1 }
  0x24   : > { %p4636_p8 = pnand %p4634_p6, %p4787_p7 }
  0x26   : > { %p4637_p9 = pneg %p4636_p8 }
  0x28   : > { %p4642_p3 = pnand %p4640_p2, %p4637_p9 }
  0x2a   : > { %4645 = shalt.err (!%p4642_p3)
}
  0x2b   : > { %s4646_s20 = scalar_lea.vmem %s4775_s24, 576  ;;  %p4654_p13 = scmp.lt.s32.totalorder %s4775_s24, %s4775_s24 }
  0x2c   : > { %p4647_p10 = scmp.ne.s32.totalorder %s4775_s24, %s4646_s20  ;;  %p4655_p0 = scmp.lt.s32.totalorder %s4646_s20, %s4646_s20 }
  0x2e   : > { %p4649_p11 = pnand %p4647_p10, %p4787_p7  ;;  %p4656_p1 = por %p4655_p0, %p4654_p13 }
  0x30   : > { %p4650_p12 = pneg %p4649_p11 }
  0x32   : > { %p4657_p4 = pnand %p4656_p1, %p4650_p12 }
  0x34   : > { %4660 = shalt.err (!%p4657_p4)
}
  0x35   : > { %s4708_s29 = smov 64   ;;  %s4709_s30 = smov 4  }
  0x36   : > { %4169 = dma.hbm_to_vmem [thread:$0]  (!%p4771_p5), %s6465_s1, 576, %s4775_s24, [#allocation3], %s4708_s29, %s4708_s29, %s4709_s30  }
  0x37   : > { %s4661_s11 = scalar_lea.hbm %s6468_s4, 16 }
  0x38   : > { %p4662_p6 = scmp.ne.s32.totalorder %s6468_s4, %s4661_s11  ;;  %p4668_p2 = scmp.lt.u32.totalorder %s4661_s11, %s6468_s4 }
  0x3a   : > { %p4664_p8 = pnand %p4662_p6, %p4787_p7 }
  0x3c   : > { %p4665_p9 = pneg %p4664_p8 }
  0x3e   : > { %p4670_p3 = pnand %p4668_p2, %p4665_p9 }
  0x40   : > { %4673 = shalt.err (!%p4670_p3)
}
  0x41   : > { %s4674_s24 = scalar_lea.vmem %s4777_s27, 16  ;;  %s4681_s16 = scalar_lea.vmem %s4777_s27, 32 }
  0x42   : > { %p4675_p10 = scmp.ne.s32.totalorder %s4777_s27, %s4674_s24  ;;  %p4682_p13 = scmp.lt.s32.totalorder %s4777_s27, %s4777_s27 }
  0x43   : > { %p4683_p0 = scmp.lt.s32.totalorder %s4681_s16, %s4674_s24 }
  0x44   : > { %p4677_p11 = pnand %p4675_p10, %p4787_p7 }
  0x45   : > { %p4684_p1 = por %p4683_p0, %p4682_p13 }
  0x46   : > { %p4678_p12 = pneg %p4677_p11 }
  0x48   : > { %p4685_p4 = pnand %p4684_p1, %p4678_p12 }
  0x4a   : > { %4688 = shalt.err (!%p4685_p4)
}
  0x4b   : > { %4175 = dma.hbm_to_vmem [thread:$0]  (!%p4771_p5), %s6468_s4, 16, %s4777_s27, [#allocation5]  }
  0x4c   : > { %p6487_p6 = scmp.ne.s32.totalorder %s6484_s22, 0 }
  0x4e   : > { %219 = sbr.rel (%p6487_p6) target bundleno = 1002 (0x3ea), region = 40 }
  0x55   : > { %p6488_p7 = scmp.eq.s32.totalorder %s4758_s21, 0 }
  0x57   : > { %4694 = dma.done.wait (%p6488_p7), [#allocation3], 576   ;;  %p6489_p8 = pmov %p6488_p7 }
  0x58   : > { %p6490_p9 = pmov %p6488_p7 }
  0x59   : > { %4696 = vsyncadd (%p6489_p8), [#allocation3], 4294966720 }
  0x5a   : > { %4698 = dma.done.wait (%p6490_p9), [#allocation5], 32   ;;  %p6491_p2 = pmov %p6488_p7 }
  0x5b   : > { %p255_p3 = scmp.lt.s32.totalorder %s4758_s21, 1  ;;  %vm298_vm0 = vcmask 1041408   ;;  %vm356_vm1 = vcmask 1046528   ;;  %v6472_v7 = vmov 0.0   ;;  %vm442_vm2 = vcmask 1045504   ;;  %s4711_s23 = smov 24  }
  0x5c   : > { %4700 = vsyncadd (%p6491_p2), [#allocation5], 4294967264  ;;  %v4875_v8 = vrot.slane %v6472_v7, 1  ;;  %v4894_v17 = vrot.slane %v6472_v7, 2  ;;  %v4527_v28 = vld [vmem:[#allocation2] sm:$0xff]   ;;  %s4712_s26 = smov 8  }
  0x5d   : > { %s6512_s21 = smov (!%p255_p3, %s4758_s21), 1  ;;  %4062 = vmatprep.subr.bf16.mxu0 %v4527_v28  ;;  %v4528_v35 = vld [vmem:[#allocation2 + $0x8] sm:$0xff]   ;;  %s4713_s28 = smov 16   ;;  %v4529_v40 = vld [vmem:[#allocation2 + $0x10] sm:$0xff]   ;;  %v4530_v45 = vld [vmem:[#allocation2 + $0x18] sm:$0xff]   ;;  %vm1077_vm3 = vcmask 1043456  }
  0x5e   : > { %s3785_s22 = sshll.u32 %s6512_s21, 7  ;;  %4063 = vmatpush3.bf16.msra.mxu0 %v4527_v28  ;;  %s4714_s20 = smov 32   ;;  %vm834_vm4 = vcmask 64512   ;;  %vm852_vm5 = vcmask 130048   ;;  %vm870_vm6 = vcmask 195584   ;;  %vm890_vm7 = vcmask 261120  }
  0x5f   : > { %s4868_s8 = scalar_lea.vmem %s6464_s0, %s3785_s22  ;;  %4064 = vmatprep.subr.bf16.mxu0 %v4528_v35  ;;  %s4715_s29 = smov 40   ;;  %vm910_vm8 = vcmask 326656   ;;  %vm930_vm9 = vcmask 392192   ;;  %vm951_vm10 = vcmask 457728   ;;  %vm972_vm11 = vcmask 523264  }
  0x60   : > { %v266_v0 = vld [vmem:[%s4868_s8] sm:$0xff]  ;;  %v267_v1 = vld [vmem:[%s4868_s8 + $0x8] sm:$0x3f]  ;;  %v268_v2 = vld [vmem:[%s4868_s8 + $0x10] sm:$0xff]  ;;  %s4716_s30 = smov 48   ;;  %s4717_s6 = smov 56  }
  0x61   : > { %v299_v3 = vrot.slane %v266_v0, 6  ;;  %v300_v4 = vrot.slane %v267_v1, 6  ;;  %v269_v5 = vld [vmem:[%s4868_s8 + $0x18] sm:$0x3f]  ;;  %v302_v6 = vrot.slane %v268_v2, 6  ;;  %v270_v36 = vld [vmem:[%s4868_s8 + $0x20] sm:$0xff] }
  0x62   : > { %v303_v9 = vrot.slane %v269_v5, 6  ;;  %v271_v37 = vld [vmem:[%s4868_s8 + $0x28] sm:$0x3f]  ;;  %v305_v39 = vrot.slane %v270_v36, 6  ;;  %4065 = vmatpush3.bf16.msra.mxu0 %v4528_v35  ;;  %v272_v48 = vld [vmem:[%s4868_s8 + $0x30] sm:$0xff]  ;;  %v274_v60 = vld [vmem:[%s4868_s8 + $0x40] sm:$0xff] }
  0x63   : > { %v4878_v10 = vsel %vm298_vm0, 0.0, %v299_v3  ;;  %v4881_v11 = vsel %vm298_vm0, %v299_v3, %v300_v4  ;;  %v4884_v12 = vsel %vm298_vm0, 0.0, %v302_v6  ;;  %v306_v41 = vrot.slane %v271_v37, 6  ;;  %4066 = vmatprep.subr.bf16.mxu0 %v4529_v40  ;;  %v273_v52 = vld [vmem:[%s4868_s8 + $0x38] sm:$0x3f]  ;;  %v276_v3 = vld [vmem:[%s4868_s8 + $0x50] sm:$0xff] }
  0x64   : > { %v4207_v13 = vpack.i.bf16 %v4878_v10, %v6472_v7  ;;  %v359_v14 = vrot.slane %v4878_v10, 1  ;;  %v360_v15 = vrot.slane %v4881_v11, 1  ;;  %v4891_v16 = vsel %vm298_vm0, %v302_v6, %v303_v9  ;;  %v275_v62 = vld [vmem:[%s4868_s8 + $0x48] sm:$0x3f]  ;;  %v277_v4 = vld [vmem:[%s4868_s8 + $0x58] sm:$0x3f] }
  0x65   : > { %v445_v18 = vrot.slane %v4878_v10, 2  ;;  %v446_v19 = vrot.slane %v4881_v11, 2  ;;  %v363_v20 = vrot.slane %v4884_v12, 1  ;;  %v4212_v22 = vpack.i.bf16 %v4884_v12, %v4881_v11  ;;  %s4718_s7 = smov 64   ;;  %s4153_s15 = smul.u32 56, %s6512_s21 }
  0x66   : > { %4208 = vrot.lane.b32.xlu1 %v4207_v13, %s4711_s23  ;;  %v4901_v21 = vsel %vm356_vm1, %v359_v14, %v360_v15  ;;  %v364_v23 = vrot.slane %v4891_v16, 1  ;;  %v362_v26 = vsel %vm356_vm1, %v360_v15, %v4875_v8  ;;  %v449_v27 = vrot.slane %v4884_v12, 2  ;;  %4067 = vmatpush3.bf16.msra.mxu0 %v4529_v40 }
  0x67   : > { %v4217_v24 = vpack.i.bf16 %v4901_v21, %v4875_v8  ;;  %v4909_v25 = vsel %vm442_vm2, %v445_v18, %v446_v19  ;;  %v450_v30 = vrot.slane %v4891_v16, 2  ;;  %v448_v33 = vsel %vm442_vm2, %v446_v19, %v4894_v17  ;;  %4068 = vmatprep.subr.bf16.mxu0 %v4530_v45  ;;  %s6416_s17 = scalar_lea.vmem %s6469_s5, %s4153_s15 }
  0x68   : > { %v365_v29 = vsel %vm356_vm1, %v363_v20, %v364_v23  ;;  %v4222_v31 = vpack.i.bf16 %v4909_v25, %v4894_v17  ;;  %v4252_v42 = vpack.i.bf16 %v4891_v16, %v4884_v12  ;;  %v366_v43 = vsel %vm356_vm1, %v364_v23, %v4875_v8 }
  0x69   : > { %4218 = vrot.lane.b32.xlu0 %v4217_v24, %s4712_s26  ;;  %v4232_v32 = vpack.i.bf16 %v365_v29, %v362_v26  ;;  %v4923_v34 = vsel %vm442_vm2, %v449_v27, %v450_v30  ;;  %v4940_v44 = vsel %vm298_vm0, 0.0, %v305_v39  ;;  %v4943_v46 = vsel %vm298_vm0, %v305_v39, %v306_v41 }
  0x6a   : > { %4213 = vrot.lane.b32.xlu1 %v4212_v22, %s4711_s23  ;;  %v4930_v38 = vpack.i.bf16 %v4923_v34, %v448_v33  ;;  %v4242_v47 = vpack.i.bf16 %v4881_v11, %v4878_v10  ;;  %v4262_v49 = vpack.i.bf16 %v366_v43, %v365_v29  ;;  %v367_v50 = vrot.slane %v4940_v44, 1  ;;  %4069 = vmatpush3.bf16.msra.mxu0 %v4530_v45 }
  0x6b   : > { %v368_v51 = vrot.slane %v4943_v46, 1  ;;  %v308_v53 = vrot.slane %v272_v48, 6  ;;  %v4257_v54 = vpack.i.bf16 %v362_v26, %v4901_v21  ;;  %v453_v55 = vrot.slane %v4940_v44, 2 }
  0x6c   : > { %v454_v57 = vrot.slane %v4943_v46, 2  ;;  %v309_v58 = vrot.slane %v273_v52, 6  ;;  %v4267_v61 = vpack.i.bf16 %v448_v33, %v4909_v25  ;;  %v452_v0 = vsel %vm442_vm2, %v450_v30, %v4894_v17 }
  0x6d   : > { %4223 = vrot.lane.b32.xlu0 %v4222_v31, %s4713_s28  ;;  %v4958_v56 = vsel %vm356_vm1, %v367_v50, %v368_v51  ;;  %v4962_v59 = vsel %vm298_vm0, 0.0, %v308_v53  ;;  %v4277_v5 = vpack.i.bf16 %v452_v0, %v4923_v34  ;;  %v311_v9 = vrot.slane %v274_v60, 6 }
  0x6e   : > { %4233 = vrot.lane.b32.xlu1 %v4232_v32, %s4714_s20  ;;  %v4282_v63 = vpack.i.bf16 %v4958_v56, %v366_v43  ;;  %v4973_v1 = vsel %vm442_vm2, %v453_v55, %v454_v57  ;;  %v4976_v2 = vsel %vm298_vm0, %v308_v53, %v309_v58  ;;  %v371_v6 = vrot.slane %v4962_v59, 1 }
  0x6f   : > { %v4292_v13 = vpack.i.bf16 %v4973_v1, %v452_v0  ;;  %v372_v14 = vrot.slane %v4976_v2, 1  ;;  %v312_v15 = vrot.slane %v275_v62, 6  ;;  %v314_v18 = vrot.slane %v276_v3, 6  ;;  %v278_v3 = vld [vmem:[%s4868_s8 + $0x60] sm:$0xff] }
  0x70   : > { %v315_v19 = vrot.slane %v277_v4, 6  ;;  %v457_v20 = vrot.slane %v4962_v59, 2  ;;  %v4989_v21 = vsel %vm298_vm0, 0.0, %v311_v9  ;;  %v4302_v22 = vpack.i.bf16 %v4962_v59, %v4943_v46  ;;  %v279_v4 = vld [vmem:[%s4868_s8 + $0x68] sm:$0x3f] }
  0x71   : > { %4228 = vrot.lane.b32.xlu0 %v4217_v24, %s4714_s20  ;;  %v4995_v23 = vsel %vm298_vm0, %v311_v9, %v312_v15  ;;  %v4531_v24 = vld [vmem:[#allocation2 + $0x20] ss:$0 sps:$4 sm:$0xff]   ;;  %v370_v25 = vsel %vm356_vm1, %v368_v51, %v4875_v8  ;;  %v373_v26 = vsel %vm356_vm1, %v371_v6, %v372_v14  ;;  %v458_v27 = vrot.slane %v4976_v2, 2 }
  0x72   : > { %4248 = vrot.lane.b32.xlu1 %v4930_v38, %s4715_s29  ;;  %v5002_v28 = vsel %vm298_vm0, 0.0, %v314_v18  ;;  %v4297_v29 = vpack.i.bf16 %v4940_v44, %v4891_v16  ;;  %v5007_v30 = vsel %vm298_vm0, %v314_v18, %v315_v19  ;;  %v461_v33 = vrot.slane %v4989_v21, 2  ;;  %4152 = vmatprep.subr.msk.bf16.mxu0 %vm1077_vm3, %v4531_v24 }
  0x73   : > { %v462_v34 = vrot.slane %v4995_v23, 2  ;;  %v4312_v35 = vpack.i.bf16 %v373_v26, %v370_v25  ;;  %v379_v36 = vrot.slane %v5002_v28, 1  ;;  %v456_v37 = vsel %vm442_vm2, %v454_v57, %v4894_v17 }
  0x74   : > { %v459_v39 = vsel %vm442_vm2, %v457_v20, %v458_v27  ;;  %v1079_v40 = vsel %vm1077_vm3, %v4531_v24, 0  ;;  %v374_v43 = vsel %vm356_vm1, %v372_v14, %v4875_v8  ;;  %v4327_v45 = vpack.i.bf16 %v4943_v46, %v4940_v44 }
  0x75   : > { %4238 = vrot.lane.b32.xlu0 %v4222_v31, %s4715_s29  ;;  %v375_v31 = vrot.slane %v4989_v21, 1  ;;  %4071 = vmatpush3.bf16.msra.mxu0 %v1079_v40  ;;  %v4322_v41 = vpack.i.bf16 %v459_v39, %v456_v37  ;;  %v4337_v48 = vpack.i.bf16 %v370_v25, %v4958_v56  ;;  %v4347_v50 = vpack.i.bf16 %v456_v37, %v4973_v1 }
  0x76   : > { %4253 = vrot.lane.b32.xlu1 %v4252_v42, %s4716_s30  ;;  %v4332_v42 = vpack.i.bf16 %v4976_v2, %v4962_v59  ;;  %v460_v52 = vsel %vm442_vm2, %v458_v27, %v4894_v17  ;;  %v463_v53 = vsel %vm442_vm2, %v461_v33, %v462_v34  ;;  %v4382_v56 = vpack.i.bf16 %v5002_v28, %v4995_v23  ;;  %v281_v27 = vld [vmem:[%s4868_s8 + $0x78] sm:$0x3f] }
  0x77   : > { %v4372_v55 = vpack.i.bf16 %v463_v53, %v460_v52  ;;  %v465_v60 = vrot.slane %v5002_v28, 2  ;;  %v4377_v62 = vpack.i.bf16 %v4989_v21, %v4976_v2  ;;  %v464_v0 = vsel %vm442_vm2, %v462_v34, %v4894_v17 }
  0x78   : > { %v317_v6 = vrot.slane %v278_v3, 6  ;;  %v318_v9 = vrot.slane %v279_v4, 6  ;;  %v4407_v19 = vpack.i.bf16 %v4995_v23, %v4989_v21  ;;  %v321_v34 = vrot.slane %v281_v27, 6 }
  0x79   : > { %4243 = vrot.lane.b32.xlu0 %v4242_v47, %s4716_s30  ;;  %v4342_v47 = vpack.i.bf16 %v374_v43, %v373_v26  ;;  %v280_v26 = vld [vmem:[%s4868_s8 + $0x70] sm:$0xff]  ;;  %vm1046_vm12 = vcmask 588800   ;;  %vm2274_vm13 = vcmask 1043459   ;;  %vm2276_vm14 = vcmask 1044484  }
  0x7a   : > { %4263 = vrot.lane.b32.xlu1 %v4262_v49, %s4717_s6  ;;  %v5072_v15 = vsel %vm298_vm0, %v317_v6, %v318_v9  ;;  %v5075_v18 = vsel %vm298_vm0, 0.0, %v317_v6  ;;  %v320_v33 = vrot.slane %v280_v26, 6  ;;  %vm2278_vm15 = vcmask 1045509  }
  0x7b   : > { %v384_v24 = vrot.slane %v5072_v15, 1  ;;  %vm2280_vm3 = vcmask 1046534  }
  0x7c   : > { %v5099_v40 = vsel %vm298_vm0, 0.0, %v320_v33 }
  0x7d   : > { %4258 = vrot.lane.b32.xlu0 %v4257_v54, %s4717_s6  ;;  %v4357_v54 = vpack.i.bf16 %v460_v52, %v459_v39 }
  0x7e   : > { %4273 = vrot.lane.b32.xlu1 %v4232_v32, %s4712_s26  ;;  %v376_v32 = vrot.slane %v4995_v23, 1 }
  0x80   : > { %v377_v49 = vsel %vm356_vm1, %v375_v31, %v376_v32  ;;  %v378_v57 = vsel %vm356_vm1, %v376_v32, %v4875_v8  ;;  %v469_v31 = vrot.slane %v5075_v18, 2  ;;  %v470_v32 = vrot.slane %v5072_v15, 2 }
  0x81   : > { %4268 = vrot.lane.b32.xlu0 %v4267_v61, %s4718_s7  ;;  %v4362_v51 = vpack.i.bf16 %v377_v49, %v374_v43  ;;  %v466_v61 = vrot.slane %v5007_v30, 2  ;;  %v4417_v25 = vpack.i.bf16 %v378_v57, %v377_v49  ;;  %v387_v43 = vrot.slane %v5099_v40, 1 }
  0x82   : > { %4283 = vrot.lane.b32.xlu1 %v4282_v63, %s4712_s26  ;;  %v471_v39 = vsel %vm442_vm2, %v469_v31, %v470_v32  ;;  %v472_v52 = vsel %vm442_vm2, %v470_v32, %v4894_v17  ;;  %v4533_v31 = vld [vmem:[%s6467_s3] sm:$0xff]   ;;  %v4534_v32 = vld [vmem:[%s6467_s3 + $0x48] sm:$0xff]  }
  0x83   : > { %v467_v1 = vsel %vm442_vm2, %v465_v60, %v466_v61  ;;  %v468_v37 = vsel %vm442_vm2, %v466_v61, %v4894_v17  ;;  %v473_v60 = vrot.slane %v5099_v40, 2 }
  0x85   : > { %4278 = vrot.lane.b32.xlu0 %v4277_v5, %s4718_s7  ;;  %v4402_v5 = vpack.i.bf16 %v467_v1, %v464_v0 }
  0x86   : > { %4293 = vrot.lane.b32.xlu1 %v4292_v13, %s4713_s28 }
  0x89   : > { %4288 = vrot.lane.b32.xlu0 %v4930_v38, %s4713_s28  ;;  %v380_v38 = vrot.slane %v5007_v30, 1 }
  0x8a   : > { %4303 = vrot.lane.b32.xlu1 %v4302_v22, %s4711_s23  ;;  %v383_v22 = vrot.slane %v5075_v18, 1 }
  0x8b   : > { %v381_v58 = vsel %vm356_vm1, %v379_v36, %v380_v38  ;;  %v382_v14 = vsel %vm356_vm1, %v380_v38, %v4875_v8  ;;  %v5096_v38 = vsel %vm298_vm0, %v320_v33, %v321_v34 }
  0x8c   : > { %v4422_v20 = vpack.i.bf16 %v382_v14, %v381_v58  ;;  %v474_v61 = vrot.slane %v5096_v38, 2 }
  0x8d   : > { %4298 = vrot.lane.b32.xlu0 %v4297_v29, %s4711_s23  ;;  %v385_v29 = vsel %vm356_vm1, %v383_v22, %v384_v24 }
  0x8e   : > { %4313 = vrot.lane.b32.xlu1 %v4312_v35, %s4714_s20  ;;  %v4442_v36 = vpack.i.bf16 %v385_v29, %v382_v14  ;;  %v476_v3 = vsel %vm442_vm2, %v474_v61, %v4894_v17 }
  0x91   : > { %4308 = vrot.lane.b32.xlu0 %v4282_v63, %s4714_s20  ;;  %v4392_v63 = vpack.i.bf16 %v381_v58, %v378_v57 }
  0x92   : > { %4323 = vrot.lane.b32.xlu1 %v4322_v41, %s4715_s29 }
  0x95   : > { %4318 = vrot.lane.b32.xlu0 %v4292_v13, %s4715_s29  ;;  %v4412_v13 = vpack.i.bf16 %v5007_v30, %v5002_v28 }
  0x96   : > { %4333 = vrot.lane.b32.xlu1 %v4332_v42, %s4716_s30  ;;  %v4452_v42 = vpack.i.bf16 %v471_v39, %v468_v37 }
  0x99   : > { %4328 = vrot.lane.b32.xlu0 %v4327_v45, %s4716_s30  ;;  %v388_v45 = vrot.slane %v5096_v38, 1 }
  0x9a   : > { %4343 = vrot.lane.b32.xlu1 %v4342_v47, %s4717_s6  ;;  %v4462_v47 = vpack.i.bf16 %v5099_v40, %v5072_v15 }
  0x9b   : > { %v389_v49 = vsel %vm356_vm1, %v387_v43, %v388_v45 }
  0x9d   : > { %4338 = vrot.lane.b32.xlu0 %v4337_v48, %s4717_s6  ;;  %v386_v48 = vsel %vm356_vm1, %v384_v24, %v4875_v8 }
  0x9e   : > { %4353 = vrot.lane.b32.xlu1 %v4312_v35, %s4712_s26  ;;  %v4427_v35 = vpack.i.bf16 %v464_v0, %v463_v53  ;;  %v4487_v53 = vpack.i.bf16 %v5096_v38, %v5099_v40  ;;  %v4492_v58 = vpack.i.bf16 %v386_v48, %v385_v29  ;;  %v4502_v0 = vpack.i.bf16 %v472_v52, %v471_v39  ;;  %v4532_v29 = vld [vmem:[%s6467_s3 + $0x40] sm:$0xff]  }
  0x9f   : > { %3815 = vmatprep.subr.bf16.mxu1 %v4532_v29 }
  0xa0   : > { %3816 = vmatpush3.bf16.msra.mxu1 %v4533_v31 }
  0xa1   : > { %4348 = vrot.lane.b32.xlu0 %v4347_v50, %s4718_s7  ;;  %v4457_v50 = vpack.i.bf16 %v5075_v18, %v5007_v30  ;;  %3817 = vmatprep.subr.bf16.mxu1 %v4534_v32 }
  0xa2   : > { %4363 = vrot.lane.b32.xlu1 %v4362_v51, %s4712_s26 }
  0xa5   : > { %4358 = vrot.lane.b32.xlu0 %v4357_v54, %s4718_s7  ;;  %v390_v54 = vsel %vm356_vm1, %v388_v45, %v4875_v8  ;;  %v4538_v45 = vld [vmem:[%s6467_s3 + $0xc0] sm:$0xff]  }
  0xa6   : > { %4373 = vrot.lane.b32.xlu1 %v4372_v55, %s4713_s28  ;;  %3873 = vmatprep.subr.bf16.mxu0 %v4538_v45 }
  0xa9   : > { %4368 = vrot.lane.b32.xlu0 %v4322_v41, %s4713_s28  ;;  %v4437_v41 = vpack.i.bf16 %v468_v37, %v467_v1  ;;  %v475_v1 = vsel %vm442_vm2, %v473_v60, %v474_v61 }
  0xaa   : > { %4383 = vrot.lane.b32.xlu1 %v4382_v56, %s4711_s23  ;;  %v4497_v56 = vpack.i.bf16 %v390_v54, %v389_v49  ;;  %v4512_v6 = vpack.i.bf16 %v476_v3, %v475_v1  ;;  %v4517_v14 = vpack.i.bf16 %v475_v1, %v472_v52 }
  0xad   : > { %4378 = vrot.lane.b32.xlu0 %v4377_v62, %s4711_s23 }
  0xae   : > { %4393 = vrot.lane.b32.xlu1 %v4392_v63, %s4714_s20 }
  0xb1   : > { %4388 = vrot.lane.b32.xlu0 %v4362_v51, %s4714_s20  ;;  %v4472_v51 = vpack.i.bf16 %v389_v49, %v386_v48 }
  0xb2   : > { %4403 = vrot.lane.b32.xlu1 %v4402_v5, %s4715_s29 }
  0xb5   : > { %4398 = vrot.lane.b32.xlu0 %v4372_v55, %s4715_s29  ;;  %v4482_v55 = vpack.i.bf16 %v5072_v15, %v5075_v18 }
  0xb6   : > { %4413 = vrot.lane.b32.xlu1 %v4412_v13, %s4716_s30 }
  0xb9   : > { %4408 = vrot.lane.b32.xlu0 %v4407_v19, %s4716_s30 }
  0xba   : > { %4423 = vrot.lane.b32.xlu1 %v4422_v20, %s4717_s6 }
  0xbd   : > { %4418 = vrot.lane.b32.xlu0 %v4417_v25, %s4717_s6 }
  0xbe   : > { %4433 = vrot.lane.b32.xlu1 %v4392_v63, %s4712_s26 }
  0xc1   : > { %4428 = vrot.lane.b32.xlu0 %v4427_v35, %s4718_s7 }
  0xc2   : > { %4443 = vrot.lane.b32.xlu1 %v4442_v36, %s4712_s26 }
  0xc5   : > { %4438 = vrot.lane.b32.xlu0 %v4437_v41, %s4718_s7 }
  0xc6   : > { %4453 = vrot.lane.b32.xlu1 %v4452_v42, %s4713_s28 }
  0xc9   : > { %4448 = vrot.lane.b32.xlu0 %v4402_v5, %s4713_s28 }
  0xca   : > { %4463 = vrot.lane.b32.xlu1 %v4462_v47, %s4711_s23 }
  0xcd   : > { %4458 = vrot.lane.b32.xlu0 %v4457_v50, %s4711_s23 }
  0xce   : > { %4473 = vrot.lane.b32.xlu1 %v4472_v51, %s4714_s20 }
  0xd1   : > { %4468 = vrot.lane.b32.xlu0 %v4442_v36, %s4714_s20 }
  0xd2   : > { %658 = vrot.lane.b32.xlu1 %v472_v52, %s4715_s29 }
  0xd5   : > { %4478 = vrot.lane.b32.xlu0 %v4452_v42, %s4715_s29 }
  0xd6   : > { %4488 = vrot.lane.b32.xlu1 %v4487_v53, %s4716_s30 }
  0xd8   : > { %v5130_v57 = vpop.permute.xlu1 %4208 }
  0xd9   : > { %4483 = vrot.lane.b32.xlu0 %v4482_v55, %s4716_s30  ;;  %v4211_v37 = vunpack.i.h.bf16 %v5130_v57  ;;  %v5183_v39 = vunpack.i.l.bf16 %v5130_v57 }
  0xda   : > { %4498 = vrot.lane.b32.xlu1 %v4497_v56, %s4717_s6  ;;  %v4536_v56 = vld [vmem:[%s6467_s3 + $0x50] sm:$0xff]  }
  0xdb   : > { %v5136_v62 = vpop.permute.xlu0 %4218 }
  0xdc   : > { %v5138_v63 = vpop.permute.xlu1 %4213  ;;  %v4220_v22 = vunpack.i.l.bf16 %v5136_v62 }
  0xdd   : > { %4493 = vrot.lane.b32.xlu0 %v4492_v58, %s4717_s6  ;;  %v4215_v33 = vunpack.i.l.bf16 %v5138_v63 }
  0xde   : > { %4508 = vrot.lane.b32.xlu1 %v4472_v51, %s4712_s26  ;;  %v835_v27 = vsel %vm834_vm4, 0.0, %v4220_v22  ;;  %v4535_v51 = vld [vmem:[%s6467_s3 + $0x8] sm:$0xff]  }
  0xdf   : > { %v5145_v4 = vpop.permute.xlu0 %4223  ;;  %3818 = vmatpush3.bf16.msra.mxu1 %v4535_v51 }
  0xe0   : > { %v5147_v5 = vpop.permute.xlu1 %4233  ;;  %v4225_v24 = vunpack.i.l.bf16 %v5145_v4  ;;  %3819 = vmatprep.subr.bf16.mxu1 %v4536_v56  ;;  %v4539_v56 = vld [vmem:[%s6467_s3 + $0x80] sm:$0xff]  }
  0xe1   : > { %4503 = vrot.lane.b32.xlu0 %v4502_v0, %s4718_s7  ;;  %v4235_v47 = vunpack.i.l.bf16 %v5147_v5 }
  0xe2   : > { %423 = vrot.lane.b32.xlu1 %v390_v54, %s4712_s26  ;;  %v853_v34 = vsel %vm852_vm5, %v835_v27, %v4225_v24  ;;  %v4537_v27 = vld [vmem:[%s6467_s3 + $0x10] sm:$0xff]  }
  0xe3   : > { %v4229_v9 = vpop.permute.xlu0 %4228  ;;  %v871_v52 = vsel %vm870_vm6, %v853_v34, %v5183_v39  ;;  %v872_v53 = vsel %vm870_vm6, %v853_v34, %v4211_v37  ;;  %v873_v57 = vsel %vm870_vm6, %v853_v34, %v4215_v33  ;;  %v4540_v33 = vld [vmem:[%s6467_s3 + $0x58] sm:$0xff]   ;;  %3820 = vmatpush3.bf16.msra.mxu1 %v4537_v27  ;;  %v4236_v27 = vunpack.i.h.bf16 %v5147_v5 }
  0xe4   : > { %v5151_v13 = vpop.permute.xlu1 %4248  ;;  %v4231_v35 = vunpack.i.h.bf16 %v4229_v9  ;;  %v5177_v36 = vunpack.i.l.bf16 %v4229_v9  ;;  %v893_v34 = vsel %vm890_vm7, %v873_v57, %v4235_v47  ;;  %3821 = vmatprep.subr.bf16.mxu1 %v4540_v33 }
  0xe5   : > { %4513 = vrot.lane.b32.xlu0 %v4512_v6, %s4718_s7  ;;  %v4250_v61 = vunpack.i.l.bf16 %v5151_v13 }
  0xe6   : > { %509 = vrot.lane.b32.xlu1 %v476_v3, %s4713_s28  ;;  %v891_v58 = vsel %vm890_vm7, %v871_v52, %v5177_v36  ;;  %v892_v60 = vsel %vm890_vm7, %v872_v53, %v4231_v35 }
  0xe7   : > { %v4239_v19 = vpop.permute.xlu0 %4238 }
  0xe8   : > { %v5155_v20 = vpop.permute.xlu1 %4253  ;;  %v4241_v41 = vunpack.i.h.bf16 %v4239_v19  ;;  %v5185_v42 = vunpack.i.l.bf16 %v4239_v19 }
  0xe9   : > { %4518 = vrot.lane.b32.xlu0 %v4517_v14, %s4713_s28  ;;  %v4256_v3 = vunpack.i.h.bf16 %v5155_v20 }
  0xea   : > { %611 = vrot.lane.b32.xlu1 %v390_v54, %s4714_s20  ;;  %v911_v0 = vsel %vm910_vm8, %v891_v58, %v5185_v42  ;;  %v912_v1 = vsel %vm910_vm8, %v892_v60, %v4241_v41 }
  0xeb   : > { %v4244_v25 = vpop.permute.xlu0 %4243 }
  0xec   : > { %v5161_v26 = vpop.permute.xlu1 %4263  ;;  %v4246_v48 = vunpack.i.h.bf16 %v4244_v25  ;;  %v4245_v49 = vunpack.i.l.bf16 %v4244_v25 }
  0xed   : > { %560 = vrot.lane.b32.xlu0 %v5096_v38, %s4711_s23  ;;  %v4266_v29 = vunpack.i.h.bf16 %v5161_v26  ;;  %v4265_v31 = vunpack.i.l.bf16 %v5161_v26  ;;  %v913_v26 = vsel %vm910_vm8, %v893_v34, %v4250_v61 }
  0xee   : > { %713 = vrot.lane.b32.xlu1 %v6472_v7, %s4716_s30  ;;  %v931_v14 = vsel %vm930_vm9, %v911_v0, %v4245_v49  ;;  %v932_v19 = vsel %vm930_vm9, %v911_v0, %v4246_v48  ;;  %v934_v48 = vsel %vm930_vm9, %v913_v26, %v4256_v3  ;;  %v4226_v3 = vunpack.i.h.bf16 %v5145_v4 }
  0xef   : > { %v4259_v43 = vpop.permute.xlu0 %4258  ;;  %v955_v53 = vsel %vm951_vm10, %v934_v48, %v4266_v29  ;;  %v4251_v4 = vunpack.i.h.bf16 %v5151_v13 }
  0xf0   : > { %v5191_v50 = vpop.permute.xlu1 %4273  ;;  %v4261_v54 = vunpack.i.h.bf16 %v4259_v43  ;;  %v4260_v55 = vunpack.i.l.bf16 %v4259_v43 }
  0xf1   : > { %4523 = vrot.lane.b32.xlu0 %v4512_v6, %s4715_s29  ;;  %v4255_v6 = vunpack.i.l.bf16 %v5155_v20 }
  0xf2   : > { %815 = vrot.lane.b32.xlu1 %v4894_v17, %s4718_s7  ;;  %v952_v20 = vsel %vm951_vm10, %v931_v14, %v4260_v55  ;;  %v953_v32 = vsel %vm951_vm10, %v932_v19, %v4261_v54  ;;  %v4216_v19 = vunpack.i.h.bf16 %v5138_v63 }
  0xf3   : > { %v4269_v9 = vpop.permute.xlu0 %4268  ;;  %v933_v45 = vsel %vm930_vm9, %v912_v1, %v4255_v6  ;;  %v4221_v1 = vunpack.i.h.bf16 %v5136_v62 }
  0xf4   : > { %v4271_v22 = vunpack.i.h.bf16 %v4269_v9  ;;  %v4270_v24 = vunpack.i.l.bf16 %v4269_v9  ;;  %v5217_v25 = vpop.permute.xlu1 %4283  ;;  %v954_v47 = vsel %vm951_vm10, %v933_v45, %v4265_v31 }
  0xf5   : > { %764 = vrot.lane.b32.xlu0 %v4875_v8, %s4717_s6  ;;  %v836_v14 = vsel %vm834_vm4, %v4878_v10, %v4221_v1  ;;  %v4285_v29 = vunpack.i.l.bf16 %v5217_v25 }
  0xf6   : > { %v973_v35 = vsel %vm972_vm11, %v952_v20, %v4270_v24  ;;  %v974_v37 = vsel %vm972_vm11, %v953_v32, %v4271_v22  ;;  %v854_v22 = vsel %vm852_vm5, %v836_v14, %v4226_v3  ;;  %v4276_v20 = vunpack.i.h.bf16 %v5191_v50 }
  0xf7   : > { %v4279_v41 = vpop.permute.xlu0 %4278  ;;  %v993_v43 = vpack.c.bf16 %v974_v37, %v973_v35  ;;  %v874_v62 = vsel %vm870_vm6, %v854_v22, %v4216_v19  ;;  %v4275_v32 = vunpack.i.l.bf16 %v5191_v50  ;;  %v839_v5 = vsel %vm834_vm4, %v4891_v16, %v4285_v29 }
  0xf8   : > { %v4281_v49 = vunpack.i.h.bf16 %v4279_v41  ;;  %v4280_v51 = vunpack.i.l.bf16 %v4279_v41  ;;  %v5237_v52 = vpop.permute.xlu1 %4293  ;;  %v894_v34 = vsel %vm890_vm7, %v874_v62, %v4236_v27  ;;  %v838_v50 = vsel %vm834_vm4, %v4884_v12, %v4276_v20 }
  0xf9   : > { %4072 = vmatprep.mubr.msk.bf16.mxu0 %vm1046_vm12, %v993_v43  ;;  %v4295_v10 = vunpack.i.l.bf16 %v5237_v52  ;;  %v914_v41 = vsel %vm910_vm8, %v894_v34, %v4251_v4  ;;  %v837_v45 = vsel %vm834_vm4, %v4881_v11, %v4275_v32 }
  0xfa   : > { %v975_v54 = vsel %vm972_vm11, %v954_v47, %v4280_v51  ;;  %v976_v55 = vsel %vm972_vm11, %v955_v53, %v4281_v49 }
  0xfb   : > { %v994_v57 = vpack.c.bf16 %v976_v55, %v975_v54  ;;  %v4289_v58 = vpop.permute.xlu0 %4288  ;;  %v857_v51 = vsel %vm852_vm5, %v839_v5, %v4295_v10 }
  0xfc   : > { %v5247_v60 = vpop.permute.xlu1 %4303  ;;  %v4291_v33 = vunpack.i.h.bf16 %v4289_v58  ;;  %v4290_v35 = vunpack.i.l.bf16 %v4289_v58 }
  0xfd   : > { %4073 = vmatmul.mubr.msk.bf16.vlgmr.msra.gmra.mrb[0].mxu0 %vm1046_vm12, %v994_v57  ;;  %v4305_v37 = vunpack.i.l.bf16 %v5247_v60 }
  0xfe   : > { %3874 = vmatpush3.bf16.msra.mxu0 %v4539_v56  ;;  %v856_v16 = vsel %vm852_vm5, %v838_v50, %v4291_v33  ;;  %v855_v55 = vsel %vm852_vm5, %v837_v45, %v4290_v35 }
  0xff   : > { %v4299_v61 = vpop.permute.xlu0 %4298  ;;  %v877_v56 = vsel %vm870_vm6, %v857_v51, %v4305_v37 }
 0x100   : > { %v5250_v0 = vpop.permute.xlu1 %4313  ;;  %v4301_v13 = vunpack.i.h.bf16 %v4299_v61  ;;  %v4300_v43 = vunpack.i.l.bf16 %v4299_v61 }
 0x102   : > { %v875_v12 = vsel %vm870_vm6, %v855_v55, %v4300_v43  ;;  %v876_v11 = vsel %vm870_vm6, %v856_v16, %v4301_v13 }
 0x103   : > { %v4309_v6 = vpop.permute.xlu0 %4308 }
 0x104   : > { %v5254_v9 = vpop.permute.xlu1 %4323  ;;  %v4311_v48 = vunpack.i.h.bf16 %v4309_v6  ;;  %v4310_v49 = vunpack.i.l.bf16 %v4309_v6  ;;  %v4315_v6 = vunpack.i.l.bf16 %v5250_v0 }
 0x105   : > { %v4325_v22 = vunpack.i.l.bf16 %v5254_v9 }
 0x106   : > { %v895_v14 = vsel %vm890_vm7, %v875_v12, %v4310_v49  ;;  %v896_v19 = vsel %vm890_vm7, %v876_v11, %v4311_v48  ;;  %v897_v13 = vsel %vm890_vm7, %v877_v56, %v4315_v6 }
 0x107   : > { %v4319_v24 = vpop.permute.xlu0 %4318 }
 0x108   : > { %v4334_v31 = vpop.permute.xlu1 %4333  ;;  %v4321_v47 = vunpack.i.h.bf16 %v4319_v24  ;;  %v4320_v53 = vunpack.i.l.bf16 %v4319_v24 }
 0x109   : > { %v4336_v29 = vunpack.i.h.bf16 %v4334_v31  ;;  %v4335_v62 = vunpack.i.l.bf16 %v4334_v31 }
 0x10a   : > { %v915_v24 = vsel %vm910_vm8, %v895_v14, %v4320_v53  ;;  %v916_v27 = vsel %vm910_vm8, %v896_v19, %v4321_v47  ;;  %v4296_v14 = vunpack.i.h.bf16 %v5237_v52 }
 0x10b   : > { %v4329_v63 = vpop.permute.xlu0 %4328  ;;  %v937_v48 = vsel %vm930_vm9, %v916_v27, %v4335_v62  ;;  %v4316_v27 = vunpack.i.h.bf16 %v5250_v0 }
 0x10c   : > { %v4344_v26 = vpop.permute.xlu1 %4343  ;;  %v4331_v57 = vunpack.i.h.bf16 %v4329_v63  ;;  %v4330_v58 = vunpack.i.l.bf16 %v4329_v63 }
 0x10d   : > { %v4346_v34 = vunpack.i.h.bf16 %v4344_v26  ;;  %v4345_v5 = vunpack.i.l.bf16 %v4344_v26 }
 0x10e   : > { %v935_v20 = vsel %vm930_vm9, %v914_v41, %v4330_v58  ;;  %v936_v32 = vsel %vm930_vm9, %v915_v24, %v4331_v57  ;;  %v917_v41 = vsel %vm910_vm8, %v897_v13, %v4325_v22  ;;  %v4306_v22 = vunpack.i.h.bf16 %v5247_v60 }
 0x10f   : > { %v4339_v54 = vpop.permute.xlu0 %4338  ;;  %v938_v49 = vsel %vm930_vm9, %v917_v41, %v4336_v29  ;;  %v958_v47 = vsel %vm951_vm10, %v937_v48, %v4345_v5 }
 0x110   : > { %v5280_v61 = vpop.permute.xlu1 %4353  ;;  %v4341_v1 = vunpack.i.h.bf16 %v4339_v54  ;;  %v4340_v3 = vunpack.i.l.bf16 %v4339_v54  ;;  %v959_v53 = vsel %vm951_vm10, %v938_v49, %v4346_v34 }
 0x112   : > { %v956_v35 = vsel %vm951_vm10, %v935_v20, %v4340_v3  ;;  %v957_v37 = vsel %vm951_vm10, %v936_v32, %v4341_v1  ;;  %v4286_v1 = vunpack.i.h.bf16 %v5217_v25  ;;  %v4356_v20 = vunpack.i.h.bf16 %v5280_v61 }
 0x113   : > { %v4349_v4 = vpop.permute.xlu0 %4348  ;;  %v4355_v32 = vunpack.i.l.bf16 %v5280_v61 }
 0x114   : > { %v4351_v10 = vunpack.i.h.bf16 %v4349_v4  ;;  %v4350_v33 = vunpack.i.l.bf16 %v4349_v4  ;;  %v5292_v63 = vpop.permute.xlu1 %4363  ;;  %v840_v19 = vsel %vm834_vm4, %v4940_v44, %v4286_v1  ;;  %v4326_v4 = vunpack.i.h.bf16 %v5254_v9 }
 0x115   : > { %v4365_v29 = vunpack.i.l.bf16 %v5292_v63  ;;  %v858_v25 = vsel %vm852_vm5, %v840_v19, %v4296_v14  ;;  %v842_v61 = vsel %vm834_vm4, %v4962_v59, %v4356_v20 }
 0x116   : > { %v977_v43 = vsel %vm972_vm11, %v956_v35, %v4350_v33  ;;  %v978_v31 = vsel %vm972_vm11, %v957_v37, %v4351_v10  ;;  %v878_v52 = vsel %vm870_vm6, %v858_v25, %v4306_v22 }
 0x117   : > { %v995_v50 = vpack.c.bf16 %v978_v31, %v977_v43  ;;  %v4359_v45 = vpop.permute.xlu0 %4358  ;;  %v898_v33 = vsel %vm890_vm7, %v878_v52, %v4316_v27  ;;  %v843_v0 = vsel %vm834_vm4, %v4976_v2, %v4365_v29  ;;  %v841_v43 = vsel %vm834_vm4, %v4943_v46, %v4355_v32 }
 0x118   : > { %v4361_v51 = vunpack.i.h.bf16 %v4359_v45  ;;  %v4360_v26 = vunpack.i.l.bf16 %v4359_v45  ;;  %v5302_v16 = vpop.permute.xlu1 %4373  ;;  %v918_v35 = vsel %vm910_vm8, %v898_v33, %v4326_v4 }
 0x119   : > { %4076 = vmatprep.mubr.msk.bf16.mxu0 %vm1046_vm12, %v995_v50  ;;  %v4375_v44 = vunpack.i.l.bf16 %v5302_v16 }
 0x11a   : > { %v980_v54 = vsel %vm972_vm11, %v959_v53, %v4361_v51  ;;  %v979_v55 = vsel %vm972_vm11, %v958_v47, %v4360_v26 }
 0x11b   : > { %v996_v56 = vpack.c.bf16 %v980_v54, %v979_v55  ;;  %v4369_v57 = vpop.permute.xlu0 %4368  ;;  %v861_v50 = vsel %vm852_vm5, %v843_v0, %v4375_v44 }
 0x11c   : > { %v5309_v58 = vpop.permute.xlu1 %4383  ;;  %v4371_v10 = vunpack.i.h.bf16 %v4369_v57  ;;  %v4370_v34 = vunpack.i.l.bf16 %v4369_v57 }
 0x11d   : > { %4077 = vmatmul.mubr.msk.bf16.gmra.mrb[4].mxu0 %vm1046_vm12, %v996_v56  ;;  %v4385_v9 = vunpack.i.l.bf16 %v5309_v58 }
 0x11e   : > { %v860_v2 = vsel %vm852_vm5, %v842_v61, %v4371_v10  ;;  %v859_v51 = vsel %vm852_vm5, %v841_v43, %v4370_v34 }
 0x11f   : > { %v4379_v12 = vpop.permute.xlu0 %4378  ;;  %v881_v26 = vsel %vm870_vm6, %v861_v50, %v4385_v9 }
 0x120   : > { %v5312_v11 = vpop.permute.xlu1 %4393  ;;  %v4381_v37 = vunpack.i.h.bf16 %v4379_v12  ;;  %v4380_v13 = vunpack.i.l.bf16 %v4379_v12 }
 0x121   : > { %v4395_v57 = vunpack.i.l.bf16 %v5312_v11 }
 0x122   : > { %v879_v59 = vsel %vm870_vm6, %v859_v51, %v4380_v13  ;;  %v880_v46 = vsel %vm870_vm6, %v860_v2, %v4381_v37 }
 0x123   : > { %v4389_v3 = vpop.permute.xlu0 %4388  ;;  %v901_v33 = vsel %vm890_vm7, %v881_v26, %v4395_v57 }
 0x124   : > { %v5315_v6 = vpop.permute.xlu1 %4403  ;;  %v4391_v31 = vunpack.i.h.bf16 %v4389_v3  ;;  %v4390_v41 = vunpack.i.l.bf16 %v4389_v3 }
 0x125   : > { %v4405_v3 = vunpack.i.l.bf16 %v5315_v6 }
 0x126   : > { %v899_v12 = vsel %vm890_vm7, %v879_v59, %v4390_v41  ;;  %v900_v1 = vsel %vm890_vm7, %v880_v46, %v4391_v31  ;;  %v4376_v46 = vunpack.i.h.bf16 %v5302_v16 }
 0x127   : > { %v4399_v24 = vpop.permute.xlu0 %4398  ;;  %v921_v34 = vsel %vm910_vm8, %v901_v33, %v4405_v3 }
 0x128   : > { %v4414_v62 = vpop.permute.xlu1 %4413  ;;  %v4401_v45 = vunpack.i.h.bf16 %v4399_v24  ;;  %v4400_v48 = vunpack.i.l.bf16 %v4399_v24 }
 0x129   : > { %v4416_v22 = vunpack.i.h.bf16 %v4414_v62  ;;  %v4415_v24 = vunpack.i.l.bf16 %v4414_v62 }
 0x12a   : > { %v919_v14 = vsel %vm910_vm8, %v899_v12, %v4400_v48  ;;  %v920_v19 = vsel %vm910_vm8, %v900_v1, %v4401_v45  ;;  %v4396_v12 = vunpack.i.h.bf16 %v5312_v11 }
 0x12b   : > { %v4409_v60 = vpop.permute.xlu0 %4408  ;;  %v941_v37 = vsel %vm930_vm9, %v920_v19, %v4415_v24  ;;  %v942_v13 = vsel %vm930_vm9, %v921_v34, %v4416_v22 }
 0x12c   : > { %v4424_v5 = vpop.permute.xlu1 %4423  ;;  %v4411_v47 = vunpack.i.h.bf16 %v4409_v60  ;;  %v4410_v53 = vunpack.i.l.bf16 %v4409_v60 }
 0x12d   : > { %v4426_v52 = vunpack.i.h.bf16 %v4424_v5  ;;  %v4425_v44 = vunpack.i.l.bf16 %v4424_v5 }
 0x12e   : > { %v939_v29 = vsel %vm930_vm9, %v918_v35, %v4410_v53  ;;  %v940_v4 = vsel %vm930_vm9, %v919_v14, %v4411_v47  ;;  %v4366_v47 = vunpack.i.h.bf16 %v5292_v63 }
 0x12f   : > { %v4419_v49 = vpop.permute.xlu0 %4418  ;;  %v962_v31 = vsel %vm951_vm10, %v941_v37, %v4425_v44  ;;  %v963_v41 = vsel %vm951_vm10, %v942_v13, %v4426_v52 }
 0x130   : > { %v5342_v54 = vpop.permute.xlu1 %4433  ;;  %v4421_v55 = vunpack.i.h.bf16 %v4419_v49  ;;  %v4420_v56 = vunpack.i.l.bf16 %v4419_v49 }
 0x131   : > { %v4436_v14 = vunpack.i.h.bf16 %v5342_v54  ;;  %v4435_v19 = vunpack.i.l.bf16 %v5342_v54 }
 0x132   : > { %v960_v10 = vsel %vm951_vm10, %v939_v29, %v4420_v56  ;;  %v961_v60 = vsel %vm951_vm10, %v940_v4, %v4421_v55  ;;  %v844_v55 = vsel %vm834_vm4, %v4989_v21, %v4366_v47  ;;  %v4386_v56 = vunpack.i.h.bf16 %v5309_v58 }
 0x133   : > { %v4429_v27 = vpop.permute.xlu0 %4428  ;;  %v862_v63 = vsel %vm852_vm5, %v844_v55, %v4376_v46  ;;  %v846_v54 = vsel %vm834_vm4, %v5002_v28, %v4436_v14  ;;  %v845_v44 = vsel %vm834_vm4, %v4995_v23, %v4435_v19 }
 0x134   : > { %v4431_v25 = vunpack.i.h.bf16 %v4429_v27  ;;  %v4430_v20 = vunpack.i.l.bf16 %v4429_v27  ;;  %v5354_v32 = vpop.permute.xlu1 %4443  ;;  %v882_v16 = vsel %vm870_vm6, %v862_v63, %v4386_v56 }
 0x135   : > { %v4445_v1 = vunpack.i.l.bf16 %v5354_v32  ;;  %v902_v58 = vsel %vm890_vm7, %v882_v16, %v4396_v12 }
 0x136   : > { %v981_v0 = vsel %vm972_vm11, %v960_v10, %v4430_v20  ;;  %v982_v62 = vsel %vm972_vm11, %v961_v60, %v4431_v25  ;;  %v4406_v25 = vunpack.i.h.bf16 %v5315_v6 }
 0x137   : > { %v997_v9 = vpack.c.bf16 %v982_v62, %v981_v0  ;;  %v4439_v35 = vpop.permute.xlu0 %4438  ;;  %v847_v11 = vsel %vm834_vm4, %v5007_v30, %v4445_v1  ;;  %v4541_v30 = vld [vmem:[%s6467_s3 + $0x18] sm:$0xff]  }
 0x138   : > { %v4441_v61 = vunpack.i.h.bf16 %v4439_v35  ;;  %v4440_v5 = vunpack.i.l.bf16 %v4439_v35  ;;  %v5364_v43 = vpop.permute.xlu1 %4453  ;;  %3822 = vmatpush3.bf16.msra.mxu1 %v4541_v30 }
 0x139   : > { %4080 = vmatprep.mubr.msk.bf16.mxu0 %vm1046_vm12, %v997_v9  ;;  %v4455_v22 = vunpack.i.l.bf16 %v5364_v43 }
 0x13a   : > { %v984_v50 = vsel %vm972_vm11, %v963_v41, %v4441_v61  ;;  %v983_v2 = vsel %vm972_vm11, %v962_v31, %v4440_v5 }
 0x13b   : > { %v998_v45 = vpack.c.bf16 %v984_v50, %v983_v2  ;;  %v4449_v48 = vpop.permute.xlu0 %4448  ;;  %v865_v0 = vsel %vm852_vm5, %v847_v11, %v4455_v22  ;;  %v4542_v50 = vld [vmem:[%s6467_s3 + $0xc8] sm:$0xff]   ;;  %v922_v2 = vsel %vm910_vm8, %v902_v58, %v4406_v25 }
 0x13c   : > { %v5371_v49 = vpop.permute.xlu1 %4463  ;;  %v4451_v21 = vunpack.i.h.bf16 %v4449_v48  ;;  %v4450_v27 = vunpack.i.l.bf16 %v4449_v48  ;;  %3875 = vmatprep.subr.bf16.mxu0 %v4542_v50 }
 0x13d   : > { %4081 = vmatmul.mubr.msk.bf16.gmra.mrb[8].mxu0 %vm1046_vm12, %v998_v45  ;;  %v4465_v29 = vunpack.i.l.bf16 %v5371_v49 }
 0x13e   : > { %v864_v6 = vsel %vm852_vm5, %v846_v54, %v4451_v21  ;;  %v863_v9 = vsel %vm852_vm5, %v845_v44, %v4450_v27 }
 0x13f   : > { %v4459_v51 = vpop.permute.xlu0 %4458  ;;  %v885_v35 = vsel %vm870_vm6, %v865_v0, %v4465_v29 }
 0x140   : > { %v5374_v26 = vpop.permute.xlu1 %4473  ;;  %v4461_v20 = vunpack.i.h.bf16 %v4459_v51  ;;  %v4460_v52 = vunpack.i.l.bf16 %v4459_v51 }
 0x141   : > { %v4475_v10 = vunpack.i.l.bf16 %v5374_v26  ;;  %v4476_v50 = vunpack.i.h.bf16 %v5374_v26 }
 0x142   : > { %v883_v61 = vsel %vm870_vm6, %v863_v9, %v4460_v52  ;;  %v884_v5 = vsel %vm870_vm6, %v864_v6, %v4461_v20 }
 0x143   : > { %v4469_v53 = vpop.permute.xlu0 %4468  ;;  %v905_v51 = vsel %vm890_vm7, %v885_v35, %v4475_v10 }
 0x144   : > { %v5377_v59 = vpop.permute.xlu1 %658  ;;  %v4471_v60 = vunpack.i.h.bf16 %v4469_v53  ;;  %v4470_v33 = vunpack.i.l.bf16 %v4469_v53 }
 0x146   : > { %v903_v45 = vsel %vm890_vm7, %v883_v61, %v4470_v33  ;;  %v904_v48 = vsel %vm890_vm7, %v884_v5, %v4471_v60 }
 0x147   : > { %v4479_v57 = vpop.permute.xlu0 %4478 }
 0x148   : > { %v5385_v3 = vpop.permute.xlu1 %4488  ;;  %v4481_v62 = vunpack.i.h.bf16 %v4479_v57  ;;  %v4480_v34 = vunpack.i.l.bf16 %v4479_v57 }
 0x149   : > { %v4491_v46 = vunpack.i.h.bf16 %v5385_v3  ;;  %v4490_v55 = vunpack.i.l.bf16 %v5385_v3  ;;  %v925_v3 = vsel %vm910_vm8, %v905_v51, %v5377_v59 }
 0x14a   : > { %v923_v47 = vsel %vm910_vm8, %v903_v45, %v4480_v34  ;;  %v924_v53 = vsel %vm910_vm8, %v904_v48, %v4481_v62  ;;  %v4446_v62 = vunpack.i.h.bf16 %v5354_v32  ;;  %v4456_v32 = vunpack.i.h.bf16 %v5364_v43 }
 0x14b   : > { %v4484_v24 = vpop.permute.xlu0 %4483  ;;  %v945_v29 = vsel %vm930_vm9, %v924_v53, %v4490_v55  ;;  %v946_v25 = vsel %vm930_vm9, %v925_v3, %v4491_v46  ;;  %v4544_v55 = vld [vmem:[%s6467_s3 + $0x60] sm:$0xff]  }
 0x14c   : > { %v4499_v4 = vpop.permute.xlu1 %4498  ;;  %v4486_v23 = vunpack.i.h.bf16 %v4484_v24  ;;  %v4485_v37 = vunpack.i.l.bf16 %v4484_v24  ;;  %3823 = vmatprep.subr.bf16.mxu1 %v4544_v55 }
 0x14d   : > { %v4501_v19 = vunpack.i.h.bf16 %v4499_v4  ;;  %v4500_v16 = vunpack.i.l.bf16 %v4499_v4 }
 0x14e   : > { %v943_v57 = vsel %vm930_vm9, %v922_v2, %v4485_v37  ;;  %v944_v12 = vsel %vm930_vm9, %v923_v47, %v4486_v23 }
 0x14f   : > { %v4494_v28 = vpop.permute.xlu0 %4493  ;;  %v966_v52 = vsel %vm951_vm10, %v945_v29, %v4500_v16  ;;  %v967_v44 = vsel %vm951_vm10, %v946_v25, %v4501_v19 }
 0x150   : > { %v4509_v13 = vpop.permute.xlu1 %4508  ;;  %v4496_v31 = vunpack.i.h.bf16 %v4494_v28  ;;  %v4495_v41 = vunpack.i.l.bf16 %v4494_v28 }
 0x151   : > { %v4511_v10 = vunpack.i.h.bf16 %v4509_v13  ;;  %v4510_v60 = vunpack.i.l.bf16 %v4509_v13  ;;  %v4543_v13 = vld [vmem:[%s6467_s3 + $0x88] sm:$0xff]  }
 0x152   : > { %v964_v22 = vsel %vm951_vm10, %v943_v57, %v4495_v41  ;;  %v965_v21 = vsel %vm951_vm10, %v944_v12, %v4496_v31  ;;  %v848_v31 = vsel %vm834_vm4, %v5075_v18, %v4446_v62  ;;  %v4466_v41 = vunpack.i.h.bf16 %v5371_v49  ;;  %3876 = vmatpush3.bf16.msra.mxu0 %v4543_v13  ;;  %v4557_v62 = vld [vmem:[%s6467_s3 + $0x38] sm:$0xff]  }
 0x153   : > { %v4504_v56 = vpop.permute.xlu0 %4503  ;;  %v850_v35 = vsel %vm834_vm4, %v5099_v40, %v4511_v10  ;;  %v849_v37 = vsel %vm834_vm4, %v5072_v15, %v4510_v60  ;;  %v866_v48 = vsel %vm852_vm5, %v848_v31, %v4456_v32  ;;  %v4550_v10 = vld [vmem:[%s6467_s3 + $0xd8] sm:$0xff]   ;;  %v5559_v32 = vpack.c.bf16 %v4894_v17, %v4894_v17 }
 0x154   : > { %v4506_v1 = vunpack.i.h.bf16 %v4504_v56  ;;  %v4505_v14 = vunpack.i.l.bf16 %v4504_v56  ;;  %v424_v63 = vpop.permute.xlu1 %423  ;;  %v886_v49 = vsel %vm870_vm6, %v866_v48, %v4466_v41  ;;  %v4551_v60 = vld [vmem:[%s6467_s3 + $0x98] sm:$0xff]  }
 0x155   : > { %v851_v59 = vsel %vm834_vm4, %v5096_v38, %v424_v63  ;;  %v906_v26 = vsel %vm890_vm7, %v886_v49, %v4476_v50  ;;  %v4563_v13 = vld [vmem:[%s6467_s3 + $0xb8] sm:$0xff]   ;;  %vm2282_vm4 = vcmask 1047559  }
 0x156   : > { %v985_v24 = vsel %vm972_vm11, %v964_v22, %v4505_v14  ;;  %v986_v58 = vsel %vm972_vm11, %v965_v21, %v4506_v1  ;;  %v4545_v1 = vld [vmem:[%s6467_s3 + $0x20] sm:$0xff]   ;;  %v4546_v21 = vld [vmem:[%s6467_s3 + $0xd0] sm:$0xff]  }
 0x157   : > { %v999_v11 = vpack.c.bf16 %v986_v58, %v985_v24  ;;  %v4514_v27 = vpop.permute.xlu0 %4513  ;;  %3824 = vmatpush3.bf16.msra.mxu1 %v4545_v1  ;;  %3877 = vmatprep.subr.bf16.mxu0 %v4546_v21 }
 0x158   : > { %v4516_v54 = vunpack.i.h.bf16 %v4514_v27  ;;  %v4515_v20 = vunpack.i.l.bf16 %v4514_v27  ;;  %v510_v4 = vpop.permute.xlu1 %509 }
 0x159   : > { %4084 = vmatprep.mubr.msk.bf16.mxu0 %vm1046_vm12, %v999_v11  ;;  %v869_v23 = vsel %vm852_vm5, %v851_v59, %v510_v4  ;;  %v4547_v11 = vld [vmem:[%s6467_s3 + $0x90] sm:$0xff]  }
 0x15a   : > { %v988_v33 = vsel %vm972_vm11, %v967_v44, %v4516_v54  ;;  %v987_v30 = vsel %vm972_vm11, %v966_v52, %v4515_v20  ;;  %v889_v15 = vsel %vm870_vm6, %v869_v23, %v5183_v39  ;;  %v4548_v20 = vld [vmem:[%s6467_s3 + $0x68] sm:$0xff]   ;;  %3878 = vmatpush3.bf16.msra.mxu0 %v4547_v11  ;;  %v4552_v59 = vld [vmem:[%s6467_s3 + $0x70] sm:$0xff]  }
 0x15b   : > { %v1000_v0 = vpack.c.bf16 %v988_v33, %v987_v30  ;;  %v4519_v6 = vpop.permute.xlu0 %4518  ;;  %v909_v51 = vsel %vm890_vm7, %v889_v15, %v5177_v36  ;;  %v4549_v44 = vld [vmem:[%s6467_s3 + $0x28] sm:$0xff]   ;;  %3825 = vmatprep.subr.bf16.mxu1 %v4548_v20  ;;  %3879 = vmatprep.subr.bf16.mxu0 %v4550_v10  ;;  %v4553_v33 = vld [vmem:[%s6467_s3 + $0x30] sm:$0xff]   ;;  %v4554_v30 = vld [vmem:[%s6467_s3 + $0xe0] sm:$0xff]  }
 0x15c   : > { %v4521_v34 = vunpack.i.h.bf16 %v4519_v6  ;;  %v4520_v28 = vunpack.i.l.bf16 %v4519_v6  ;;  %v612_v9 = vpop.permute.xlu1 %611  ;;  %v929_v57 = vsel %vm910_vm8, %v909_v51, %v5185_v42  ;;  %3826 = vmatpush3.bf16.msra.mxu1 %v4549_v44  ;;  %v4556_v6 = vld [vmem:[%s6467_s3 + $0x78] sm:$0xff]   ;;  %v4560_v23 = vld [vmem:[%s6467_s3 + $0xf0] sm:$0xff]   ;;  %v5563_v15 = vld [vmem:[#allocation4] ss:$0 sm:$0xff] }
 0x15d   : > { %4085 = vmatmul.mubr.msk.bf16.gmra.mrb[12].mxu0 %vm1046_vm12, %v1000_v0  ;;  %3827 = vmatprep.subr.bf16.mxu1 %v4552_v59  ;;  %v4555_v0 = vld [vmem:[%s6467_s3 + $0xa0] sm:$0xff]  }
 0x15e   : > { %v868_v38 = vsel %vm852_vm5, %v850_v35, %v4521_v34  ;;  %v867_v40 = vsel %vm852_vm5, %v849_v37, %v4520_v28  ;;  %3880 = vmatpush3.bf16.msra.mxu0 %v4551_v60  ;;  %v4558_v34 = vld [vmem:[%s6467_s3 + $0xe8] sm:$0xff]   ;;  %v5536_v28 = vpack.c.bf16 %v4875_v8, %v4875_v8  ;;  %v6474_v35 = vmov 0.0|0.0   ;;  %v4562_v37 = vld [vmem:[%s6467_s3 + $0xf8] sm:$0xff]  }
 0x15f   : > { %v888_v61 = vsel %vm870_vm6, %v868_v38, %v5183_v39  ;;  %v561_v5 = vpop.permute.xlu0 %560  ;;  %3881 = vmatprep.subr.bf16.mxu0 %v4554_v30  ;;  %v4561_v38 = vld [vmem:[%s6467_s3 + $0xb0] sm:$0xff]   ;;  %vm2284_vm5 = vcmask 1041409  }
 0x160   : > { %v908_v43 = vsel %vm890_vm7, %v888_v61, %v5177_v36  ;;  %v887_v2 = vsel %vm870_vm6, %v867_v40, %v561_v5  ;;  %v714_v45 = vpop.permute.xlu1 %713  ;;  %3828 = vmatpush3.bf16.msra.mxu1 %v4553_v33  ;;  %3035 = vmatprep.mubr.bf16.mxu1 %v5536_v28  ;;  %v4720_v61 = vmov 1983009808   ;;  %v1218_v40 = vlaneseq  ;;  %vm5643_vm6 = vmneg %vm298_vm0 }
 0x161   : > { %v928_v39 = vsel %vm910_vm8, %v908_v43, %v5185_v42  ;;  %v907_v46 = vsel %vm890_vm7, %v887_v2, %v612_v9  ;;  %v950_v22 = vsel %vm930_vm9, %v929_v57, %v714_v45  ;;  %3829 = vmatprep.subr.bf16.mxu1 %v4556_v6  ;;  %v4559_v9 = vld [vmem:[%s6467_s3 + $0xa8] sm:$0xff]   ;;  %v1216_v5 = vunpack.c.l.s4 %v4720_v61  ;;  %vm5656_vm7 = vmpackc.low %vm298_vm0, %vm5643_vm6 }
 0x162   : > { %v949_v16 = vsel %vm930_vm9, %v928_v39, %v714_v45  ;;  %3882 = vmatpush3.bf16.msra.mxu0 %v4555_v0  ;;  %v1219_v41 = vshrl.u32 %v1218_v40, 7 }
 0x163   : > { %v4524_v18 = vpop.permute.xlu0 %4523  ;;  %3883 = vmatprep.subr.bf16.mxu0 %v4558_v34  ;;  %v1217_v31 = vunpack.c.0.s8 %v1216_v5 }
 0x164   : > { %v4526_v47 = vunpack.i.h.bf16 %v4524_v18  ;;  %v4525_v53 = vunpack.i.l.bf16 %v4524_v18  ;;  %v816_v12 = vpop.permute.xlu1 %815  ;;  %3830 = vmatpush3.bf16.msra.mxu1 %v4557_v62 }
 0x165   : > { %v5565_v50 = vsub.s32 %v1217_v31, %v1219_v41 }
 0x166   : > { %v926_v56 = vsel %vm910_vm8, %v906_v26, %v4525_v53  ;;  %v927_v36 = vsel %vm910_vm8, %v907_v46, %v4526_v47  ;;  %3884 = vmatpush3.bf16.msra.mxu0 %v4559_v9 }
 0x167   : > { %v765_v14 = vpop.permute.xlu0 %764  ;;  %v947_v63 = vsel %vm930_vm9, %v926_v56, %v714_v45  ;;  %v948_v19 = vsel %vm930_vm9, %v927_v36, %v714_v45  ;;  %3036 = vmatmul.mubr.bf16.vlgmr.msra.gmra.mrb[0].mxu1 %v6474_v35  ;;  %3885 = vmatprep.subr.bf16.mxu0 %v4560_v23 }
 0x168   : > { %v968_v42 = vsel %vm951_vm10, %v947_v63, %v765_v14  ;;  %v969_v24 = vsel %vm951_vm10, %v948_v19, %v765_v14  ;;  %v970_v58 = vsel %vm951_vm10, %v949_v16, %v765_v14  ;;  %v971_v3 = vsel %vm951_vm10, %v950_v22, %v765_v14  ;;  %3043 = vmatprep.mubr.bf16.mxu1 %v5536_v28 }
 0x169   : > { %v989_v27 = vsel %vm972_vm11, %v968_v42, %v816_v12  ;;  %v990_v29 = vsel %vm972_vm11, %v969_v24, %v816_v12  ;;  %v991_v25 = vsel %vm972_vm11, %v970_v58, %v816_v12  ;;  %v992_v54 = vsel %vm972_vm11, %v971_v3, %v816_v12 }
 0x16a   : > { %v1001_v4 = vpack.c.bf16 %v990_v29, %v989_v27  ;;  %v1002_v52 = vpack.c.bf16 %v992_v54, %v991_v25  ;;  %3886 = vmatpush3.bf16.msra.mxu0 %v4561_v38 }
 0x16b   : > { %3887 = vmatprep.subr.bf16.mxu0 %v4562_v37 }
 0x16c   : > { %4088 = vmatprep.mubr.msk.bf16.mxu0 %vm1046_vm12, %v1001_v4 }
 0x16d   : > { %4089 = vmatmul.mubr.msk.bf16.gmra.mrb[16].mxu0 %vm1046_vm12, %v1002_v52 }
 0x16e   : > { %3124 = vmatprep.mubr.bf16.mxu0 %v6474_v35  ;;  %3888 = vmatpush3.bf16.msra.mxu0 %v4563_v13 }
 0x16f   : > { %3044 = vmatmul.mubr.bf16.gmra.mrb[4].mxu1 %v6474_v35 }
 0x175   : > { %3125 = vmatmul.mubr.bf16.vlgmr.msra.gmra.mrb[20].mxu0 %v5559_v32 }
 0x1d0   : > { %v4074_v43 = vpop.f32.mrb[0].mxu0 }
 0x1d1   : > { %v1124_v2 = vadd.f32 %v4074_v43, %v5563_v15  ;;  %v1115_v45 = vpop.f32.mrb[1].mxu0 }
 0x1d2   : > { %v1116_v48 = vadd.f32 %v5563_v15, %v1115_v45  ;;  %v4075_v51 = vpop.f32.mrb[2].mxu0 }
 0x1d3   : > { %v1248_v18 = vcombine.high %v1124_v2, %v1124_v2  ;;  %v1255_v49 = vrot.slane %v1124_v2, %v5565_v50  ;;  %v5571_v47 = vadd.f32 %v4075_v51, %v5563_v15  ;;  %v1118_v53 = vpop.f32.mrb[3].mxu0 }
 0x1d4   : > { %v1214_v39 = vcombine.high %v1116_v48, %v1116_v48  ;;  %v1221_v26 = vrot.slane %v1116_v48, %v5565_v50  ;;  %v5575_v46 = vadd.f32 %v5563_v15, %v1118_v53 }
 0x1d5   : > { %v1262_v55 = vrot.slane %v1248_v18, %v5565_v50  ;;  %v1263_v56 = vcombine.high %v1255_v49, %v1255_v49  ;;  %v1690_v36 = vsel %vm298_vm0, %v1255_v49, -inf  ;;  %v1265_v57 = vcombine.high %v5571_v47, %v5571_v47 }
 0x1d6   : > { %v1691_v12 = vrot.slane %v1690_v36, 4  ;;  %v1228_v1 = vrot.slane %v1214_v39, %v5565_v50  ;;  %v1229_v14 = vcombine.high %v1221_v26, %v1221_v26  ;;  %v1634_v63 = vsel %vm298_vm0, %v1221_v26, -inf }
 0x1d7   : > { %v1264_v19 = vcombine.high %v1262_v55, %v1262_v55  ;;  %v1697_v16 = vsel %vm298_vm0, %v1263_v56, -inf  ;;  %v1704_v22 = vsel %vm298_vm0, %v1262_v55, -inf  ;;  %v1635_v21 = vrot.slane %v1634_v63, 4 }
 0x1d8   : > { %v1692_v42 = vmax.f32 %v1690_v36, %v1691_v12  ;;  %v1698_v24 = vrot.slane %v1697_v16, 4  ;;  %v1705_v58 = vrot.slane %v1704_v22, 4  ;;  %v1230_v3 = vcombine.high %v1228_v1, %v1228_v1 }
 0x1d9   : > { %v1711_v11 = vsel %vm298_vm0, %v1264_v19, -inf  ;;  %v1636_v27 = vmax.f32 %v1634_v63, %v1635_v21  ;;  %v1641_v29 = vsel %vm298_vm0, %v1229_v14, -inf  ;;  %v1648_v25 = vsel %vm298_vm0, %v1228_v1, -inf }
 0x1da   : > { %v1693_v54 = vrot.slane %v1692_v42, 2  ;;  %v1699_v20 = vmax.f32 %v1697_v16, %v1698_v24  ;;  %v1706_v4 = vmax.f32 %v1704_v22, %v1705_v58  ;;  %v1712_v52 = vrot.slane %v1711_v11, 4 }
 0x1db   : > { %v1637_v44 = vrot.slane %v1636_v27, 2  ;;  %v1642_v10 = vrot.slane %v1641_v29, 4  ;;  %v1649_v60 = vrot.slane %v1648_v25, 4  ;;  %v1655_v59 = vsel %vm298_vm0, %v1230_v3, -inf }
 0x1dc   : > { %v1694_v33 = vmax.f32 %v1692_v42, %v1693_v54  ;;  %v1700_v30 = vrot.slane %v1699_v20, 2  ;;  %v1707_v0 = vrot.slane %v1706_v4, 2  ;;  %v1713_v6 = vmax.f32 %v1711_v11, %v1712_v52 }
 0x1dd   : > { %v1638_v62 = vmax.f32 %v1636_v27, %v1637_v44  ;;  %v1643_v34 = vmax.f32 %v1641_v29, %v1642_v10  ;;  %v1650_v9 = vmax.f32 %v1648_v25, %v1649_v60  ;;  %v1656_v23 = vrot.slane %v1655_v59, 4 }
 0x1de   : > { %v1695_v38 = vrot.slane %v1694_v33, 1  ;;  %v1701_v37 = vmax.f32 %v1699_v20, %v1700_v30  ;;  %v1708_v13 = vmax.f32 %v1706_v4, %v1707_v0  ;;  %v1714_v61 = vrot.slane %v1713_v6, 2 }
 0x1df   : > { %v1639_v5 = vrot.slane %v1638_v62, 1  ;;  %v1644_v40 = vrot.slane %v1643_v34, 2  ;;  %v1651_v31 = vrot.slane %v1650_v9, 2  ;;  %v1657_v41 = vmax.f32 %v1655_v59, %v1656_v23 }
 0x1e0   : > { %v1696_v43 = vmax.f32 %v1694_v33, %v1695_v38  ;;  %v1702_v2 = vrot.slane %v1701_v37, 1  ;;  %v1709_v45 = vrot.slane %v1708_v13, 1  ;;  %v1715_v48 = vmax.f32 %v1713_v6, %v1714_v61 }
 0x1e1   : > { %v1640_v51 = vmax.f32 %v1638_v62, %v1639_v5  ;;  %v1645_v18 = vmax.f32 %v1643_v34, %v1644_v40  ;;  %v1652_v49 = vmax.f32 %v1650_v9, %v1651_v31  ;;  %v1658_v53 = vrot.slane %v1657_v41, 2  ;;  %v4564_v34 = vld [vmem:[%s6467_s3 + $0x140] sm:$0xff]  }
 0x1e2   : > { %v1703_v39 = vmax.f32 %v1701_v37, %v1702_v2  ;;  %v1710_v26 = vmax.f32 %v1708_v13, %v1709_v45  ;;  %v1716_v55 = vrot.slane %v1715_v48, 1  ;;  %v1272_v56 = vrot.slane %v5571_v47, %v5565_v50  ;;  %3931 = vmatprep.subr.bf16.mxu1 %v4564_v34 }
 0x1e3   : > { %v1646_v36 = vrot.slane %v1645_v18, 1  ;;  %v1653_v12 = vrot.slane %v1652_v49, 1  ;;  %v1659_v1 = vmax.f32 %v1657_v41, %v1658_v53  ;;  %v2194_v14 = vmax.f32 %v1640_v51, %v1696_v43 }
 0x1e4   : > { %v1717_v63 = vmax.f32 %v1715_v48, %v1716_v55  ;;  %v1279_v19 = vrot.slane %v1265_v57, %v5565_v50  ;;  %v1280_v16 = vcombine.high %v1272_v56, %v1272_v56  ;;  %v1718_v22 = vsel %vm298_vm0, %v1272_v56, -inf }
 0x1e5   : > { %v1647_v21 = vmax.f32 %v1645_v18, %v1646_v36  ;;  %v1654_v42 = vmax.f32 %v1652_v49, %v1653_v12  ;;  %v1660_v24 = vrot.slane %v1659_v1, 1  ;;  %v1719_v58 = vrot.slane %v1718_v22, 4 }
 0x1e6   : > { %v1281_v3 = vcombine.high %v1279_v19, %v1279_v19  ;;  %v1725_v11 = vsel %vm298_vm0, %v1280_v16, -inf  ;;  %v1732_v27 = vsel %vm298_vm0, %v1279_v19, -inf  ;;  %v1231_v47 = vcombine.high %v5575_v46, %v5575_v46 }
 0x1e7   : > { %v1661_v29 = vmax.f32 %v1659_v1, %v1660_v24  ;;  %v2195_v25 = vmax.f32 %v1647_v21, %v1703_v39  ;;  %v2196_v54 = vmax.f32 %v1654_v42, %v1710_v26  ;;  %v1720_v57 = vmax.f32 %v1718_v22, %v1719_v58 }
 0x1e8   : > { %v1726_v20 = vrot.slane %v1725_v11, 4  ;;  %v1733_v4 = vrot.slane %v1732_v27, 4  ;;  %v1739_v52 = vsel %vm298_vm0, %v1281_v3, -inf  ;;  %v1238_v44 = vrot.slane %v5575_v46, %v5565_v50 }
 0x1e9   : > { %v2197_v10 = vmax.f32 %v1661_v29, %v1717_v63  ;;  %v2275_v60 = vsel %vm2274_vm13, %v2195_v25, %v2194_v14  ;;  %v1721_v59 = vrot.slane %v1720_v57, 2  ;;  %v1740_v33 = vrot.slane %v1739_v52, 4 }
 0x1ea   : > { %v1727_v30 = vmax.f32 %v1725_v11, %v1726_v20  ;;  %v1734_v0 = vmax.f32 %v1732_v27, %v1733_v4  ;;  %v1245_v6 = vrot.slane %v1231_v47, %v5565_v50  ;;  %v1246_v62 = vcombine.high %v1238_v44, %v1238_v44 }
 0x1eb   : > { %v1722_v9 = vmax.f32 %v1720_v57, %v1721_v59  ;;  %v1741_v23 = vmax.f32 %v1739_v52, %v1740_v33  ;;  %v1662_v38 = vsel %vm298_vm0, %v1238_v44, -inf  ;;  %v2277_v46 = vsel %vm2276_vm14, %v2196_v54, %v2275_v60 }
 0x1ec   : > { %v1728_v37 = vrot.slane %v1727_v30, 2  ;;  %v1735_v13 = vrot.slane %v1734_v0, 2  ;;  %v1247_v61 = vcombine.high %v1245_v6, %v1245_v6  ;;  %v1663_v5 = vrot.slane %v1662_v38, 4 }
 0x1ed   : > { %v1723_v40 = vrot.slane %v1722_v9, 1  ;;  %v1742_v31 = vrot.slane %v1741_v23, 2  ;;  %v1669_v41 = vsel %vm298_vm0, %v1246_v62, -inf  ;;  %v1676_v43 = vsel %vm298_vm0, %v1245_v6, -inf  ;;  %v4566_v6 = vld [vmem:[%s6467_s3 + $0x148] sm:$0xff]  }
 0x1ee   : > { %v1729_v2 = vmax.f32 %v1727_v30, %v1728_v37  ;;  %v1736_v45 = vmax.f32 %v1734_v0, %v1735_v13  ;;  %v1664_v48 = vmax.f32 %v1662_v38, %v1663_v5  ;;  %v1670_v51 = vrot.slane %v1669_v41, 4  ;;  %v4565_v0 = vld [vmem:[%s6467_s3 + $0x100] sm:$0xff]  }
 0x1ef   : > { %v1724_v18 = vmax.f32 %v1722_v9, %v1723_v40  ;;  %v1743_v49 = vmax.f32 %v1741_v23, %v1742_v31  ;;  %v1677_v53 = vrot.slane %v1676_v43, 4  ;;  %v1683_v39 = vsel %vm298_vm0, %v1247_v61, -inf  ;;  %3932 = vmatpush3.bf16.msra.mxu1 %v4565_v0  ;;  %v4567_v61 = vld [vmem:[%s6467_s3 + $0x108] sm:$0xff]  }
 0x1f0   : > { %v1730_v26 = vrot.slane %v1729_v2, 1  ;;  %v1737_v55 = vrot.slane %v1736_v45, 1  ;;  %v1665_v56 = vrot.slane %v1664_v48, 2  ;;  %v1671_v36 = vmax.f32 %v1669_v41, %v1670_v51  ;;  %v4078_v12 = vpop.f32.mrb[4].mxu0  ;;  %3933 = vmatprep.subr.bf16.mxu1 %v4566_v6 }
 0x1f1   : > { %v1744_v1 = vrot.slane %v1743_v49, 1  ;;  %v1678_v14 = vmax.f32 %v1676_v43, %v1677_v53  ;;  %v1684_v63 = vrot.slane %v1683_v39, 4  ;;  %v2279_v19 = vsel %vm2278_vm15, %v2197_v10, %v2277_v46  ;;  %v1131_v16 = vpop.f32.mrb[5].mxu0 }
 0x1f2   : > { %v1731_v22 = vmax.f32 %v1729_v2, %v1730_v26  ;;  %v5611_v21 = vmax.f32 %v1736_v45, %v1737_v55  ;;  %v1666_v42 = vmax.f32 %v1664_v48, %v1665_v56  ;;  %v1672_v24 = vrot.slane %v1671_v36, 2  ;;  %v4079_v58 = vpop.f32.mrb[6].mxu0 }
 0x1f3   : > { %v1745_v3 = vmax.f32 %v1743_v49, %v1744_v1  ;;  %v1679_v11 = vrot.slane %v1678_v14, 2  ;;  %v1685_v27 = vmax.f32 %v1683_v39, %v1684_v63  ;;  %v1140_v47 = vadd.f32 %v4078_v12, %v5563_v15  ;;  %v5614_v29 = vpop.f32.mrb[7].mxu0  ;;  %v4568_v39 = vld [vmem:[%s6467_s3 + $0x150] sm:$0xff]   ;;  %3934 = vmatpush3.bf16.msra.mxu1 %v4567_v61 }
 0x1f4   : > { %v1667_v25 = vrot.slane %v1666_v42, 1  ;;  %v1673_v54 = vmax.f32 %v1671_v36, %v1672_v24  ;;  %v1132_v57 = vadd.f32 %v5563_v15, %v1131_v16  ;;  %v5618_v20 = vadd.f32 %v4079_v58, %v5563_v15  ;;  %3935 = vmatprep.subr.bf16.mxu1 %v4568_v39 }
 0x1f5   : > { %v1680_v4 = vmax.f32 %v1678_v14, %v1679_v11  ;;  %v1686_v52 = vrot.slane %v1685_v27, 2  ;;  %v1316_v44 = vcombine.high %v1140_v47, %v1140_v47  ;;  %v1323_v10 = vrot.slane %v1140_v47, %v5565_v50 }
 0x1f6   : > { %v1668_v60 = vmax.f32 %v1666_v42, %v1667_v25  ;;  %v1674_v59 = vrot.slane %v1673_v54, 1  ;;  %v1282_v33 = vcombine.high %v1132_v57, %v1132_v57  ;;  %v1289_v30 = vrot.slane %v1132_v57, %v5565_v50 }
 0x1f7   : > { %v1681_v62 = vrot.slane %v1680_v4, 1  ;;  %v1687_v34 = vmax.f32 %v1685_v27, %v1686_v52  ;;  %v1330_v9 = vrot.slane %v1316_v44, %v5565_v50  ;;  %v1331_v23 = vcombine.high %v1323_v10, %v1323_v10 }
 0x1f8   : > { %v1675_v38 = vmax.f32 %v1673_v54, %v1674_v59  ;;  %v2198_v46 = vmax.f32 %v1668_v60, %v1724_v18  ;;  %v1802_v37 = vsel %vm298_vm0, %v1323_v10, -inf  ;;  %v1296_v13 = vrot.slane %v1282_v33, %v5565_v50 }
 0x1f9   : > { %v1682_v5 = vmax.f32 %v1680_v4, %v1681_v62  ;;  %v1688_v40 = vrot.slane %v1687_v34, 1  ;;  %v1332_v31 = vcombine.high %v1330_v9, %v1330_v9  ;;  %v1803_v41 = vrot.slane %v1802_v37, 4 }
 0x1fa   : > { %v2199_v43 = vmax.f32 %v1675_v38, %v1731_v22  ;;  %v2281_v2 = vsel %vm2280_vm3, %v2198_v46, %v2279_v19  ;;  %v1809_v45 = vsel %vm298_vm0, %v1331_v23, -inf  ;;  %v1816_v48 = vsel %vm298_vm0, %v1330_v9, -inf }
 0x1fb   : > { %v1689_v51 = vmax.f32 %v1687_v34, %v1688_v40  ;;  %v2200_v18 = vmax.f32 %v1682_v5, %v5611_v21  ;;  %v1804_v49 = vmax.f32 %v1802_v37, %v1803_v41  ;;  %v1810_v53 = vrot.slane %v1809_v45, 4 }
 0x1fc   : > { %v2283_v26 = vsel %vm2282_vm4, %v2199_v43, %v2281_v2  ;;  %v1817_v56 = vrot.slane %v1816_v48, 4  ;;  %v1823_v36 = vsel %vm298_vm0, %v1332_v31, -inf  ;;  %v1297_v12 = vcombine.high %v1289_v30, %v1289_v30 }
 0x1fd   : > { %v2201_v1 = vmax.f32 %v1689_v51, %v1745_v3  ;;  %v5649_v14 = vsel %vm298_vm0, 0.0, %v2283_v26  ;;  %v1805_v63 = vrot.slane %v1804_v49, 2  ;;  %v1811_v19 = vmax.f32 %v1809_v45, %v1810_v53 }
 0x1fe   : > { %v1818_v16 = vmax.f32 %v1816_v48, %v1817_v56  ;;  %v1824_v22 = vrot.slane %v1823_v36, 4  ;;  %v1298_v21 = vcombine.high %v1296_v13, %v1296_v13  ;;  %v1746_v42 = vsel %vm298_vm0, %v1289_v30, -inf }
 0x1ff   : > { %v2285_v24 = vsel %vm2284_vm5, %v2201_v1, %v2200_v18  ;;  %v1806_v3 = vmax.f32 %v1804_v49, %v1805_v63  ;;  %v1812_v11 = vrot.slane %v1811_v19, 2  ;;  %v1747_v27 = vrot.slane %v1746_v42, 4 }
 0x200   : > { %v5661_v47 = vsel %vm298_vm0, %v2285_v24, 0.0  ;;  %v5663_v25 = vpack.c.bf16 %v2285_v24, %v2283_v26  ;;  %v1819_v54 = vrot.slane %v1818_v16, 2  ;;  %v1825_v57 = vmax.f32 %v1823_v36, %v1824_v22  ;;  %v4569_v26 = vld [vmem:[%s6467_s3 + $0x110] sm:$0xff]  }
 0x201   : > { %v1807_v4 = vrot.slane %v1806_v3, 1  ;;  %v1813_v52 = vmax.f32 %v1811_v19, %v1812_v11  ;;  %v1748_v44 = vmax.f32 %v1746_v42, %v1747_v27  ;;  %v1753_v10 = vsel %vm298_vm0, %v1297_v12, -inf  ;;  %3936 = vmatpush3.bf16.msra.mxu1 %v4569_v26 }
 0x202   : > { %3732 = vmatprep.mubr.msk.bf16.mxu0 %vm5656_vm7, %v5663_v25  ;;  %v1820_v60 = vmax.f32 %v1818_v16, %v1819_v54  ;;  %v1826_v59 = vrot.slane %v1825_v57, 2  ;;  %v1754_v33 = vrot.slane %v1753_v10, 4  ;;  %v1760_v30 = vsel %vm298_vm0, %v1296_v13, -inf }
 0x203   : > { %v1808_v0 = vmax.f32 %v1806_v3, %v1807_v4  ;;  %v1814_v6 = vrot.slane %v1813_v52, 1  ;;  %v1749_v62 = vrot.slane %v1748_v44, 2  ;;  %v1761_v34 = vrot.slane %v1760_v30, 4  ;;  %3133 = vmatmul.mubr.bf16.gmra.mrb[24].mxu0 %v5559_v32 }
 0x204   : > { %v1821_v9 = vrot.slane %v1820_v60, 1  ;;  %v1827_v23 = vmax.f32 %v1825_v57, %v1826_v59  ;;  %v1755_v38 = vmax.f32 %v1753_v10, %v1754_v33  ;;  %v1767_v46 = vsel %vm298_vm0, %v1298_v21, -inf }
 0x205   : > { %v1815_v37 = vmax.f32 %v1813_v52, %v1814_v6  ;;  %v1750_v61 = vmax.f32 %v1748_v44, %v1749_v62  ;;  %v1762_v5 = vmax.f32 %v1760_v30, %v1761_v34  ;;  %v1768_v40 = vrot.slane %v1767_v46, 4 }
 0x206   : > { %v1822_v31 = vmax.f32 %v1820_v60, %v1821_v9  ;;  %v1828_v41 = vrot.slane %v1827_v23, 1  ;;  %v1756_v43 = vrot.slane %v1755_v38, 2  ;;  %v1333_v13 = vcombine.high %v5618_v20, %v5618_v20 }
 0x207   : > { %v1751_v2 = vrot.slane %v1750_v61, 1  ;;  %v1763_v45 = vrot.slane %v1762_v5, 2  ;;  %v1769_v48 = vmax.f32 %v1767_v46, %v1768_v40  ;;  %v1340_v51 = vrot.slane %v5618_v20, %v5565_v50 }
 0x208   : > { %v5676_v18 = vmax.f32 %v1827_v23, %v1828_v41  ;;  %v1757_v49 = vmax.f32 %v1755_v38, %v1756_v43  ;;  %v1347_v53 = vrot.slane %v1333_v13, %v5565_v50  ;;  %v2340_v39 = vrot.slane %v5649_v14, 1 }
 0x209   : > { %v1752_v55 = vmax.f32 %v1750_v61, %v1751_v2  ;;  %v1764_v56 = vmax.f32 %v1762_v5, %v1763_v45  ;;  %v1770_v36 = vrot.slane %v1769_v48, 2  ;;  %v1348_v12 = vcombine.high %v1340_v51, %v1340_v51 }
 0x20a   : > { %v1758_v1 = vrot.slane %v1757_v49, 1  ;;  %v1349_v63 = vcombine.high %v1347_v53, %v1347_v53  ;;  %v1830_v19 = vsel %vm298_vm0, %v1340_v51, -inf  ;;  %v1844_v20 = vsel %vm298_vm0, %v1347_v53, -inf }
 0x20b   : > { %v1765_v16 = vrot.slane %v1764_v56, 1  ;;  %v1771_v22 = vmax.f32 %v1769_v48, %v1770_v36  ;;  %v2202_v21 = vmax.f32 %v1752_v55, %v1808_v0  ;;  %v1831_v42 = vrot.slane %v1830_v19, 4 }
 0x20c   : > { %v1759_v24 = vmax.f32 %v1757_v49, %v1758_v1  ;;  %v1837_v3 = vsel %vm298_vm0, %v1348_v12, -inf  ;;  %v1845_v11 = vrot.slane %v1844_v20, 4  ;;  %v1851_v27 = vsel %vm298_vm0, %v1349_v63, -inf }
 0x20d   : > { %v1766_v54 = vmax.f32 %v1764_v56, %v1765_v16  ;;  %v1772_v57 = vrot.slane %v1771_v22, 1  ;;  %v1832_v4 = vmax.f32 %v1830_v19, %v1831_v42  ;;  %v1838_v52 = vrot.slane %v1837_v3, 4 }
 0x20e   : > { %v2203_v44 = vmax.f32 %v1759_v24, %v1815_v37  ;;  %v1846_v10 = vmax.f32 %v1844_v20, %v1845_v11  ;;  %v1852_v60 = vrot.slane %v1851_v27, 4  ;;  %v2341_v59 = vrot.slane %v5661_v47, 1  ;;  %v4570_v11 = vld [vmem:[%s6467_s3 + $0x158] sm:$0xff]  }
 0x20f   : > { %v1773_v33 = vmax.f32 %v1771_v22, %v1772_v57  ;;  %v2204_v30 = vmax.f32 %v1766_v54, %v1822_v31  ;;  %v1833_v6 = vrot.slane %v1832_v4, 2  ;;  %v1839_v0 = vmax.f32 %v1837_v3, %v1838_v52  ;;  %v4571_v52 = vld [vmem:[%s6467_s3 + $0x118] sm:$0xff]   ;;  %3937 = vmatprep.subr.bf16.mxu1 %v4570_v11 }
 0x210   : > { %v2286_v62 = vsel %vm2274_vm13, %v2203_v44, %v2202_v21  ;;  %v1847_v34 = vrot.slane %v1846_v10, 2  ;;  %v1853_v9 = vmax.f32 %v1851_v27, %v1852_v60  ;;  %v2342_v23 = vsel %vm356_vm1, %v2340_v39, %v2341_v59  ;;  %v4082_v38 = vpop.f32.mrb[8].mxu0  ;;  %3938 = vmatpush3.bf16.msra.mxu1 %v4571_v52 }
 0x211   : > { %v2205_v46 = vmax.f32 %v1773_v33, %v5676_v18  ;;  %v1834_v61 = vmax.f32 %v1832_v4, %v1833_v6  ;;  %v1840_v5 = vrot.slane %v1839_v0, 2  ;;  %v2343_v37 = vsel %vm356_vm1, %v2341_v59, %v4875_v8  ;;  %v1147_v40 = vpop.f32.mrb[9].mxu0  ;;  %v4572_v33 = vld [vmem:[%s6467_s3 + $0x160] sm:$0xff]  }
 0x212   : > { %v1848_v41 = vmax.f32 %v1846_v10, %v1847_v34  ;;  %v1854_v43 = vrot.slane %v1853_v9, 2  ;;  %v5693_v31 = vpack.c.bf16 %v2343_v37, %v2342_v23  ;;  %v1135_v13 = vadd.f32 %v5563_v15, %v5614_v29  ;;  %v5697_v2 = vpop.f32.mrb[10].mxu0  ;;  %v4575_v23 = vld [vmem:[%s6467_s3 + $0x180] sm:$0xff]   ;;  %3939 = vmatprep.subr.bf16.mxu1 %v4572_v33 }
 0x213   : > { %v1835_v45 = vrot.slane %v1834_v61, 1  ;;  %v1841_v48 = vmax.f32 %v1839_v0, %v1840_v5  ;;  %v2287_v51 = vsel %vm2276_vm14, %v2204_v30, %v2286_v62  ;;  %v2371_v18 = vrot.slane %v5649_v14, 2  ;;  %v5701_v49 = vpop.f32.mrb[11].mxu0  ;;  %v4574_v30 = vld [vmem:[%s6467_s3 + $0x1c0] sm:$0xff]  }
 0x214   : > { %v1849_v53 = vrot.slane %v1848_v41, 1  ;;  %v1855_v39 = vmax.f32 %v1853_v9, %v1854_v43  ;;  %3051 = vmatprep.mubr.bf16.mxu1 %v5693_v31  ;;  %v1299_v26 = vcombine.high %v1135_v13, %v1135_v13  ;;  %v1306_v55 = vrot.slane %v1135_v13, %v5565_v50  ;;  %v4573_v9 = vld [vmem:[%s6467_s3 + $0x120] sm:$0xff]   ;;  %3989 = vmatprep.subr.bf16.mxu0 %v4574_v30 }
 0x215   : > { %v5705_v56 = vmax.f32 %v1834_v61, %v1835_v45  ;;  %v1842_v29 = vrot.slane %v1841_v48, 1  ;;  %3712 = vmatmul.mubr.msk.bf16.gmra.mrb[8].mxu1 %vm5656_vm7, %v5663_v25  ;;  %v5711_v36 = vsel %vm2278_vm15, %v2205_v46, %v2287_v51  ;;  %v2372_v14 = vrot.slane %v5661_v47, 2  ;;  %3990 = vmatpush3.bf16.msra.mxu0 %v4575_v23 }
 0x216   : > { %v5714_v12 = vmax.f32 %v1848_v41, %v1849_v53  ;;  %v1856_v1 = vrot.slane %v1855_v39, 1  ;;  %v1313_v63 = vrot.slane %v1299_v26, %v5565_v50  ;;  %v1314_v19 = vcombine.high %v1306_v55, %v1306_v55  ;;  %v4580_v26 = vld [vmem:[%s6467_s3 + $0x1d0] sm:$0xff]   ;;  %3940 = vmatpush3.bf16.msra.mxu1 %v4573_v9 }
 0x217   : > { %v5717_v20 = vmax.f32 %v1841_v48, %v1842_v29  ;;  %v1774_v16 = vsel %vm298_vm0, %v1306_v55, -inf  ;;  %v2373_v22 = vsel %vm442_vm2, %v2371_v18, %v2372_v14  ;;  %v2374_v21 = vsel %vm442_vm2, %v2372_v14, %v4894_v17  ;;  %v4577_v48 = vld [vmem:[%s6467_s3 + $0x188] sm:$0xff]  }
 0x218   : > { %v5723_v42 = vmax.f32 %v1855_v39, %v1856_v1  ;;  %v1315_v24 = vcombine.high %v1313_v63, %v1313_v63  ;;  %v1775_v3 = vrot.slane %v1774_v16, 4  ;;  %v1781_v47 = vsel %vm298_vm0, %v1314_v19, -inf }
 0x219   : > { %v1782_v27 = vrot.slane %v1781_v47, 4  ;;  %v1788_v54 = vsel %vm298_vm0, %v1313_v63, -inf  ;;  %v5730_v57 = vpack.c.bf16 %v2374_v21, %v2373_v22  ;;  %v1156_v4 = vadd.f32 %v4082_v38, %v5563_v15  ;;  %v4576_v38 = vld [vmem:[%s6467_s3 + $0x1c8] sm:$0xff]  }
 0x21a   : > { %v1776_v44 = vmax.f32 %v1774_v16, %v1775_v3  ;;  %v1789_v10 = vrot.slane %v1788_v54, 4  ;;  %v1795_v60 = vsel %vm298_vm0, %v1315_v24, -inf  ;;  %v1148_v59 = vadd.f32 %v5563_v15, %v1147_v40  ;;  %v4578_v40 = vld [vmem:[%s6467_s3 + $0x168] sm:$0xff]   ;;  %3991 = vmatprep.subr.bf16.mxu0 %v4576_v38  ;;  %v4583_v24 = vld [vmem:[%s6467_s3 + $0x170] sm:$0xff]  }
 0x21b   : > { %v1783_v6 = vmax.f32 %v1781_v47, %v1782_v27  ;;  %v1796_v0 = vrot.slane %v1795_v60, 4  ;;  %v1384_v62 = vcombine.high %v1156_v4, %v1156_v4  ;;  %v1391_v34 = vrot.slane %v1156_v4, %v5565_v50  ;;  %v4579_v63 = vld [vmem:[%s6467_s3 + $0x128] sm:$0xff]   ;;  %3941 = vmatprep.subr.bf16.mxu1 %v4578_v40  ;;  %3992 = vmatpush3.bf16.msra.mxu0 %v4577_v48  ;;  %v4584_v40 = vld [vmem:[%s6467_s3 + $0x198] sm:$0xff]  }
 0x21c   : > { %v1777_v46 = vrot.slane %v1776_v44, 2  ;;  %v1790_v61 = vmax.f32 %v1788_v54, %v1789_v10  ;;  %v1350_v5 = vcombine.high %v1148_v59, %v1148_v59  ;;  %v5755_v37 = vrot.slane %v1148_v59, %v5565_v50  ;;  %v4581_v54 = vld [vmem:[%s6467_s3 + $0x190] sm:$0xff]   ;;  %3993 = vmatprep.subr.bf16.mxu0 %v4580_v26  ;;  %3942 = vmatpush3.bf16.msra.mxu1 %v4579_v63 }
 0x21d   : > { %v1784_v41 = vrot.slane %v1783_v6, 2  ;;  %v1797_v43 = vmax.f32 %v1795_v60, %v1796_v0  ;;  %v1398_v13 = vrot.slane %v1384_v62, %v5565_v50  ;;  %v1399_v45 = vcombine.high %v1391_v34, %v1391_v34  ;;  %v4582_v60 = vld [vmem:[%s6467_s3 + $0x1d8] sm:$0xff]   ;;  %v4585_v0 = vld [vmem:[%s6467_s3 + $0x130] sm:$0xff]   ;;  %3943 = vmatprep.subr.bf16.mxu1 %v4583_v24  ;;  %v4587_v24 = vld [vmem:[%s6467_s3 + $0x1a0] sm:$0xff]  }
 0x21e   : > { %v1778_v51 = vmax.f32 %v1776_v44, %v1777_v46  ;;  %v1791_v18 = vrot.slane %v1790_v61, 2  ;;  %v1914_v53 = vsel %vm298_vm0, %v1391_v34, -inf  ;;  %v5766_v39 = vrot.slane %v1350_v5, %v5565_v50 }
 0x21f   : > { %v1785_v55 = vmax.f32 %v1783_v6, %v1784_v41  ;;  %v1798_v29 = vrot.slane %v1797_v43, 2  ;;  %v1400_v14 = vcombine.high %v1398_v13, %v1398_v13  ;;  %v1915_v1 = vrot.slane %v1914_v53, 4  ;;  %3994 = vmatpush3.bf16.msra.mxu0 %v4581_v54  ;;  %v4589_v54 = vld [vmem:[%s6467_s3 + $0x1e8] sm:$0xff]  }
 0x220   : > { %v1779_v19 = vrot.slane %v1778_v51, 1  ;;  %v1792_v16 = vmax.f32 %v1790_v61, %v1791_v18  ;;  %v1921_v22 = vsel %vm298_vm0, %v1399_v45, -inf  ;;  %v1928_v21 = vsel %vm298_vm0, %v1398_v13, -inf  ;;  %3995 = vmatprep.subr.bf16.mxu0 %v4582_v60  ;;  %v4586_v45 = vld [vmem:[%s6467_s3 + $0x1e0] sm:$0xff]   ;;  %3944 = vmatpush3.bf16.msra.mxu1 %v4585_v0 }
 0x221   : > { %v1786_v3 = vrot.slane %v1785_v55, 1  ;;  %v1799_v47 = vmax.f32 %v1797_v43, %v1798_v29  ;;  %v1916_v11 = vmax.f32 %v1914_v53, %v1915_v1  ;;  %v1922_v27 = vrot.slane %v1921_v22, 4 }
 0x222   : > { %v1780_v4 = vmax.f32 %v1778_v51, %v1779_v19  ;;  %v1793_v52 = vrot.slane %v1792_v16, 1  ;;  %v1929_v44 = vrot.slane %v1928_v21, 4  ;;  %v1935_v10 = vsel %vm298_vm0, %v1400_v14, -inf }
 0x223   : > { %v1787_v59 = vmax.f32 %v1785_v55, %v1786_v3  ;;  %v1800_v33 = vrot.slane %v1799_v47, 1  ;;  %v1917_v30 = vrot.slane %v1916_v11, 2  ;;  %v1923_v6 = vmax.f32 %v1921_v22, %v1922_v27  ;;  %3996 = vmatpush3.bf16.msra.mxu0 %v4584_v40 }
 0x224   : > { %v1794_v62 = vmax.f32 %v1792_v16, %v1793_v52  ;;  %v2206_v34 = vmax.f32 %v1780_v4, %v5705_v56  ;;  %v1930_v9 = vmax.f32 %v1928_v21, %v1929_v44  ;;  %v1936_v23 = vrot.slane %v1935_v10, 4  ;;  %3997 = vmatprep.subr.bf16.mxu0 %v4586_v45 }
 0x225   : > { %v1801_v38 = vmax.f32 %v1799_v47, %v1800_v33  ;;  %v2207_v46 = vmax.f32 %v1787_v59, %v5717_v20  ;;  %v1918_v61 = vmax.f32 %v1916_v11, %v1917_v30  ;;  %v1924_v5 = vrot.slane %v1923_v6, 2  ;;  %v4588_v20 = vld [vmem:[%s6467_s3 + $0x178] sm:$0xff]  }
 0x226   : > { %v2208_v41 = vmax.f32 %v1794_v62, %v5714_v12  ;;  %v2289_v43 = vsel %vm2280_vm3, %v2206_v34, %v5711_v36  ;;  %v1931_v13 = vrot.slane %v1930_v9, 2  ;;  %v1937_v56 = vmax.f32 %v1935_v10, %v1936_v23  ;;  %v4590_v36 = vld [vmem:[%s6467_s3 + $0x138] sm:$0xff]   ;;  %3945 = vmatprep.subr.bf16.mxu1 %v4588_v20  ;;  %v4591_v62 = vld [vmem:[%s6467_s3 + $0x1a8] sm:$0xff]  }
 0x227   : > { %v2209_v48 = vmax.f32 %v1801_v38, %v5723_v42  ;;  %v2290_v51 = vsel %vm2282_vm4, %v2207_v46, %v2289_v43  ;;  %v1919_v18 = vrot.slane %v1918_v61, 1  ;;  %v1925_v12 = vmax.f32 %v1923_v6, %v1924_v5  ;;  %3946 = vmatpush3.bf16.msra.mxu1 %v4590_v36  ;;  %3998 = vmatpush3.bf16.msra.mxu0 %v4587_v24 }
 0x228   : > { %v5809_v53 = vsel %vm298_vm0, 0.0, %v2290_v51  ;;  %v1932_v26 = vmax.f32 %v1930_v9, %v1931_v13  ;;  %v1938_v55 = vrot.slane %v1937_v56, 2  ;;  %v1365_v29 = vcombine.high %v5755_v37, %v5755_v37  ;;  %4136 = vmatprep.subr.bf16.mxu1 %v6472_v7  ;;  %3999 = vmatprep.subr.bf16.mxu0 %v4589_v54 }
 0x229   : > { %v2291_v42 = vsel %vm2284_vm5, %v2209_v48, %v2208_v41  ;;  %v5814_v14 = vmax.f32 %v1918_v61, %v1919_v18  ;;  %v1926_v1 = vrot.slane %v1925_v12, 1  ;;  %v1366_v63 = vcombine.high %v5766_v39, %v5766_v39 }
 0x22a   : > { %v5819_v19 = vsel %vm298_vm0, %v2291_v42, 0.0  ;;  %v5821_v16 = vpack.c.bf16 %v2291_v42, %v2290_v51  ;;  %v1933_v22 = vrot.slane %v1932_v26, 1  ;;  %v1939_v21 = vmax.f32 %v1937_v56, %v1938_v55 }
 0x22b   : > { %v5826_v3 = vmax.f32 %v1925_v12, %v1926_v1  ;;  %v1858_v47 = vsel %vm298_vm0, %v5755_v37, -inf  ;;  %v1865_v11 = vsel %vm298_vm0, %v1365_v29, -inf  ;;  %v1872_v27 = vsel %vm298_vm0, %v5766_v39, -inf  ;;  %4000 = vmatpush3.bf16.msra.mxu0 %v4591_v62  ;;  %v4594_v1 = vld [vmem:[%s6467_s3 + $0x1f8] sm:$0xff]  }
 0x22c   : > { %6496 = vst [vmem:[#allocation9_spill] sm:$0xff] %v5821_v16  ;;  %3736 = vmatprep.mubr.msk.bf16.mxu0 %vm5656_vm7, %v5821_v16  ;;  %v5839_v4 = vmax.f32 %v1932_v26, %v1933_v22  ;;  %v1940_v52 = vrot.slane %v1939_v21, 1  ;;  %v1859_v44 = vrot.slane %v1858_v47, 4  ;;  %v1866_v10 = vrot.slane %v1865_v11, 4 }
 0x22d   : > { %3141 = vmatmul.mubr.bf16.gmra.mrb[28].mxu0 %v5730_v57  ;;  %v1873_v37 = vrot.slane %v1872_v27, 4  ;;  %v1879_v39 = vsel %vm298_vm0, %v1366_v63, -inf  ;;  %v1159_v60 = vadd.f32 %v5697_v2, %v5563_v15  ;;  %v2344_v59 = vrot.slane %v5809_v53, 1  ;;  %v4592_v2 = vld [vmem:[%s6467_s3 + $0x1f0] sm:$0xff]  }
 0x22e   : > { %v5847_v33 = vmax.f32 %v1939_v21, %v1940_v52  ;;  %v1860_v30 = vmax.f32 %v1858_v47, %v1859_v44  ;;  %v1867_v6 = vmax.f32 %v1865_v11, %v1866_v10  ;;  %v1880_v0 = vrot.slane %v1879_v39, 4  ;;  %4001 = vmatprep.subr.bf16.mxu0 %v4592_v2 }
 0x22f   : > { %v1874_v34 = vmax.f32 %v1872_v27, %v1873_v37  ;;  %v1401_v9 = vcombine.high %v1159_v60, %v1159_v60  ;;  %v1408_v23 = vrot.slane %v1159_v60, %v5565_v50  ;;  %v2345_v38 = vrot.slane %v5819_v19, 1 }
 0x230   : > { %v1861_v46 = vrot.slane %v1860_v30, 2  ;;  %v1868_v61 = vrot.slane %v1867_v6, 2  ;;  %v1881_v5 = vmax.f32 %v1879_v39, %v1880_v0  ;;  %v5859_v40 = vadd.f32 %v5563_v15, %v5701_v49  ;;  %v5861_v41 = vpop.f32.mrb[12].mxu0  ;;  %v4593_v15 = vld [vmem:[%s6467_s3 + $0x1b0] sm:$0xff]   ;;  %v4596_v39 = vld [vmem:[%s6467_s3 + $0x1b8] sm:$0xff]  }
 0x231   : > { %v1875_v43 = vrot.slane %v1874_v34, 2  ;;  %v1415_v13 = vrot.slane %v1401_v9, %v5565_v50  ;;  %v1416_v56 = vcombine.high %v1408_v23, %v1408_v23  ;;  %v1942_v45 = vsel %vm298_vm0, %v1408_v23, -inf  ;;  %v5865_v20 = vpop.f32.mrb[13].mxu0  ;;  %4002 = vmatpush3.bf16.msra.mxu0 %v4593_v15 }
 0x232   : > { %v1862_v48 = vmax.f32 %v1860_v30, %v1861_v46  ;;  %v1869_v51 = vmax.f32 %v1867_v6, %v1868_v61  ;;  %v1882_v18 = vrot.slane %v1881_v5, 2  ;;  %v1943_v12 = vrot.slane %v1942_v45, 4  ;;  %v5867_v36 = vpop.f32.mrb[14].mxu0  ;;  %4003 = vmatprep.subr.bf16.mxu0 %v4594_v1 }
 0x233   : > { %v1876_v49 = vmax.f32 %v1874_v34, %v1875_v43  ;;  %v1417_v26 = vcombine.high %v1415_v13, %v1415_v13  ;;  %v1949_v55 = vsel %vm298_vm0, %v1416_v56, -inf  ;;  %v1956_v29 = vsel %vm298_vm0, %v1415_v13, -inf  ;;  %v5874_v42 = vpop.f32.mrb[15].mxu0 }
 0x234   : > { %v1863_v63 = vrot.slane %v1862_v48, 1  ;;  %v1870_v22 = vrot.slane %v1869_v51, 1  ;;  %v1883_v21 = vmax.f32 %v1881_v5, %v1882_v18  ;;  %v1944_v24 = vmax.f32 %v1942_v45, %v1943_v12 }
 0x235   : > { %v1877_v47 = vrot.slane %v1876_v49, 1  ;;  %v1950_v11 = vrot.slane %v1949_v55, 4  ;;  %v1957_v27 = vrot.slane %v1956_v29, 4  ;;  %v1963_v54 = vsel %vm298_vm0, %v1417_v26, -inf  ;;  %4004 = vmatpush3.bf16.msra.mxu0 %v4596_v39 }
 0x236   : > { %v1864_v52 = vmax.f32 %v1862_v48, %v1863_v63  ;;  %v1871_v44 = vmax.f32 %v1869_v51, %v1870_v22  ;;  %v1884_v10 = vrot.slane %v1883_v21, 1  ;;  %v1945_v37 = vrot.slane %v1944_v24, 2  ;;  %4092 = vmatprep.subr.bf16.mxu0 %v6472_v7 }
 0x237   : > { %v1878_v60 = vmax.f32 %v1876_v49, %v1877_v47  ;;  %v1951_v30 = vmax.f32 %v1949_v55, %v1950_v11  ;;  %v1958_v6 = vmax.f32 %v1956_v29, %v1957_v27  ;;  %v1964_v0 = vrot.slane %v1963_v54, 4 }
 0x238   : > { %v1885_v62 = vmax.f32 %v1883_v21, %v1884_v10  ;;  %v2210_v34 = vmax.f32 %v1864_v52, %v5814_v14  ;;  %v2211_v9 = vmax.f32 %v1871_v44, %v5826_v3  ;;  %v1946_v23 = vmax.f32 %v1944_v24, %v1945_v37 }
 0x239   : > { %v2212_v2 = vmax.f32 %v1878_v60, %v5839_v4  ;;  %v1952_v46 = vrot.slane %v1951_v30, 2  ;;  %v1959_v61 = vrot.slane %v1958_v6, 2  ;;  %v1965_v5 = vmax.f32 %v1963_v54, %v1964_v0 }
 0x23a   : > { %v2213_v43 = vmax.f32 %v1885_v62, %v5847_v33  ;;  %v2292_v13 = vsel %vm2274_vm13, %v2211_v9, %v2210_v34  ;;  %v1947_v56 = vrot.slane %v1946_v23, 1  ;;  %v2346_v45 = vsel %vm356_vm1, %v2344_v59, %v2345_v38 }
 0x23b   : > { %v1953_v14 = vmax.f32 %v1951_v30, %v1952_v46  ;;  %v1960_v3 = vmax.f32 %v1958_v6, %v1959_v61  ;;  %v1966_v48 = vrot.slane %v1965_v5, 2  ;;  %v2347_v4 = vsel %vm356_vm1, %v2345_v38, %v4875_v8  ;;  %v5931_v6 = vld [vmem:[#allocation4] ss:$0 sm:$0xff] }
 0x23c   : > { %v5898_v33 = vmax.f32 %v1946_v23, %v1947_v56  ;;  %v5900_v51 = vpack.c.bf16 %v2347_v4, %v2346_v45  ;;  %v1367_v18 = vcombine.high %v5859_v40, %v5859_v40  ;;  %v1374_v59 = vrot.slane %v5859_v40, %v5565_v50 }
 0x23d   : > { %v1954_v12 = vrot.slane %v1953_v14, 1  ;;  %v1961_v15 = vrot.slane %v1960_v3, 1  ;;  %v1967_v49 = vmax.f32 %v1965_v5, %v1966_v48  ;;  %v2293_v26 = vsel %vm2276_vm14, %v2212_v2, %v2292_v13 }
 0x23e   : > { %6497 = vst [vmem:[#allocation10_spill] sm:$0xff] %v5900_v51  ;;  %3059 = vmatprep.mubr.bf16.mxu1 %v5900_v51  ;;  %v1381_v38 = vrot.slane %v1367_v18, %v5565_v50  ;;  %v1382_v55 = vcombine.high %v1374_v59, %v1374_v59  ;;  %v1886_v29 = vsel %vm298_vm0, %v1374_v59, -inf  ;;  %v5911_v1 = vsel %vm2278_vm15, %v2213_v43, %v2293_v26 }
 0x23f   : > { %v5913_v63 = vmax.f32 %v1953_v14, %v1954_v12  ;;  %v5915_v22 = vmax.f32 %v1960_v3, %v1961_v15  ;;  %v1968_v40 = vrot.slane %v1967_v49, 1  ;;  %v1887_v21 = vrot.slane %v1886_v29, 4  ;;  %3716 = vmatmul.mubr.msk.bf16.gmra.mrb[12].mxu1 %vm5656_vm7, %v5821_v16 }
 0x240   : > { %v1383_v24 = vcombine.high %v1381_v38, %v1381_v38  ;;  %v1893_v47 = vsel %vm298_vm0, %v1382_v55, -inf  ;;  %v1900_v11 = vsel %vm298_vm0, %v1381_v38, -inf  ;;  %v2375_v27 = vrot.slane %v5809_v53, 2  ;;  %v5923_v54 = vpop.f32.mrb[16].mxu0 }
 0x241   : > { %v5925_v52 = vmax.f32 %v1967_v49, %v1968_v40  ;;  %v1888_v44 = vmax.f32 %v1886_v29, %v1887_v21  ;;  %v1894_v10 = vrot.slane %v1893_v47, 4  ;;  %v1901_v37 = vrot.slane %v1900_v11, 4  ;;  %v5927_v39 = vpop.f32.mrb[17].mxu0 }
 0x242   : > { %v1907_v60 = vsel %vm298_vm0, %v1383_v24, -inf  ;;  %v2376_v30 = vrot.slane %v5819_v19, 2  ;;  %v1172_v0 = vadd.f32 %v5931_v6, %v5861_v41  ;;  %v1164_v53 = vadd.f32 %v5931_v6, %v5865_v20  ;;  %v5937_v62 = vpop.f32.mrb[18].mxu0 }
 0x243   : > { %v1889_v34 = vrot.slane %v1888_v44, 2  ;;  %v1895_v9 = vmax.f32 %v1893_v47, %v1894_v10  ;;  %v1902_v23 = vmax.f32 %v1900_v11, %v1901_v37  ;;  %v1908_v2 = vrot.slane %v1907_v60, 4  ;;  %v5939_v46 = vpop.f32.mrb[19].mxu0 }
 0x244   : > { %v2377_v61 = vsel %vm442_vm2, %v2375_v27, %v2376_v30  ;;  %v2378_v19 = vsel %vm442_vm2, %v2376_v30, %v4894_v17  ;;  %v1452_v5 = vcombine.high %v1172_v0, %v1172_v0  ;;  %v1459_v43 = vrot.slane %v1172_v0, %v5565_v50 }
 0x245   : > { %v1890_v41 = vmax.f32 %v1888_v44, %v1889_v34  ;;  %v1896_v13 = vrot.slane %v1895_v9, 2  ;;  %v1903_v56 = vrot.slane %v1902_v23, 2  ;;  %v1909_v20 = vmax.f32 %v1907_v60, %v1908_v2 }
 0x246   : > { %v5945_v45 = vpack.c.bf16 %v2378_v19, %v2377_v61  ;;  %v1466_v14 = vrot.slane %v1452_v5, %v5565_v50  ;;  %v1467_v3 = vcombine.high %v1459_v43, %v1459_v43  ;;  %v2026_v48 = vsel %vm298_vm0, %v1459_v43, -inf }
 0x247   : > { %v1891_v4 = vrot.slane %v1890_v41, 1  ;;  %v1897_v18 = vmax.f32 %v1895_v9, %v1896_v13  ;;  %v1904_v59 = vmax.f32 %v1902_v23, %v1903_v56  ;;  %v1910_v12 = vrot.slane %v1909_v20, 2 }
 0x248   : > { %6498 = vst [vmem:[#allocation11_spill] sm:$0xff] %v5945_v45  ;;  %v1468_v15 = vcombine.high %v1466_v14, %v1466_v14  ;;  %v2027_v49 = vrot.slane %v2026_v48, 4  ;;  %v2033_v26 = vsel %vm298_vm0, %v1467_v3, -inf  ;;  %v2040_v38 = vsel %vm298_vm0, %v1466_v14, -inf }
 0x249   : > { %v1892_v55 = vmax.f32 %v1890_v41, %v1891_v4  ;;  %v1898_v29 = vrot.slane %v1897_v18, 1  ;;  %v1905_v40 = vrot.slane %v1904_v59, 1  ;;  %v1911_v21 = vmax.f32 %v1909_v20, %v1910_v12 }
 0x24a   : > { %v2028_v24 = vmax.f32 %v2026_v48, %v2027_v49  ;;  %v2034_v47 = vrot.slane %v2033_v26, 4  ;;  %v2041_v11 = vrot.slane %v2040_v38, 4  ;;  %v2047_v27 = vsel %vm298_vm0, %v1468_v15, -inf }
 0x24b   : > { %v1899_v44 = vmax.f32 %v1897_v18, %v1898_v29  ;;  %v1906_v10 = vmax.f32 %v1904_v59, %v1905_v40  ;;  %v1912_v37 = vrot.slane %v1911_v21, 1  ;;  %v2214_v60 = vmax.f32 %v1892_v55, %v5898_v33 }
 0x24c   : > { %v2029_v30 = vrot.slane %v2028_v24, 2  ;;  %v2035_v0 = vmax.f32 %v2033_v26, %v2034_v47  ;;  %v2042_v34 = vmax.f32 %v2040_v38, %v2041_v11  ;;  %v2048_v9 = vrot.slane %v2047_v27, 4 }
 0x24d   : > { %v1913_v23 = vmax.f32 %v1911_v21, %v1912_v37  ;;  %v2215_v2 = vmax.f32 %v1899_v44, %v5913_v63  ;;  %v2216_v61 = vmax.f32 %v1906_v10, %v5915_v22  ;;  %v2295_v19 = vsel %vm2280_vm3, %v2214_v60, %v5911_v1 }
 0x24e   : > { %v2030_v5 = vmax.f32 %v2028_v24, %v2029_v30  ;;  %v2036_v43 = vrot.slane %v2035_v0, 2  ;;  %v2043_v41 = vrot.slane %v2042_v34, 2  ;;  %v2049_v13 = vmax.f32 %v2047_v27, %v2048_v9 }
 0x24f   : > { %v2217_v56 = vmax.f32 %v1913_v23, %v5925_v52  ;;  %v2296_v33 = vsel %vm2282_vm4, %v2215_v2, %v2295_v19  ;;  %v1418_v20 = vcombine.high %v1164_v53, %v1164_v53  ;;  %v1425_v14 = vrot.slane %v1164_v53, %v5565_v50 }
 0x250   : > { %v5961_v3 = vsel %vm298_vm0, 0.0, %v2296_v33  ;;  %v2031_v63 = vrot.slane %v2030_v5, 1  ;;  %v2037_v48 = vmax.f32 %v2035_v0, %v2036_v43  ;;  %v2044_v22 = vmax.f32 %v2042_v34, %v2043_v41 }
 0x251   : > { %v2297_v4 = vsel %vm2284_vm5, %v2217_v56, %v2216_v61  ;;  %v2050_v1 = vrot.slane %v2049_v13, 2  ;;  %v1432_v18 = vrot.slane %v1418_v20, %v5565_v50  ;;  %v1433_v59 = vcombine.high %v1425_v14, %v1425_v14 }
 0x252   : > { %v5966_v12 = vsel %vm298_vm0, %v2297_v4, 0.0  ;;  %v5968_v52 = vpack.c.bf16 %v2297_v4, %v2296_v33  ;;  %v5970_v15 = vmax.f32 %v2030_v5, %v2031_v63  ;;  %v2038_v53 = vrot.slane %v2037_v48, 1 }
 0x253   : > { %v2045_v49 = vrot.slane %v2044_v22, 1  ;;  %v2051_v26 = vmax.f32 %v2049_v13, %v2050_v1  ;;  %v1434_v38 = vcombine.high %v1432_v18, %v1432_v18  ;;  %v1970_v55 = vsel %vm298_vm0, %v1425_v14, -inf }
 0x254   : > { %6499 = vst [vmem:[#allocation12_spill] sm:$0xff] %v5968_v52  ;;  %3740 = vmatprep.mubr.msk.bf16.mxu0 %vm5656_vm7, %v5968_v52  ;;  %v5976_v29 = vmax.f32 %v2037_v48, %v2038_v53  ;;  %v1971_v40 = vrot.slane %v1970_v55, 4  ;;  %v1977_v21 = vsel %vm298_vm0, %v1433_v59, -inf  ;;  %v1984_v24 = vsel %vm298_vm0, %v1432_v18, -inf }
 0x255   : > { %3149 = vmatmul.mubr.bf16.gmra.mrb[32].mxu0 %v5945_v45  ;;  %v5981_v47 = vmax.f32 %v2044_v22, %v2045_v49  ;;  %v2052_v11 = vrot.slane %v2051_v26, 1  ;;  %v1978_v27 = vrot.slane %v1977_v21, 4  ;;  %v1985_v44 = vrot.slane %v1984_v24, 4 }
 0x256   : > { %v1972_v10 = vmax.f32 %v1970_v55, %v1971_v40  ;;  %v1991_v37 = vsel %vm298_vm0, %v1434_v38, -inf  ;;  %v1175_v60 = vadd.f32 %v5931_v6, %v5867_v36  ;;  %v2348_v30 = vrot.slane %v5961_v3, 1 }
 0x257   : > { %v5987_v0 = vmax.f32 %v2051_v26, %v2052_v11  ;;  %v1979_v34 = vmax.f32 %v1977_v21, %v1978_v27  ;;  %v1986_v9 = vmax.f32 %v1984_v24, %v1985_v44  ;;  %v1992_v23 = vrot.slane %v1991_v37, 4 }
 0x258   : > { %v1973_v2 = vrot.slane %v1972_v10, 2  ;;  %v1469_v61 = vcombine.high %v1175_v60, %v1175_v60  ;;  %v1476_v19 = vrot.slane %v1175_v60, %v5565_v50  ;;  %v2349_v5 = vrot.slane %v5966_v12, 1 }
 0x259   : > { %v1980_v43 = vrot.slane %v1979_v34, 2  ;;  %v1987_v41 = vrot.slane %v1986_v9, 2  ;;  %v1993_v13 = vmax.f32 %v1991_v37, %v1992_v23  ;;  %v1167_v56 = vadd.f32 %v5931_v6, %v5874_v42 }
 0x25a   : > { %v1974_v36 = vmax.f32 %v1972_v10, %v1973_v2  ;;  %v1483_v33 = vrot.slane %v1469_v61, %v5565_v50  ;;  %v1484_v20 = vcombine.high %v1476_v19, %v1476_v19  ;;  %v2054_v14 = vsel %vm298_vm0, %v1476_v19, -inf }
 0x25b   : > { %v1981_v63 = vmax.f32 %v1979_v34, %v1980_v43  ;;  %v1988_v48 = vmax.f32 %v1986_v9, %v1987_v41  ;;  %v1994_v22 = vrot.slane %v1993_v13, 2  ;;  %v2055_v4 = vrot.slane %v2054_v14, 4 }
 0x25c   : > { %v1975_v1 = vrot.slane %v1974_v36, 1  ;;  %v1485_v18 = vcombine.high %v1483_v33, %v1483_v33  ;;  %v2061_v59 = vsel %vm298_vm0, %v1484_v20, -inf  ;;  %v2068_v53 = vsel %vm298_vm0, %v1483_v33, -inf }
 0x25d   : > { %v1982_v49 = vrot.slane %v1981_v63, 1  ;;  %v1989_v26 = vrot.slane %v1988_v48, 1  ;;  %v1995_v38 = vmax.f32 %v1993_v13, %v1994_v22  ;;  %v2056_v42 = vmax.f32 %v2054_v14, %v2055_v4 }
 0x25e   : > { %v1976_v55 = vmax.f32 %v1974_v36, %v1975_v1  ;;  %v2062_v40 = vrot.slane %v2061_v59, 4  ;;  %v2069_v21 = vrot.slane %v2068_v53, 4  ;;  %v2075_v24 = vsel %vm298_vm0, %v1485_v18, -inf }
 0x25f   : > { %v1983_v11 = vmax.f32 %v1981_v63, %v1982_v49  ;;  %v5998_v27 = vmax.f32 %v1988_v48, %v1989_v26  ;;  %v1996_v44 = vrot.slane %v1995_v38, 1  ;;  %v2057_v10 = vrot.slane %v2056_v42, 2 }
 0x260   : > { %v2218_v37 = vmax.f32 %v1976_v55, %v5970_v15  ;;  %v2063_v60 = vmax.f32 %v2061_v59, %v2062_v40  ;;  %v2070_v34 = vmax.f32 %v2068_v53, %v2069_v21  ;;  %v2076_v9 = vrot.slane %v2075_v24, 4 }
 0x261   : > { %v6001_v23 = vmax.f32 %v1995_v38, %v1996_v44  ;;  %v2219_v2 = vmax.f32 %v1983_v11, %v5976_v29  ;;  %v2058_v19 = vmax.f32 %v2056_v42, %v2057_v10  ;;  %v2350_v36 = vsel %vm356_vm1, %v2348_v30, %v2349_v5 }
 0x262   : > { %v2064_v43 = vrot.slane %v2063_v60, 2  ;;  %v2071_v41 = vrot.slane %v2070_v34, 2  ;;  %v2077_v13 = vmax.f32 %v2075_v24, %v2076_v9  ;;  %v2351_v14 = vsel %vm356_vm1, %v2349_v5, %v4875_v8 }
 0x263   : > { %v6010_v15 = vsel %vm2274_vm13, %v2219_v2, %v2218_v37  ;;  %v2059_v20 = vrot.slane %v2058_v19, 1  ;;  %v6014_v22 = vpack.c.bf16 %v2351_v14, %v2350_v36  ;;  %v1435_v1 = vcombine.high %v1167_v56, %v1167_v56 }
 0x264   : > { %v2065_v29 = vmax.f32 %v2063_v60, %v2064_v43  ;;  %v2072_v63 = vmax.f32 %v2070_v34, %v2071_v41  ;;  %v2078_v48 = vrot.slane %v2077_v13, 2  ;;  %v1442_v30 = vrot.slane %v1167_v56, %v5565_v50 }
 0x265   : > { %6500 = vst [vmem:[#allocation13_spill] sm:$0xff] %v6014_v22  ;;  %v6016_v4 = vmax.f32 %v2058_v19, %v2059_v20  ;;  %v1188_v18 = vadd.f32 %v5931_v6, %v5923_v54  ;;  %3067 = vmatprep.mubr.bf16.mxu1 %v6014_v22  ;;  %v6024_v5 = vadd.f32 %v5931_v6, %v5927_v39 }
 0x266   : > { %v2066_v59 = vrot.slane %v2065_v29, 1  ;;  %v2073_v53 = vrot.slane %v2072_v63, 1  ;;  %v2079_v49 = vmax.f32 %v2077_v13, %v2078_v48  ;;  %v1449_v26 = vrot.slane %v1435_v1, %v5565_v50  ;;  %3720 = vmatmul.mubr.msk.bf16.gmra.mrb[16].mxu1 %vm5656_vm7, %v5968_v52 }
 0x267   : > { %v1450_v38 = vcombine.high %v1442_v30, %v1442_v30  ;;  %v1998_v42 = vsel %vm298_vm0, %v1442_v30, -inf  ;;  %v1520_v56 = vcombine.high %v1188_v18, %v1188_v18  ;;  %v1527_v44 = vrot.slane %v1188_v18, %v5565_v50 }
 0x268   : > { %v6031_v54 = vmax.f32 %v2065_v29, %v2066_v59  ;;  %v6033_v55 = vmax.f32 %v2072_v63, %v2073_v53  ;;  %v2080_v40 = vrot.slane %v2079_v49, 1  ;;  %v1999_v21 = vrot.slane %v1998_v42, 4 }
 0x269   : > { %v1451_v24 = vcombine.high %v1449_v26, %v1449_v26  ;;  %v2005_v39 = vsel %vm298_vm0, %v1450_v38, -inf  ;;  %v2012_v11 = vsel %vm298_vm0, %v1449_v26, -inf  ;;  %v1534_v2 = vrot.slane %v1520_v56, %v5565_v50 }
 0x26a   : > { %v6038_v10 = vmax.f32 %v2079_v49, %v2080_v40  ;;  %v2000_v37 = vmax.f32 %v1998_v42, %v1999_v21  ;;  %v2006_v60 = vrot.slane %v2005_v39, 4  ;;  %v2013_v34 = vrot.slane %v2012_v11, 4 }
 0x26b   : > { %v2019_v9 = vsel %vm298_vm0, %v1451_v24, -inf  ;;  %v1535_v19 = vcombine.high %v1527_v44, %v1527_v44  ;;  %v2138_v43 = vsel %vm298_vm0, %v1527_v44, -inf  ;;  %v1536_v14 = vcombine.high %v1534_v2, %v1534_v2 }
 0x26c   : > { %v2001_v41 = vrot.slane %v2000_v37, 2  ;;  %v2007_v13 = vmax.f32 %v2005_v39, %v2006_v60  ;;  %v2014_v36 = vmax.f32 %v2012_v11, %v2013_v34  ;;  %v2020_v20 = vrot.slane %v2019_v9, 4 }
 0x26d   : > { %v2139_v29 = vrot.slane %v2138_v43, 4  ;;  %v2145_v63 = vsel %vm298_vm0, %v1535_v19, -inf  ;;  %v2152_v48 = vsel %vm298_vm0, %v1534_v2, -inf  ;;  %v2159_v38 = vsel %vm298_vm0, %v1536_v14, -inf }
 0x26e   : > { %v2002_v1 = vmax.f32 %v2000_v37, %v2001_v41  ;;  %v2008_v30 = vrot.slane %v2007_v13, 2  ;;  %v2015_v18 = vrot.slane %v2014_v36, 2  ;;  %v2021_v59 = vmax.f32 %v2019_v9, %v2020_v20 }
 0x26f   : > { %v2140_v53 = vmax.f32 %v2138_v43, %v2139_v29  ;;  %v2146_v49 = vrot.slane %v2145_v63, 4  ;;  %v2153_v26 = vrot.slane %v2152_v48, 4  ;;  %v2160_v44 = vrot.slane %v2159_v38, 4 }
 0x270   : > { %v2003_v42 = vrot.slane %v2002_v1, 1  ;;  %v2009_v56 = vmax.f32 %v2007_v13, %v2008_v30  ;;  %v2016_v40 = vmax.f32 %v2014_v36, %v2015_v18  ;;  %v2022_v21 = vrot.slane %v2021_v59, 2 }
 0x271   : > { %v2141_v24 = vrot.slane %v2140_v53, 2  ;;  %v2147_v39 = vmax.f32 %v2145_v63, %v2146_v49  ;;  %v2154_v11 = vmax.f32 %v2152_v48, %v2153_v26  ;;  %v2161_v41 = vmax.f32 %v2159_v38, %v2160_v44 }
 0x272   : > { %v6046_v60 = vmax.f32 %v2002_v1, %v2003_v42  ;;  %v2010_v34 = vrot.slane %v2009_v56, 1  ;;  %v2017_v37 = vrot.slane %v2016_v40, 1  ;;  %v2023_v2 = vmax.f32 %v2021_v59, %v2022_v21 }
 0x273   : > { %v2142_v19 = vmax.f32 %v2140_v53, %v2141_v24  ;;  %v2148_v9 = vrot.slane %v2147_v39, 2  ;;  %v2155_v43 = vrot.slane %v2154_v11, 2  ;;  %v2162_v1 = vrot.slane %v2161_v41, 2 }
 0x274   : > { %v6048_v20 = vmax.f32 %v2009_v56, %v2010_v34  ;;  %v6050_v14 = vmax.f32 %v2016_v40, %v2017_v37  ;;  %v2024_v13 = vrot.slane %v2023_v2, 1  ;;  %v1486_v18 = vcombine.high %v6024_v5, %v6024_v5 }
 0x275   : > { %v2143_v29 = vrot.slane %v2142_v19, 1  ;;  %v2149_v63 = vmax.f32 %v2147_v39, %v2148_v9  ;;  %v2156_v48 = vmax.f32 %v2154_v11, %v2155_v43  ;;  %v1493_v59 = vrot.slane %v6024_v5, %v5565_v50 }
 0x276   : > { %v6054_v30 = vmax.f32 %v2023_v2, %v2024_v13  ;;  %v1191_v53 = vadd.f32 %v5931_v6, %v5937_v62  ;;  %v2163_v42 = vmax.f32 %v2161_v41, %v2162_v1  ;;  %v1500_v56 = vrot.slane %v1486_v18, %v5565_v50 }
 0x277   : > { %v6062_v49 = vmax.f32 %v2142_v19, %v2143_v29  ;;  %v2150_v26 = vrot.slane %v2149_v63, 1  ;;  %v2157_v38 = vrot.slane %v2156_v48, 1  ;;  %v1501_v40 = vcombine.high %v1493_v59, %v1493_v59 }
 0x278   : > { %v2082_v21 = vsel %vm298_vm0, %v1493_v59, -inf  ;;  %v1537_v24 = vcombine.high %v1191_v53, %v1191_v53  ;;  %v2164_v44 = vrot.slane %v2163_v42, 1  ;;  %v1502_v34 = vcombine.high %v1500_v56, %v1500_v56 }
 0x279   : > { %v6066_v39 = vmax.f32 %v2149_v63, %v2150_v26  ;;  %v6068_v11 = vmax.f32 %v2156_v48, %v2157_v38  ;;  %v2083_v5 = vrot.slane %v2082_v21, 4  ;;  %v2089_v62 = vsel %vm298_vm0, %v1501_v40, -inf  ;;  %v6080_v40 = vpop.f32.mrb[0].mxu1 }
 0x27a   : > { %v2096_v37 = vsel %vm298_vm0, %v1500_v56, -inf  ;;  %v1544_v2 = vrot.slane %v1191_v53, %v5565_v50  ;;  %v6073_v19 = vmax.f32 %v2163_v42, %v2164_v44  ;;  %v2090_v43 = vrot.slane %v2089_v62, 4 }
 0x27b   : > { %v2084_v9 = vmax.f32 %v2082_v21, %v2083_v5  ;;  %v2097_v41 = vrot.slane %v2096_v37, 4  ;;  %v2103_v13 = vsel %vm298_vm0, %v1502_v34, -inf  ;;  %v1551_v29 = vrot.slane %v1537_v24, %v5565_v50  ;;  %v6082_v24 = vpop.f32.mrb[1].mxu1 }
 0x27c   : > { %v1552_v63 = vcombine.high %v1544_v2, %v1544_v2  ;;  %v2166_v48 = vsel %vm298_vm0, %v1544_v2, -inf  ;;  %v2091_v18 = vmax.f32 %v2089_v62, %v2090_v43  ;;  %v2104_v26 = vrot.slane %v2103_v13, 4 }
 0x27d   : > { %v2085_v1 = vrot.slane %v2084_v9, 2  ;;  %v2098_v59 = vmax.f32 %v2096_v37, %v2097_v41  ;;  %v1553_v38 = vcombine.high %v1551_v29, %v1551_v29  ;;  %v2167_v56 = vrot.slane %v2166_v48, 4  ;;  %v6085_v37 = vpop.f32.mrb[2].mxu1 }
 0x27e   : > { %v2173_v53 = vsel %vm298_vm0, %v1552_v63, -inf  ;;  %v2180_v42 = vsel %vm298_vm0, %v1551_v29, -inf  ;;  %v2092_v44 = vrot.slane %v2091_v18, 2  ;;  %v2105_v34 = vmax.f32 %v2103_v13, %v2104_v26  ;;  %v6087_v29 = vpop.f32.mrb[3].mxu1 }
 0x27f   : > { %v2086_v21 = vmax.f32 %v2084_v9, %v2085_v1  ;;  %v2099_v5 = vrot.slane %v2098_v59, 2  ;;  %v2168_v7 = vmax.f32 %v2166_v48, %v2167_v56  ;;  %v2174_v2 = vrot.slane %v2173_v53, 4  ;;  %v6089_v13 = vpop.f32.mrb[4].mxu1 }
 0x280   : > { %v2181_v35 = vrot.slane %v2180_v42, 4  ;;  %v2187_v62 = vsel %vm298_vm0, %v1553_v38, -inf  ;;  %v2093_v41 = vmax.f32 %v2091_v18, %v2092_v44  ;;  %v2106_v36 = vrot.slane %v2105_v34, 2  ;;  %v6091_v22 = vpop.f32.mrb[5].mxu1 }
 0x281   : > { %v2087_v43 = vrot.slane %v2086_v21, 1  ;;  %v2100_v63 = vmax.f32 %v2098_v59, %v2099_v5  ;;  %v2169_v33 = vrot.slane %v2168_v7, 2  ;;  %v2175_v9 = vmax.f32 %v2173_v53, %v2174_v2 }
 0x282   : > { %v2182_v1 = vmax.f32 %v2180_v42, %v2181_v35  ;;  %v2188_v61 = vrot.slane %v2187_v62, 4  ;;  %v2094_v48 = vrot.slane %v2093_v41, 1  ;;  %v2107_v52 = vmax.f32 %v2105_v34, %v2106_v36 }
 0x283   : > { %v2088_v26 = vmax.f32 %v2086_v21, %v2087_v43  ;;  %v2101_v56 = vrot.slane %v2100_v63, 1  ;;  %v2170_v38 = vmax.f32 %v2168_v7, %v2169_v33  ;;  %v2176_v16 = vrot.slane %v2175_v9, 2  ;;  %v6096_v21 = vpop.f32.mrb[6].mxu1 }
 0x284   : > { %v2183_v45 = vrot.slane %v2182_v1, 2  ;;  %v2189_v18 = vmax.f32 %v2187_v62, %v2188_v61  ;;  %v2095_v59 = vmax.f32 %v2093_v41, %v2094_v48  ;;  %v2108_v5 = vrot.slane %v2107_v52, 1  ;;  %v6105_v33 = vpop.f32.mrb[7].mxu1 }
 0x285   : > { %v6093_v44 = vmax.f32 %v2100_v63, %v2101_v56  ;;  %v2226_v53 = vmax.f32 %v2088_v26, %v6062_v49  ;;  %v2171_v35 = vrot.slane %v2170_v38, 1  ;;  %v2177_v42 = vmax.f32 %v2175_v9, %v2176_v16 }
 0x286   : > { %v2184_v2 = vmax.f32 %v2182_v1, %v2183_v45  ;;  %v2190_v51 = vrot.slane %v2189_v18, 2  ;;  %v6098_v43 = vmax.f32 %v2107_v52, %v2108_v5  ;;  %v2227_v36 = vmax.f32 %v2095_v59, %v6066_v39 }
 0x287   : > { %v2228_v7 = vmax.f32 %v6093_v44, %v6068_v11  ;;  %v1183_v61 = vadd.f32 %v5931_v6, %v5939_v46  ;;  %v6107_v34 = vmax.f32 %v2170_v38, %v2171_v35  ;;  %v2178_v49 = vrot.slane %v2177_v42, 1 }
 0x288   : > { %v2185_v16 = vrot.slane %v2184_v2, 1  ;;  %v2191_v45 = vmax.f32 %v2189_v18, %v2190_v51  ;;  %v2229_v62 = vmax.f32 %v6098_v43, %v6073_v19  ;;  %v2304_v52 = vsel %vm2274_vm13, %v2227_v36, %v2226_v53 }
 0x289   : > { %v1503_v41 = vcombine.high %v1183_v61, %v1183_v61  ;;  %v1510_v39 = vrot.slane %v1183_v61, %v5565_v50  ;;  %v6113_v63 = vmax.f32 %v2177_v42, %v2178_v49  ;;  %v2223_v46 = vmax.f32 %v6048_v20, %v6031_v54 }
 0x28a   : > { %v6115_v9 = vmax.f32 %v2184_v2, %v2185_v16  ;;  %v2192_v6 = vrot.slane %v2191_v45, 1  ;;  %v2224_v48 = vmax.f32 %v6050_v14, %v6033_v55  ;;  %v2225_v18 = vmax.f32 %v6054_v30, %v6038_v10 }
 0x28b   : > { %v1517_v1 = vrot.slane %v1503_v41, %v5565_v50  ;;  %v1518_v26 = vcombine.high %v1510_v39, %v1510_v39  ;;  %v2110_v51 = vsel %vm298_vm0, %v1510_v39, -inf  ;;  %v6501_v59 = vmax.f32 %v5998_v27, %v5981_v47  ;;  %v6142_v27 = vpop.f32.mrb[20].mxu0 }
 0x28c   : > { %v6123_v56 = vmax.f32 %v2191_v45, %v2192_v6  ;;  %v2111_v38 = vrot.slane %v2110_v51, 4  ;;  %v6502_v55 = vmax.f32 %v6001_v23, %v5987_v0  ;;  %v6503_v10 = vmax.f32 %v6046_v60, %v6016_v4  ;;  %v3890_v23 = vpop.f32.mrb[21].mxu0 }
 0x28d   : > { %v2299_v54 = vsel %vm2276_vm14, %v6501_v59, %v6010_v15  ;;  %v1519_v20 = vcombine.high %v1517_v1, %v1517_v1  ;;  %v2117_v50 = vsel %vm298_vm0, %v1518_v26, -inf  ;;  %v2124_v5 = vsel %vm298_vm0, %v1517_v1, -inf  ;;  %v3892_v45 = vpop.f32.mrb[22].mxu0 }
 0x28e   : > { %v2300_v14 = vsel %vm2278_vm15, %v6502_v55, %v2299_v54  ;;  %v2112_v53 = vmax.f32 %v2110_v51, %v2111_v38  ;;  %v2118_v35 = vrot.slane %v2117_v50, 4  ;;  %v2125_v42 = vrot.slane %v2124_v5, 4  ;;  %v3893_v6 = vpop.f32.mrb[23].mxu0 }
 0x28f   : > { %v2301_v47 = vsel %vm2280_vm3, %v6503_v10, %v2300_v14  ;;  %v2131_v15 = vsel %vm298_vm0, %v1519_v20, -inf  ;;  %v2303_v2 = vsel %vm2284_vm5, %v2225_v18, %v2224_v48  ;;  %v2379_v0 = vrot.slane %v5961_v3, 2 }
 0x290   : > { %v2302_v30 = vsel %vm2282_vm4, %v2223_v46, %v2301_v47  ;;  %v2113_v36 = vrot.slane %v2112_v53, 2  ;;  %v2119_v61 = vmax.f32 %v2117_v50, %v2118_v35  ;;  %v2126_v49 = vmax.f32 %v2124_v5, %v2125_v42 }
 0x291   : > { %v2132_v16 = vrot.slane %v2131_v15, 4  ;;  %v2323_v4 = vsel %vm298_vm0, 0.0, %v2302_v30  ;;  %v2328_v60 = vsel %vm298_vm0, %v2303_v2, 0.0  ;;  %v6150_v41 = vpack.c.bf16 %v2303_v2, %v2302_v30 }
 0x292   : > { %v2380_v39 = vrot.slane %v5966_v12, 2  ;;  %v2114_v46 = vmax.f32 %v2112_v53, %v2113_v36  ;;  %v2120_v1 = vrot.slane %v2119_v61, 2  ;;  %v2127_v26 = vrot.slane %v2126_v49, 2 }
 0x293   : > { %v2133_v51 = vmax.f32 %v2131_v15, %v2132_v16  ;;  %3744 = vmatprep.mubr.msk.bf16.mxu0 %vm5656_vm7, %v6150_v41  ;;  %v2352_v38 = vrot.slane %v2323_v4, 1  ;;  %v2353_v18 = vrot.slane %v2328_v60, 1  ;;  %v2305_v14 = vsel %vm2276_vm14, %v2228_v7, %v2304_v52 }
 0x294   : > { %v2381_v3 = vsel %vm442_vm2, %v2379_v0, %v2380_v39  ;;  %v2382_v48 = vsel %vm442_vm2, %v2380_v39, %v4894_v17  ;;  %v2115_v59 = vrot.slane %v2114_v46, 1  ;;  %v2121_v54 = vmax.f32 %v2119_v61, %v2120_v1 }
 0x295   : > { %v2128_v20 = vmax.f32 %v2126_v49, %v2127_v26  ;;  %v2134_v12 = vrot.slane %v2133_v51, 2  ;;  %v6159_v50 = vpack.c.bf16 %v2382_v48, %v2381_v3  ;;  %v2354_v5 = vsel %vm356_vm1, %v2352_v38, %v2353_v18  ;;  %v6188_v49 = vld [vmem:[#allocation6] ss:$0 sm:$0xff] }
 0x296   : > { %v2355_v55 = vsel %vm356_vm1, %v2353_v18, %v4875_v8  ;;  %v2116_v53 = vmax.f32 %v2114_v46, %v2115_v59  ;;  %v2122_v35 = vrot.slane %v2121_v54, 1  ;;  %v2306_v15 = vsel %vm2278_vm15, %v2229_v62, %v2305_v14  ;;  %v4601_v14 = vld [vmem:[%s6467_s3 + $0x228] sm:$0xff]  }
 0x297   : > { %v2129_v42 = vrot.slane %v2128_v20, 1  ;;  %v2135_v10 = vmax.f32 %v2133_v51, %v2134_v12  ;;  %3157 = vmatmul.mubr.bf16.gmra.mrb[36].mxu0 %v6159_v50  ;;  %v6169_v47 = vpack.c.bf16 %v2355_v55, %v2354_v5  ;;  %v2383_v30 = vrot.slane %v2323_v4, 2  ;;  %v6507_v12 = vld [vmem:[#allocation11_spill] sm:$0xff]  ;;  %v6508_v5 = vld [vmem:[#allocation9_spill] sm:$0xff] }
 0x298   : > { %v2384_v2 = vrot.slane %v2328_v60, 2  ;;  %v2123_v0 = vmax.f32 %v2121_v54, %v2122_v35  ;;  %v2230_v44 = vmax.f32 %v2116_v53, %v6107_v34  ;;  %v3833_v61 = vadd.f32 %v6082_v24, %v6080_v40  ;;  %v6506_v54 = vld [vmem:[#allocation10_spill] sm:$0xff]  ;;  %v6509_v55 = vld [vmem:[#allocation13_spill] sm:$0xff]  ;;  %v6510_v53 = vld [vmem:[#allocation12_spill] sm:$0xff] }
 0x299   : > { %v2130_v36 = vmax.f32 %v2128_v20, %v2129_v42  ;;  %v2136_v11 = vrot.slane %v2135_v10, 1  ;;  %3075 = vmatprep.mubr.bf16.mxu1 %v6169_v47  ;;  %v3836_v40 = vadd.f32 %v6087_v29, %v6085_v37  ;;  %v6197_v24 = vadd.f32 %v6091_v22, %v6089_v13  ;;  %v4598_v20 = vld [vmem:[%s6467_s3 + $0x210] sm:$0xff]   ;;  %v4603_v42 = vld [vmem:[%s6467_s3 + $0x238] sm:$0xff]  }
 0x29a   : > { %v2385_v7 = vsel %vm442_vm2, %v2383_v30, %v2384_v2  ;;  %v2386_v52 = vsel %vm442_vm2, %v2384_v2, %v4894_v17  ;;  %3724 = vmatmul.mubr.msk.bf16.gmra.mrb[20].mxu1 %vm5656_vm7, %v6150_v41  ;;  %v2231_v43 = vmax.f32 %v2123_v0, %v6113_v63  ;;  %v2307_v34 = vsel %vm2280_vm3, %v2230_v44, %v2306_v15  ;;  %v4602_v35 = vld [vmem:[%s6467_s3 + $0x230] sm:$0xff]  }
 0x29b   : > { %v2137_v19 = vmax.f32 %v2135_v10, %v2136_v11  ;;  %v2232_v62 = vmax.f32 %v2130_v36, %v6115_v9  ;;  %v6190_v16 = vpack.c.bf16 %v2386_v52, %v2385_v7  ;;  %v3038_v4 = vadd.f32 %v3833_v61, %v6188_v49 }
 0x29c   : > { %v2308_v63 = vsel %vm2282_vm4, %v2231_v43, %v2307_v34  ;;  %v6203_v9 = vadd.f32 %v6105_v33, %v6096_v21  ;;  %v3891_v39 = vadd.f32 %v3890_v23, %v6142_v27  ;;  %v3041_v1 = vadd.f32 %v3836_v40, %v6188_v49 }
 0x29d   : > { %v2233_v60 = vmax.f32 %v2137_v19, %v6123_v56  ;;  %v2324_v46 = vsel %vm298_vm0, 0.0, %v2308_v63  ;;  %v3894_v26 = vadd.f32 %v3893_v6, %v3892_v45  ;;  %v6504_v38 = vmov 0.0|0.0  }
 0x29e   : > { %v2356_v29 = vrot.slane %v2324_v46, 1  ;;  %v2387_v22 = vrot.slane %v2324_v46, 2  ;;  %v6212_v51 = vadd.f32 %v3891_v39, %v3038_v4  ;;  %v6505_v59 = vmov 0.0  }
 0x29f   : > { %v2309_v37 = vsel %vm2284_vm5, %v2233_v60, %v2232_v62  ;;  %v6214_v3 = vadd.f32 %v3894_v26, %v3041_v1 }
 0x2a0   : > { %v2329_v13 = vsel %vm298_vm0, %v2309_v37, 0.0  ;;  %v6210_v56 = vpack.c.bf16 %v2309_v37, %v2308_v63  ;;  %vm4721_vm0 = vmmov 0  }
 0x2a1   : > { %v2357_v21 = vrot.slane %v2329_v13, 1  ;;  %v2388_v33 = vrot.slane %v2329_v13, 2 }
 0x2a2   : > { %3748 = vmatprep.mubr.msk.bf16.mxu0 %vm5656_vm7, %v6210_v56 }
 0x2a3   : > { %3165 = vmatmul.mubr.bf16.gmra.mrb[40].mxu0 %v6190_v16  ;;  %v2358_v27 = vsel %vm356_vm1, %v2356_v29, %v2357_v21  ;;  %v2359_v23 = vsel %vm356_vm1, %v2357_v21, %v4875_v8  ;;  %v2389_v45 = vsel %vm442_vm2, %v2387_v22, %v2388_v33  ;;  %v2390_v6 = vsel %vm442_vm2, %v2388_v33, %v4894_v17  ;;  %v4595_v8 = vld [vmem:[%s6467_s3 + $0x200] sm:$0xff]   ;;  %v4597_v17 = vld [vmem:[%s6467_s3 + $0x208] sm:$0xff]  }
 0x2a4   : > { %v6226_v48 = vpack.c.bf16 %v2359_v23, %v2358_v27  ;;  %3172 = vmatprep.mubr.bf16.mxu0 %v6504_v38  ;;  %v6229_v18 = vpack.c.bf16 %v2390_v6, %v2389_v45  ;;  %vm3504_vm1 = vcmask 257024   ;;  %vm3506_vm2 = vcmask 253952  }
 0x2a6   : > { %3083 = vmatprep.mubr.bf16.mxu1 %v6226_v48 }
 0x2a7   : > { %3728 = vmatmul.mubr.msk.bf16.gmra.mrb[24].mxu1 %vm5656_vm7, %v6210_v56 }
 0x2a8   : > { %3213 = vmatprep.mubr.bf16.mxu1 %v5559_v32 }
 0x2ab   : > { %3173 = vmatmul.mubr.bf16.gmra.mrb[44].mxu0 %v6229_v18 }
 0x2ac   : > { %3302 = vmatprep.mubr.bf16.mxu0 %v5693_v31 }
 0x2af   : > { %3214 = vmatmul.mubr.bf16.vlgmr.msra.gmra.mrb[28].mxu1 %v5536_v28 }
 0x2b0   : > { %4144 = vmatpush3.bf16.msra.mxu1 %v4595_v8  ;;  %3221 = vmatprep.mubr.bf16.mxu1 %v5730_v57 }
 0x2b1   : > { %4137 = vmatprep.subr.bf16.mxu1 %v6505_v59 }
 0x2b3   : > { %3752 = vmatmul.mubr.msk.bf16.vlgmr.msra.gmra.mrb[48].mxu0 %vm5656_vm7, %v5663_v25  ;;  %v4599_v25 = vld [vmem:[%s6467_s3 + $0x218] sm:$0xff]  }
 0x2b4   : > { %3310 = vmatprep.mubr.bf16.mxu0 %v6506_v54  ;;  %4145 = vmatpush3.bf16.msra.mxu1 %v4597_v17 }
 0x2b5   : > { %4138 = vmatprep.subr.bf16.mxu1 %v6505_v59  ;;  %4093 = vmatpush3.bf16.msra.mxu0 %v4595_v8 }
 0x2b6   : > { %4094 = vmatprep.subr.bf16.mxu0 %v6505_v59 }
 0x2b7   : > { %3222 = vmatmul.mubr.bf16.gmra.mrb[32].mxu1 %v5693_v31  ;;  %v4600_v31 = vld [vmem:[%s6467_s3 + $0x220] sm:$0xff]  }
 0x2b8   : > { %3229 = vmatprep.mubr.bf16.mxu1 %v6507_v12  ;;  %4146 = vmatpush3.bf16.msra.mxu1 %v4598_v20 }
 0x2b9   : > { %4139 = vmatprep.subr.bf16.mxu1 %v6505_v59  ;;  %4095 = vmatpush3.bf16.msra.mxu0 %v4597_v17 }
 0x2ba   : > { %4096 = vmatprep.subr.bf16.mxu0 %v6505_v59 }
 0x2bb   : > { %3756 = vmatmul.mubr.msk.bf16.gmra.mrb[52].mxu0 %vm5656_vm7, %v6508_v5 }
 0x2bc   : > { %3318 = vmatprep.mubr.bf16.mxu0 %v6509_v55  ;;  %4147 = vmatpush3.bf16.msra.mxu1 %v4599_v25 }
 0x2bd   : > { %4140 = vmatprep.subr.bf16.mxu1 %v6505_v59  ;;  %4097 = vmatpush3.bf16.msra.mxu0 %v4598_v20 }
 0x2be   : > { %4098 = vmatprep.subr.bf16.mxu0 %v6505_v59 }
 0x2bf   : > { %3230 = vmatmul.mubr.bf16.gmra.mrb[36].mxu1 %v6506_v54 }
 0x2c0   : > { %3237 = vmatprep.mubr.bf16.mxu1 %v6159_v50  ;;  %4148 = vmatpush3.bf16.msra.mxu1 %v4600_v31 }
 0x2c1   : > { %4141 = vmatprep.subr.bf16.mxu1 %v6505_v59  ;;  %4099 = vmatpush3.bf16.msra.mxu0 %v4599_v25 }
 0x2c2   : > { %4100 = vmatprep.subr.bf16.mxu0 %v6505_v59 }
 0x2c3   : > { %3760 = vmatmul.mubr.msk.bf16.gmra.mrb[56].mxu0 %vm5656_vm7, %v6510_v53 }
 0x2c4   : > { %3326 = vmatprep.mubr.bf16.mxu0 %v6169_v47  ;;  %4149 = vmatpush3.bf16.msra.mxu1 %v4601_v14 }
 0x2c5   : > { %4142 = vmatprep.subr.bf16.mxu1 %v6505_v59  ;;  %4101 = vmatpush3.bf16.msra.mxu0 %v4600_v31 }
 0x2c6   : > { %4102 = vmatprep.subr.bf16.mxu0 %v6505_v59 }
 0x2c7   : > { %3238 = vmatmul.mubr.bf16.gmra.mrb[40].mxu1 %v6509_v55 }
 0x2c8   : > { %3245 = vmatprep.mubr.bf16.mxu1 %v6190_v16  ;;  %4150 = vmatpush3.bf16.msra.mxu1 %v4602_v35 }
 0x2c9   : > { %4143 = vmatprep.subr.bf16.mxu1 %v6505_v59  ;;  %4103 = vmatpush3.bf16.msra.mxu0 %v4601_v14 }
 0x2ca   : > { %4104 = vmatprep.subr.bf16.mxu0 %v6505_v59 }
 0x2cb   : > { %3764 = vmatmul.mubr.msk.bf16.gmra.mrb[60].mxu0 %vm5656_vm7, %v6150_v41  ;;  %v3046_v41 = vadd.f32 %v6197_v24, %v6188_v49 }
 0x2cc   : > { %3334 = vmatprep.mubr.bf16.mxu0 %v6226_v48  ;;  %4151 = vmatpush3.bf16.msra.mxu1 %v4603_v42 }
 0x2cd   : > { %4105 = vmatpush3.bf16.msra.mxu0 %v4602_v35 }
 0x2ce   : > { %4106 = vmatprep.subr.bf16.mxu0 %v6505_v59 }
 0x2cf   : > { %3246 = vmatmul.mubr.bf16.gmra.mrb[44].mxu1 %v6169_v47  ;;  %v3049_v47 = vadd.f32 %v6203_v9, %v6188_v49 }
 0x2d0   : > { %3253 = vmatprep.mubr.bf16.mxu1 %v6229_v18 }
 0x2d1   : > { %4107 = vmatpush3.bf16.msra.mxu0 %v4603_v42 }
 0x2d3   : > { %3768 = vmatmul.mubr.msk.bf16.gmra.mrb[64].mxu0 %vm5656_vm7, %v6210_v56 }
 0x2d4   : > { %3342 = vmatprep.mubr.bf16.mxu0 %v5536_v28 }
 0x2d6   : > { %v3895_v10 = vpop.f32.mrb[24].mxu0 }
 0x2d7   : > { %3254 = vmatmul.mubr.bf16.gmra.mrb[48].mxu1 %v6226_v48  ;;  %v3896_v15 = vpop.f32.mrb[25].mxu0 }
 0x2d8   : > { %3261 = vmatprep.mubr.bf16.mxu1 %v5559_v32  ;;  %v3897_v30 = vadd.f32 %v3896_v15, %v3895_v10  ;;  %v3898_v2 = vpop.f32.mrb[26].mxu0 }
 0x2d9   : > { %v3899_v0 = vpop.f32.mrb[27].mxu0 }
 0x2da   : > { %v6313_v58 = vadd.f32 %v3897_v30, %v3046_v41  ;;  %v3900_v36 = vadd.f32 %v3899_v0, %v3898_v2 }
 0x2db   : > { %3343 = vmatmul.mubr.bf16.gmra.mrb[68].mxu0 %v6504_v38 }
 0x2dc   : > { %3350 = vmatprep.mubr.bf16.mxu0 %v5536_v28  ;;  %v6316_v11 = vadd.f32 %v3900_v36, %v3049_v47 }
 0x2df   : > { %3262 = vmatmul.mubr.bf16.gmra.mrb[52].mxu1 %v5536_v28 }
 0x2e0   : > { %4112 = vmatprep.mubr.msk.bf16.mxu1 %vm4721_vm0, %v6505_v59 }
 0x2e3   : > { %3351 = vmatmul.mubr.bf16.gmra.mrb[72].mxu0 %v6504_v38 }
 0x2e4   : > { %4108 = vmatprep.mubr.msk.bf16.mxu0 %vm4721_vm0, %v6505_v59 }
 0x2e7   : > { %4113 = vmatmul.mubr.bf16.vlgmr.msra.gmra.mrb[56].mxu1 %v6507_v12 }
 0x2e8   : > { %4116 = vmatprep.mubr.msk.bf16.mxu1 %vm4721_vm0, %v6505_v59  ;;  %v3843_v44 = vpop.f32.mrb[8].mxu1 }
 0x2e9   : > { %v3844_v7 = vpop.f32.mrb[9].mxu1 }
 0x2ea   : > { %v3845_v52 = vadd.f32 %v3844_v7, %v3843_v44  ;;  %v3846_v28 = vpop.f32.mrb[10].mxu1 }
 0x2eb   : > { %4109 = vmatmul.mubr.bf16.vlgmr.msra.gmra.mrb[76].mxu0 %v5730_v57  ;;  %v3847_v61 = vpop.f32.mrb[11].mxu1 }
 0x2ec   : > { %v3848_v19 = vadd.f32 %v3847_v61, %v3846_v28  ;;  %v3054_v62 = vadd.f32 %v3845_v52, %v6188_v49 }
 0x2ee   : > { %v3057_v40 = vadd.f32 %v3848_v19, %v6188_v49 }
 0x2ef   : > { %4117 = vmatmul.mubr.bf16.gmra.mrb[60].mxu1 %v6159_v50 }
 0x2f0   : > { %4120 = vmatprep.mubr.msk.bf16.mxu1 %vm4721_vm0, %v6505_v59 }
 0x2f7   : > { %4121 = vmatmul.mubr.bf16.gmra.mrb[64].mxu1 %v6190_v16 }
 0x2f8   : > { %4124 = vmatprep.mubr.msk.bf16.mxu1 %vm4721_vm0, %v6505_v59 }
 0x2ff   : > { %4125 = vmatmul.mubr.bf16.gmra.mrb[68].mxu1 %v6229_v18 }
 0x300   : > { %4128 = vmatprep.mubr.msk.bf16.mxu1 %vm4721_vm0, %v6505_v59  ;;  %v3901_v57 = vpop.f32.mrb[28].mxu0 }
 0x301   : > { %v3902_v43 = vpop.f32.mrb[29].mxu0 }
 0x302   : > { %v3903_v34 = vadd.f32 %v3902_v43, %v3901_v57  ;;  %v3904_v4 = vpop.f32.mrb[30].mxu0 }
 0x303   : > { %v3905_v50 = vpop.f32.mrb[31].mxu0 }
 0x304   : > { %v6339_v24 = vadd.f32 %v3903_v34, %v3054_v62  ;;  %v3906_v16 = vadd.f32 %v3905_v50, %v3904_v4 }
 0x306   : > { %v6342_v60 = vadd.f32 %v3906_v16, %v3057_v40 }
 0x307   : > { %4129 = vmatmul.mubr.bf16.gmra.mrb[72].mxu1 %v5559_v32 }
 0x308   : > { %4132 = vmatprep.mubr.msk.bf16.mxu1 %vm4721_vm0, %v6505_v59 }
 0x30f   : > { %4133 = vmatmul.mubr.bf16.gmra.mrb[76].mxu1 %v5559_v32 }
 0x312   : > { %v3849_v63 = vpop.f32.mrb[12].mxu1 }
 0x313   : > { %v3850_v9 = vpop.f32.mrb[13].mxu1 }
 0x314   : > { %v3851_v39 = vadd.f32 %v3850_v9, %v3849_v63  ;;  %v3852_v46 = vpop.f32.mrb[14].mxu1 }
 0x315   : > { %v3853_v1 = vpop.f32.mrb[15].mxu1 }
 0x316   : > { %v3854_v26 = vadd.f32 %v3853_v1, %v3852_v46  ;;  %v3062_v22 = vadd.f32 %v3851_v39, %v6188_v49 }
 0x318   : > { %v3065_v33 = vadd.f32 %v3854_v26, %v6188_v49 }
 0x328   : > { %v3907_v37 = vpop.f32.mrb[32].mxu0 }
 0x329   : > { %v3908_v29 = vpop.f32.mrb[33].mxu0 }
 0x32a   : > { %v3909_v13 = vadd.f32 %v3908_v29, %v3907_v37  ;;  %v3910_v56 = vpop.f32.mrb[34].mxu0 }
 0x32b   : > { %v3911_v21 = vpop.f32.mrb[35].mxu0 }
 0x32c   : > { %v6349_v27 = vadd.f32 %v3909_v13, %v3062_v22  ;;  %v3912_v23 = vadd.f32 %v3911_v21, %v3910_v56 }
 0x32e   : > { %v6351_v45 = vadd.f32 %v3912_v23, %v3065_v33 }
 0x339   : > { %v3855_v32 = vpop.f32.mrb[16].mxu1 }
 0x33a   : > { %v3856_v6 = vpop.f32.mrb[17].mxu1 }
 0x33b   : > { %v3857_v48 = vadd.f32 %v3856_v6, %v3855_v32  ;;  %v3858_v38 = vpop.f32.mrb[18].mxu1 }
 0x33c   : > { %v3859_v18 = vpop.f32.mrb[19].mxu1 }
 0x33d   : > { %v3860_v8 = vadd.f32 %v3859_v18, %v3858_v38  ;;  %v3070_v54 = vadd.f32 %v3857_v48, %v6188_v49 }
 0x33f   : > { %v3073_v55 = vadd.f32 %v3860_v8, %v6188_v49 }
 0x36a   : > { %v3913_v17 = vpop.f32.mrb[36].mxu0 }
 0x36b   : > { %v3914_v59 = vpop.f32.mrb[37].mxu0 }
 0x36c   : > { %v3915_v20 = vadd.f32 %v3914_v59, %v3913_v17  ;;  %v3916_v12 = vpop.f32.mrb[38].mxu0 }
 0x36d   : > { %v3917_v25 = vpop.f32.mrb[39].mxu0  ;;  %v3861_v5 = vpop.f32.mrb[20].mxu1 }
 0x36e   : > { %v6355_v31 = vadd.f32 %v3915_v20, %v3070_v54  ;;  %v3918_v14 = vadd.f32 %v3917_v25, %v3916_v12  ;;  %v3862_v53 = vpop.f32.mrb[21].mxu1 }
 0x36f   : > { %v3863_v35 = vadd.f32 %v3862_v53, %v3861_v5  ;;  %v3864_v42 = vpop.f32.mrb[22].mxu1 }
 0x370   : > { %v6357_v41 = vadd.f32 %v3918_v14, %v3073_v55  ;;  %v3865_v10 = vpop.f32.mrb[23].mxu1 }
 0x371   : > { %v3866_v15 = vadd.f32 %v3865_v10, %v3864_v42  ;;  %v3078_v2 = vadd.f32 %v3863_v35, %v6188_v49 }
 0x373   : > { %v3081_v7 = vadd.f32 %v3866_v15, %v6188_v49 }
 0x376   : > { %v3919_v47 = vpop.f32.mrb[40].mxu0 }
 0x377   : > { %v3920_v30 = vpop.f32.mrb[41].mxu0 }
 0x378   : > { %v3921_v0 = vadd.f32 %v3920_v30, %v3919_v47  ;;  %v3922_v36 = vpop.f32.mrb[42].mxu0 }
 0x379   : > { %v3923_v44 = vpop.f32.mrb[43].mxu0 }
 0x37a   : > { %v6361_v52 = vadd.f32 %v3921_v0, %v3078_v2  ;;  %v3924_v28 = vadd.f32 %v3923_v44, %v3922_v36  ;;  %v3867_v61 = vpop.f32.mrb[24].mxu1 }
 0x37b   : > { %v3868_v19 = vpop.f32.mrb[25].mxu1 }
 0x37c   : > { %v6363_v57 = vadd.f32 %v3924_v28, %v3081_v7  ;;  %v3869_v43 = vadd.f32 %v3868_v19, %v3867_v61  ;;  %v3870_v62 = vpop.f32.mrb[26].mxu1 }
 0x37d   : > { %v3871_v34 = vpop.f32.mrb[27].mxu1 }
 0x37e   : > { %v3872_v4 = vadd.f32 %v3871_v34, %v3870_v62  ;;  %v3925_v50 = vpop.f32.mrb[44].mxu0  ;;  %v3086_v16 = vadd.f32 %v3869_v43, %v6188_v49 }
 0x37f   : > { %v3926_v40 = vpop.f32.mrb[45].mxu0 }
 0x380   : > { %v3927_v63 = vadd.f32 %v3926_v40, %v3925_v50  ;;  %v3928_v9 = vpop.f32.mrb[46].mxu0  ;;  %v3089_v46 = vadd.f32 %v3872_v4, %v6188_v49 }
 0x381   : > { %v3929_v39 = vpop.f32.mrb[47].mxu0 }
 0x382   : > { %v6367_v1 = vadd.f32 %v3927_v63, %v3086_v16  ;;  %v3930_v26 = vadd.f32 %v3929_v39, %v3928_v9  ;;  %v3947_v37 = vpop.f32.mrb[28].mxu1 }
 0x383   : > { %v3948_v29 = vpop.f32.mrb[29].mxu1 }
 0x384   : > { %v6369_v22 = vadd.f32 %v3930_v26, %v3089_v46  ;;  %v3949_v13 = vadd.f32 %v3948_v29, %v3947_v37  ;;  %v3950_v56 = vpop.f32.mrb[30].mxu1 }
 0x385   : > { %v3951_v21 = vpop.f32.mrb[31].mxu1 }
 0x386   : > { %v3216_v33 = vadd.f32 %v3949_v13, %v6212_v51  ;;  %v3952_v23 = vadd.f32 %v3951_v21, %v3950_v56  ;;  %v4005_v32 = vpop.f32.mrb[48].mxu0 }
 0x387   : > { %v4006_v6 = vpop.f32.mrb[49].mxu0 }
 0x388   : > { %v3219_v48 = vadd.f32 %v3952_v23, %v6214_v3  ;;  %v4007_v38 = vadd.f32 %v4006_v6, %v4005_v32  ;;  %v4008_v18 = vpop.f32.mrb[50].mxu0 }
 0x389   : > { %v4009_v49 = vpop.f32.mrb[51].mxu0 }
 0x38a   : > { %v4010_v8 = vadd.f32 %v4009_v49, %v4008_v18  ;;  %v3953_v17 = vpop.f32.mrb[32].mxu1  ;;  %v6373_v59 = vadd.f32 %v4007_v38, %v3216_v33 }
 0x38b   : > { %v3954_v54 = vpop.f32.mrb[33].mxu1 }
 0x38c   : > { %v3955_v20 = vadd.f32 %v3954_v54, %v3953_v17  ;;  %v3956_v12 = vpop.f32.mrb[34].mxu1  ;;  %v6375_v25 = vadd.f32 %v4010_v8, %v3219_v48 }
 0x38d   : > { %v3957_v5 = vpop.f32.mrb[35].mxu1 }
 0x38e   : > { %v3224_v51 = vadd.f32 %v3955_v20, %v6313_v58  ;;  %v3958_v55 = vadd.f32 %v3957_v5, %v3956_v12  ;;  %v4011_v14 = vpop.f32.mrb[52].mxu0 }
 0x38f   : > { %v4012_v53 = vpop.f32.mrb[53].mxu0 }
 0x390   : > { %v3227_v3 = vadd.f32 %v3958_v55, %v6316_v11  ;;  %v4013_v35 = vadd.f32 %v4012_v53, %v4011_v14  ;;  %v4014_v42 = vpop.f32.mrb[54].mxu0 }
 0x391   : > { %v4015_v10 = vpop.f32.mrb[55].mxu0 }
 0x392   : > { %v4016_v15 = vadd.f32 %v4015_v10, %v4014_v42  ;;  %v3959_v47 = vpop.f32.mrb[36].mxu1  ;;  %v6379_v30 = vadd.f32 %v4013_v35, %v3224_v51 }
 0x393   : > { %v3960_v2 = vpop.f32.mrb[37].mxu1 }
 0x394   : > { %v3961_v0 = vadd.f32 %v3960_v2, %v3959_v47  ;;  %v3962_v36 = vpop.f32.mrb[38].mxu1  ;;  %v6381_v44 = vadd.f32 %v4016_v15, %v3227_v3 }
 0x395   : > { %v3963_v7 = vpop.f32.mrb[39].mxu1 }
 0x396   : > { %v3232_v58 = vadd.f32 %v3961_v0, %v6339_v24  ;;  %v3964_v28 = vadd.f32 %v3963_v7, %v3962_v36  ;;  %v4017_v61 = vpop.f32.mrb[56].mxu0 }
 0x397   : > { %v4018_v19 = vpop.f32.mrb[57].mxu0 }
 0x398   : > { %v3235_v11 = vadd.f32 %v3964_v28, %v6342_v60  ;;  %v4019_v43 = vadd.f32 %v4018_v19, %v4017_v61  ;;  %v4020_v62 = vpop.f32.mrb[58].mxu0 }
 0x399   : > { %v4021_v34 = vpop.f32.mrb[59].mxu0 }
 0x39a   : > { %v4022_v4 = vadd.f32 %v4021_v34, %v4020_v62  ;;  %v3965_v50 = vpop.f32.mrb[40].mxu1  ;;  %v6385_v40 = vadd.f32 %v4019_v43, %v3232_v58 }
 0x39b   : > { %v3966_v16 = vpop.f32.mrb[41].mxu1 }
 0x39c   : > { %v3967_v63 = vadd.f32 %v3966_v16, %v3965_v50  ;;  %v3968_v9 = vpop.f32.mrb[42].mxu1  ;;  %v6387_v39 = vadd.f32 %v4022_v4, %v3235_v11 }
 0x39d   : > { %v3969_v46 = vpop.f32.mrb[43].mxu1 }
 0x39e   : > { %v3240_v24 = vadd.f32 %v3967_v63, %v6349_v27  ;;  %v3970_v26 = vadd.f32 %v3969_v46, %v3968_v9  ;;  %v4023_v37 = vpop.f32.mrb[60].mxu0 }
 0x39f   : > { %v4024_v29 = vpop.f32.mrb[61].mxu0 }
 0x3a0   : > { %v3243_v60 = vadd.f32 %v3970_v26, %v6351_v45  ;;  %v4025_v13 = vadd.f32 %v4024_v29, %v4023_v37  ;;  %v4026_v56 = vpop.f32.mrb[62].mxu0 }
 0x3a1   : > { %v4027_v21 = vpop.f32.mrb[63].mxu0 }
 0x3a2   : > { %v4028_v33 = vadd.f32 %v4027_v21, %v4026_v56  ;;  %v3971_v23 = vpop.f32.mrb[44].mxu1  ;;  %v6391_v32 = vadd.f32 %v4025_v13, %v3240_v24 }
 0x3a3   : > { %v3972_v6 = vpop.f32.mrb[45].mxu1 }
 0x3a4   : > { %v3973_v48 = vadd.f32 %v3972_v6, %v3971_v23  ;;  %v3974_v38 = vpop.f32.mrb[46].mxu1  ;;  %v6393_v18 = vadd.f32 %v4028_v33, %v3243_v60 }
 0x3a5   : > { %v3975_v49 = vpop.f32.mrb[47].mxu1 }
 0x3a6   : > { %v3248_v27 = vadd.f32 %v3973_v48, %v6355_v31  ;;  %v3976_v8 = vadd.f32 %v3975_v49, %v3974_v38  ;;  %v4029_v17 = vpop.f32.mrb[64].mxu0 }
 0x3a7   : > { %v4030_v54 = vpop.f32.mrb[65].mxu0 }
 0x3a8   : > { %v3251_v45 = vadd.f32 %v3976_v8, %v6357_v41  ;;  %v4031_v20 = vadd.f32 %v4030_v54, %v4029_v17  ;;  %v4032_v12 = vpop.f32.mrb[66].mxu0 }
 0x3a9   : > { %v4033_v5 = vpop.f32.mrb[67].mxu0 }
 0x3aa   : > { %v4034_v51 = vadd.f32 %v4033_v5, %v4032_v12  ;;  %v3977_v55 = vpop.f32.mrb[48].mxu1  ;;  %v6397_v14 = vadd.f32 %v4031_v20, %v3248_v27 }
 0x3ab   : > { %v3978_v53 = vpop.f32.mrb[49].mxu1 }
 0x3ac   : > { %v3979_v3 = vadd.f32 %v3978_v53, %v3977_v55  ;;  %v3980_v35 = vpop.f32.mrb[50].mxu1  ;;  %v6399_v42 = vadd.f32 %v4034_v51, %v3251_v45 }
 0x3ad   : > { %v3981_v10 = vpop.f32.mrb[51].mxu1 }
 0x3ae   : > { %v3256_v31 = vadd.f32 %v3979_v3, %v6361_v52  ;;  %v3982_v15 = vadd.f32 %v3981_v10, %v3980_v35  ;;  %v4035_v47 = vpop.f32.mrb[68].mxu0 }
 0x3af   : > { %v4036_v2 = vpop.f32.mrb[69].mxu0 }
 0x3b0   : > { %v3259_v41 = vadd.f32 %v3982_v15, %v6363_v57  ;;  %v4037_v0 = vadd.f32 %v4036_v2, %v4035_v47  ;;  %v4038_v36 = vpop.f32.mrb[70].mxu0 }
 0x3b1   : > { %v4039_v7 = vpop.f32.mrb[71].mxu0 }
 0x3b2   : > { %v4040_v58 = vadd.f32 %v4039_v7, %v4038_v36  ;;  %v3983_v28 = vpop.f32.mrb[52].mxu1  ;;  %v6403_v61 = vadd.f32 %v4037_v0, %v3256_v31 }
 0x3b3   : > { %v3984_v19 = vpop.f32.mrb[53].mxu1 }
 0x3b4   : > { %v3985_v11 = vadd.f32 %v3984_v19, %v3983_v28  ;;  %v3986_v43 = vpop.f32.mrb[54].mxu1  ;;  %v6405_v62 = vadd.f32 %v4040_v58, %v3259_v41 }
 0x3b5   : > { %v3987_v34 = vpop.f32.mrb[55].mxu1 }
 0x3b6   : > { %v3264_v52 = vadd.f32 %v3985_v11, %v6367_v1  ;;  %v3988_v4 = vadd.f32 %v3987_v34, %v3986_v43  ;;  %v4041_v50 = vpop.f32.mrb[72].mxu0 }
 0x3b7   : > { %v4042_v16 = vpop.f32.mrb[73].mxu0 }
 0x3b8   : > { %v3267_v57 = vadd.f32 %v3988_v4, %v6369_v22  ;;  %v4043_v63 = vadd.f32 %v4042_v16, %v4041_v50  ;;  %v4044_v9 = vpop.f32.mrb[74].mxu0 }
 0x3b9   : > { %v4045_v46 = vpop.f32.mrb[75].mxu0 }
 0x3ba   : > { %v4046_v24 = vadd.f32 %v4045_v46, %v4044_v9  ;;  %v3401_v26 = vpop.f32.mrb[56].mxu1  ;;  %v6410_v37 = vadd.f32 %v4043_v63, %v3264_v52 }
 0x3bb   : > { %v3402_v29 = vadd.f32 %v3401_v26, %v6379_v30  ;;  %v4114_v60 = vpop.f32.mrb[57].mxu1 }
 0x3bc   : > { %v3404_v1 = vpop.f32.mrb[58].mxu1  ;;  %v6418_v22 = vadd.f32 %v4046_v24, %v3267_v57 }
 0x3bd   : > { %v3788_v13 = vpack.c.bf16 %v3402_v29, %v3402_v29  ;;  %v3405_v56 = vadd.f32 %v3404_v1, %v6381_v44  ;;  %v4115_v21 = vpop.f32.mrb[59].mxu1 }
 0x3be   : > { %v3393_v33 = vpop.f32.mrb[76].mxu0 }
 0x3bf   : > { %3508 = vst.msk [vmem:[%s6416_s17 + $0x8] sm:$0xf] %vm3504_vm1, %v3788_v13  ;;  %v3789_v30 = vpack.c.bf16 %v3405_v56, %v3405_v56  ;;  %v3394_v23 = vadd.f32 %v3393_v33, %v6373_v59  ;;  %v4110_v6 = vpop.f32.mrb[77].mxu0 }
 0x3c0   : > { %v3396_v48 = vpop.f32.mrb[78].mxu0 }
 0x3c1   : > { %3509 = vst.msk [vmem:[%s6416_s17 + $0xc] sm:$0x1] %vm3506_vm2, %v3789_v30  ;;  %v3786_v38 = vpack.c.bf16 %v3394_v23, %v3394_v23  ;;  %v3397_v49 = vadd.f32 %v3396_v48, %v6375_v25  ;;  %v4111_v27 = vpop.f32.mrb[79].mxu0 }
 0x3c2   : > { %v3409_v44 = vpop.f32.mrb[60].mxu1 }
 0x3c3   : > { %3505 = vst.msk [vmem:[%s6416_s17] sm:$0xf] %vm3504_vm1, %v3786_v38  ;;  %v3787_v8 = vpack.c.bf16 %v3397_v49, %v3397_v49  ;;  %v3410_v17 = vadd.f32 %v3409_v44, %v6385_v40  ;;  %v4118_v54 = vpop.f32.mrb[61].mxu1 }
 0x3c4   : > { %v3412_v45 = vpop.f32.mrb[62].mxu1 }
 0x3c5   : > { %3507 = vst.msk [vmem:[%s6416_s17 + $0x4] sm:$0x1] %vm3506_vm2, %v3787_v8  ;;  %v3790_v59 = vpack.c.bf16 %v3410_v17, %v3410_v17  ;;  %v3413_v20 = vadd.f32 %v3412_v45, %v6387_v39  ;;  %v4119_v12 = vpop.f32.mrb[63].mxu1 }
 0x3c7   : > { %3510 = vst.msk [vmem:[%s6416_s17 + $0x10] sm:$0xf] %vm3504_vm1, %v3790_v59  ;;  %v3791_v25 = vpack.c.bf16 %v3413_v20, %v3413_v20 }
 0x3c9   : > { %3511 = vst.msk [vmem:[%s6416_s17 + $0x14] sm:$0x1] %vm3506_vm2, %v3791_v25 }
 0x3ca   : > { %v3417_v5 = vpop.f32.mrb[64].mxu1 }
 0x3cb   : > { %v3418_v51 = vadd.f32 %v3417_v5, %v6391_v32  ;;  %v4122_v40 = vpop.f32.mrb[65].mxu1 }
 0x3cc   : > { %v3420_v55 = vpop.f32.mrb[66].mxu1 }
 0x3cd   : > { %v3792_v53 = vpack.c.bf16 %v3418_v51, %v3418_v51  ;;  %v3421_v3 = vadd.f32 %v3420_v55, %v6393_v18  ;;  %v4123_v35 = vpop.f32.mrb[67].mxu1 }
 0x3cf   : > { %3512 = vst.msk [vmem:[%s6416_s17 + $0x18] sm:$0xf] %vm3504_vm1, %v3792_v53  ;;  %v3793_v39 = vpack.c.bf16 %v3421_v3, %v3421_v3 }
 0x3d1   : > { %3513 = vst.msk [vmem:[%s6416_s17 + $0x1c] sm:$0x1] %vm3506_vm2, %v3793_v39 }
 0x3d2   : > { %v3425_v10 = vpop.f32.mrb[68].mxu1 }
 0x3d3   : > { %v3426_v31 = vadd.f32 %v3425_v10, %v6397_v14  ;;  %v4126_v15 = vpop.f32.mrb[69].mxu1 }
 0x3d4   : > { %v3428_v47 = vpop.f32.mrb[70].mxu1 }
 0x3d5   : > { %v3794_v32 = vpack.c.bf16 %v3426_v31, %v3426_v31  ;;  %v3429_v2 = vadd.f32 %v3428_v47, %v6399_v42  ;;  %v4127_v41 = vpop.f32.mrb[71].mxu1 }
 0x3d7   : > { %3514 = vst.msk [vmem:[%s6416_s17 + $0x20] sm:$0xf] %vm3504_vm1, %v3794_v32  ;;  %v3795_v18 = vpack.c.bf16 %v3429_v2, %v3429_v2 }
 0x3d9   : > { %3515 = vst.msk [vmem:[%s6416_s17 + $0x24] sm:$0x1] %vm3506_vm2, %v3795_v18 }
 0x3da   : > { %v3433_v0 = vpop.f32.mrb[72].mxu1 }
 0x3db   : > { %v3434_v36 = vadd.f32 %v3433_v0, %v6403_v61  ;;  %v4130_v7 = vpop.f32.mrb[73].mxu1 }
 0x3dc   : > { %v3436_v58 = vpop.f32.mrb[74].mxu1 }
 0x3dd   : > { %v3796_v14 = vpack.c.bf16 %v3434_v36, %v3434_v36  ;;  %v3437_v28 = vadd.f32 %v3436_v58, %v6405_v62  ;;  %v4131_v19 = vpop.f32.mrb[75].mxu1 }
 0x3df   : > { %3516 = vst.msk [vmem:[%s6416_s17 + $0x28] sm:$0xf] %vm3504_vm1, %v3796_v14  ;;  %v3797_v42 = vpack.c.bf16 %v3437_v28, %v3437_v28 }
 0x3e1   : > { %3517 = vst.msk [vmem:[%s6416_s17 + $0x2c] sm:$0x1] %vm3506_vm2, %v3797_v42 }
 0x3e2   : > { %v3441_v11 = vpop.f32.mrb[76].mxu1 }
 0x3e3   : > { %v3442_v43 = vadd.f32 %v3441_v11, %v6410_v37  ;;  %v4134_v34 = vpop.f32.mrb[77].mxu1 }
 0x3e4   : > { %v3444_v52 = vpop.f32.mrb[78].mxu1 }
 0x3e5   : > { %v3798_v4 = vpack.c.bf16 %v3442_v43, %v3442_v43  ;;  %v3445_v61 = vadd.f32 %v3444_v52, %v6418_v22  ;;  %v4135_v50 = vpop.f32.mrb[79].mxu1 }
 0x3e7   : > { %3518 = vst.msk [vmem:[%s6416_s17 + $0x30] sm:$0xf] %vm3504_vm1, %v3798_v4  ;;  %v3799_v16 = vpack.c.bf16 %v3445_v61, %v3445_v61 }
 0x3e9   : > { %3519 = vst.msk [vmem:[%s6416_s17 + $0x34] sm:$0x1] %vm3506_vm2, %v3799_v16 }
 0x3ea PF: > { %s17_s18 = sadd.s32 1, %s4703_s18  }
 0x3eb   : > { %p14_p5 = scmp.ge.s32.totalorder %s17_s18, 4  }
 0x3ed   :  { %16 = sbr.rel (!%p14_p5) target bundleno = 2 (0x2), region = 83 }
 0x3f4   :  { %3541 = vsyncpa [#allocation3], 1 }
 0x3f5   :  { %3543 = vsyncpa [#allocation3 + $0x1], 1 }
 0x3f6   :  { %3544 = vsyncpa [#allocation5], 1 }

// kernel: cnn_policy_forward.3
= control target key start
LH: loop header
LB: loop body
LE: loop exit
PB: predicated region body
PF: predicated region fallthrough
CT: control target
= control target key end

     0   :  { %s6208_s0 = inlined_call_operand.vmem [shape: bf16[2,2240], index: 0, kind: input, shape index: {}]   ;;  %s6209_s1 = inlined_call_operand.hbm [shape: bf16[2240,512], index: 1, kind: input, shape index: {}]   ;;  %s6210_s2 = inlined_call_operand.hbm [shape: f32[1,512], index: 2, kind: input, shape index: {}]   ;;  %s6211_s3 = inlined_call_operand.hbm [shape: f32[1,512], index: 3, kind: input, shape index: {}]   ;;  %s6212_s4 = inlined_call_operand.<no memory space> [shape: f32[1,1], index: 4, kind: input, shape index: {}]   ;;  %s6213_s5 = inlined_call_operand.hbm [shape: f32[2,512], index: 5, kind: output, shape index: {0}]   ;;  %s6214_s6 = inlined_call_operand.vmem [shape: f32[2,1], index: 6, kind: output, shape index: {1}]  }
   0x1   :  { %v12_v0 = vstv %s6212_s4 }
   0x2   :  { %13 = vst [vmem:[#allocation2] sm:$0x1] %v12_v0 }
   0x3   :  { %14 = vsyncpa [#allocation4], 0 }
   0x4   :  { %15 = vsyncpa [#allocation7], 0 }
   0x5   :  { %16 = vsyncpa [#allocation5], 0  ;;  %s5999_s23 = smov [#allocation6]   ;;  %s6000_s25 = smov [#allocation3]  }
   0x6   :  { %s37_s24 = sshll.u32 %s5999_s23, 4  ;;  %s24_s26 = sshll.u32 %s6000_s25, 4  ;;  %s38_s24 = int_to_ptr.vmem [resolvable:$true] %s37_s24  ;;  %s6045_s26 = int_to_ptr.vmem [resolvable:$true] %s24_s26 }
   0x7   :  { %s5905_s29 = scalar_lea.hbm %s6210_s2, 64 }
   0x8   :  { %p5906_p0 = scmp.ne.s32.totalorder %s6210_s2, %s5905_s29  ;;  %p5909_p1 = scmp.lt.u32.totalorder %s5905_s29, %s6210_s2 }
   0xa   :  { %p5911_p2 = pnand %p5909_p1, %p5906_p0 }
   0xc   :  { %5914 = shalt.err (!%p5911_p2)
}
   0xd   :  { %s5915_s9 = scalar_lea.vmem %s38_s24, 64  ;;  %p5920_p4 = scmp.lt.s32.totalorder %s38_s24, %s38_s24 }
   0xe   :  { %p5916_p3 = scmp.ne.s32.totalorder %s38_s24, %s5915_s9  ;;  %p5921_p5 = scmp.lt.s32.totalorder %s5915_s9, %s5915_s9 }
  0x10   :  { %p5922_p6 = por %p5921_p5, %p5920_p4 }
  0x12   :  { %p5923_p7 = pnand %p5922_p6, %p5916_p3 }
  0x14   :  { %5926 = shalt.err (!%p5923_p7)
}
  0x15   :  { %40 = dma.hbm_to_vmem [thread:$0]  %s6210_s2, 64, %s38_s24, [#allocation7]  }
  0x16   :  { %s5927_s14 = scalar_lea.hbm %s6209_s1, 71680 }
  0x17   :  { %p5928_p8 = scmp.ne.s32.totalorder %s6209_s1, %s5927_s14  ;;  %p5931_p9 = scmp.lt.u32.totalorder %s5927_s14, %s6209_s1 }
  0x19   :  { %p5933_p10 = pnand %p5931_p9, %p5928_p8 }
  0x1b   :  { %5936 = shalt.err (!%p5933_p10)
}
  0x1c   :  { %s5937_s19 = scalar_lea.vmem %s6045_s26, 71680  ;;  %p5942_p12 = scmp.lt.s32.totalorder %s6045_s26, %s6045_s26 }
  0x1d   :  { %p5938_p11 = scmp.ne.s32.totalorder %s6045_s26, %s5937_s19  ;;  %p5943_p13 = scmp.lt.s32.totalorder %s5937_s19, %s5937_s19 }
  0x1f   :  { %p5944_p0 = por %p5943_p13, %p5942_p12 }
  0x21   :  { %p5945_p1 = pnand %p5944_p0, %p5938_p11 }
  0x23   :  { %5948 = shalt.err (!%p5945_p1)
}
  0x24   :  { %s6001_s2 = smov 256   ;;  %s6002_s20 = smov 16  }
  0x25   :  { %30 = dma.hbm_to_vmem [thread:$0]  %s6209_s1, 71680, %s6045_s26, [#allocation4], %s6001_s2, %s6001_s2, %s6002_s20  }
  0x26   :  { %s6003_s23 = smov [#allocation8]   ;;  %s5949_s28 = scalar_lea.hbm %s6211_s3, 64 }
  0x27   :  { %s47_s24 = sshll.u32 %s6003_s23, 4  ;;  %p5950_p2 = scmp.ne.s32.totalorder %s6211_s3, %s5949_s28  ;;  %s48_s24 = int_to_ptr.vmem [resolvable:$true] %s47_s24 }
  0x28   :  { %p5953_p3 = scmp.lt.u32.totalorder %s5949_s28, %s6211_s3 }
  0x2a   :  { %p5955_p4 = pnand %p5953_p3, %p5950_p2 }
  0x2c   :  { %5958 = shalt.err (!%p5955_p4)
}
  0x2d   :  { %s5959_s8 = scalar_lea.vmem %s48_s24, 64  ;;  %p5964_p6 = scmp.lt.s32.totalorder %s48_s24, %s48_s24 }
  0x2e   :  { %p5960_p5 = scmp.ne.s32.totalorder %s48_s24, %s5959_s8  ;;  %p5965_p7 = scmp.lt.s32.totalorder %s5959_s8, %s5959_s8 }
  0x30   :  { %p5966_p8 = por %p5965_p7, %p5964_p6 }
  0x32   :  { %p5967_p9 = pnand %p5966_p8, %p5960_p5 }
  0x34   :  { %5970 = shalt.err (!%p5967_p9)
}
  0x35   :  { %50 = dma.hbm_to_vmem [thread:$0]  %s6211_s3, 64, %s48_s24, [#allocation7]  }
  0x36   :  { %5993 = dma.done.wait [#allocation4], 71680  }
  0x37   :  { %5994 = vsyncadd [#allocation4], 4294895616 }
  0x38   :  { %5995 = dma.done.wait [#allocation7], 128  }
  0x39   :  { %5996 = vsyncadd [#allocation7], 4294967168  ;;  %v5063_v1 = vld [vmem:[#allocation3 + $0x4] ss:$16 sps:$4 sm:$0xff]   ;;  %v5065_v2 = vld [vmem:[#allocation3 + $0xc] ss:$16 sps:$4 sm:$0xff]   ;;  %v628_v37 = vlaneseq }
  0x3a   :  { %3592 = vmatprep.subr.bf16.mxu0 %v5063_v1  ;;  %v5067_v3 = vld [vmem:[#allocation3] ss:$16 sps:$4 sm:$0xff]   ;;  %v5068_v4 = vld [vmem:[#allocation3 + $0x8] ss:$16 sps:$4 sm:$0xff]   ;;  %3961 = vmatprep.subr.bf16.mxu1 %v5065_v2  ;;  %v5069_v5 = vld [vmem:[#allocation3 + $0x24] ss:$16 sps:$4 sm:$0xff]  }
  0x3b   :  { %3593 = vmatpush1.bf16.msra.mxu0 %v5067_v3  ;;  %3962 = vmatpush1.bf16.msra.mxu1 %v5068_v4  ;;  %v5071_v6 = vld [vmem:[#allocation3 + $0x2c] ss:$16 sps:$4 sm:$0xff]   ;;  %v5073_v7 = vld [vmem:[#allocation3 + $0x20] ss:$16 sps:$4 sm:$0xff]   ;;  %v5074_v8 = vld [vmem:[#allocation3 + $0x28] ss:$16 sps:$4 sm:$0xff]  }
  0x3c   :  { %3594 = vmatprep.subr.bf16.mxu0 %v5069_v5  ;;  %3963 = vmatprep.subr.bf16.mxu1 %v5071_v6  ;;  %v5075_v9 = vld [vmem:[#allocation3 + $0x44] ss:$16 sps:$4 sm:$0xff]   ;;  %v5077_v10 = vld [vmem:[#allocation3 + $0x4c] ss:$16 sps:$4 sm:$0xff]   ;;  %v5079_v11 = vld [vmem:[#allocation3 + $0x40] ss:$16 sps:$4 sm:$0xff]  }
  0x3d   :  { %v5080_v12 = vld [vmem:[#allocation3 + $0x48] ss:$16 sps:$4 sm:$0xff]   ;;  %v5081_v13 = vld [vmem:[#allocation3 + $0x64] ss:$16 sps:$4 sm:$0xff]   ;;  %v5083_v14 = vld [vmem:[#allocation3 + $0x6c] ss:$16 sps:$4 sm:$0xff]  }
  0x3e   :  { %v5085_v15 = vld [vmem:[#allocation3 + $0x60] ss:$16 sps:$4 sm:$0xff]   ;;  %v5086_v16 = vld [vmem:[#allocation3 + $0x68] ss:$16 sps:$4 sm:$0xff]   ;;  %v5087_v17 = vld [vmem:[#allocation3 + $0x84] ss:$16 sps:$4 sm:$0xff]  }
  0x3f   :  { %3595 = vmatpush1.bf16.msra.mxu0 %v5073_v7  ;;  %3964 = vmatpush1.bf16.msra.mxu1 %v5074_v8  ;;  %v5089_v18 = vld [vmem:[#allocation3 + $0x8c] ss:$16 sps:$4 sm:$0xff]   ;;  %v5091_v19 = vld [vmem:[#allocation3 + $0x80] ss:$16 sps:$4 sm:$0xff]   ;;  %v5092_v20 = vld [vmem:[#allocation3 + $0x88] ss:$16 sps:$4 sm:$0xff]  }
  0x40   :  { %3596 = vmatprep.subr.bf16.mxu0 %v5075_v9  ;;  %3965 = vmatprep.subr.bf16.mxu1 %v5077_v10  ;;  %v5093_v21 = vld [vmem:[#allocation3 + $0xa4] ss:$16 sps:$4 sm:$0xff]   ;;  %v5095_v22 = vld [vmem:[#allocation3 + $0xac] ss:$16 sps:$4 sm:$0xff]   ;;  %v5097_v23 = vld [vmem:[#allocation3 + $0xa0] ss:$16 sps:$4 sm:$0xff]  }
  0x41   :  { %v5098_v24 = vld [vmem:[#allocation3 + $0xa8] ss:$16 sps:$4 sm:$0xff]   ;;  %v5099_v25 = vld [vmem:[#allocation3 + $0xc4] ss:$16 sps:$4 sm:$0xff]   ;;  %v5101_v26 = vld [vmem:[#allocation3 + $0xcc] ss:$16 sps:$4 sm:$0xff]  }
  0x42   :  { %v5103_v27 = vld [vmem:[#allocation3 + $0xc0] ss:$16 sps:$4 sm:$0xff]   ;;  %v5104_v28 = vld [vmem:[#allocation3 + $0xc8] ss:$16 sps:$4 sm:$0xff]   ;;  %v5105_v29 = vld [vmem:[#allocation3 + $0xe4] ss:$16 sps:$4 sm:$0xff]  }
  0x43   :  { %3597 = vmatpush1.bf16.msra.mxu0 %v5079_v11  ;;  %3966 = vmatpush1.bf16.msra.mxu1 %v5080_v12  ;;  %v5107_v30 = vld [vmem:[#allocation3 + $0xec] ss:$16 sps:$4 sm:$0xff]   ;;  %v5109_v31 = vld [vmem:[#allocation3 + $0xe0] ss:$16 sps:$4 sm:$0xff]   ;;  %v5110_v32 = vld [vmem:[#allocation3 + $0xe8] ss:$16 sps:$4 sm:$0xff]  }
  0x44   :  { %3598 = vmatprep.subr.bf16.mxu0 %v5081_v13  ;;  %3967 = vmatprep.subr.bf16.mxu1 %v5083_v14  ;;  %v5111_v33 = vld [vmem:[#allocation3 + $0x104] ss:$16 sps:$4 sm:$0xff]   ;;  %v5113_v34 = vld [vmem:[#allocation3 + $0x10c] ss:$16 sps:$4 sm:$0xff]   ;;  %v5115_v35 = vld [vmem:[#allocation3 + $0x100] ss:$16 sps:$4 sm:$0xff]  }
  0x45   :  { %v5116_v36 = vld [vmem:[#allocation3 + $0x108] ss:$16 sps:$4 sm:$0xff]   ;;  %v6004_v38 = vmov 1966171168   ;;  %v5117_v40 = vld [vmem:[#allocation3 + $0x124] ss:$16 sps:$4 sm:$0xff]  }
  0x46   :  { %v653_v39 = vunpack.c.l.s4 %v6004_v38  ;;  %v5119_v41 = vld [vmem:[#allocation3 + $0x12c] ss:$16 sps:$4 sm:$0xff]   ;;  %v5121_v42 = vld [vmem:[#allocation3 + $0x120] ss:$16 sps:$4 sm:$0xff]   ;;  %v6088_v43 = vshrl.u32 %v628_v37, 7  ;;  %vm3588_vm0 = vcmask 523264  }
  0x47   :  { %3599 = vmatpush1.bf16.msra.mxu0 %v5085_v15  ;;  %3968 = vmatpush1.bf16.msra.mxu1 %v5086_v16  ;;  %v5122_v45 = vld [vmem:[#allocation3 + $0x128] ss:$16 sps:$4 sm:$0xff]   ;;  %v5123_v46 = vld [vmem:[#allocation3 + $0x144] ss:$16 sps:$4 sm:$0xff]   ;;  %v5125_v47 = vld [vmem:[#allocation3 + $0x14c] ss:$16 sps:$4 sm:$0xff]  }
  0x48   :  { %3600 = vmatprep.subr.bf16.mxu0 %v5087_v17  ;;  %3969 = vmatprep.subr.bf16.mxu1 %v5089_v18  ;;  %v654_v44 = vunpack.c.0.s8 %v653_v39  ;;  %v5127_v48 = vld [vmem:[#allocation3 + $0x140] ss:$16 sps:$4 sm:$0xff]   ;;  %v5128_v49 = vld [vmem:[#allocation3 + $0x148] ss:$16 sps:$4 sm:$0xff]   ;;  %v5129_v51 = vld [vmem:[#allocation3 + $0x164] ss:$16 sps:$4 sm:$0xff]  }
  0x49   :  { %v5131_v52 = vld [vmem:[#allocation3 + $0x16c] ss:$16 sps:$4 sm:$0xff]   ;;  %v5133_v54 = vld [vmem:[#allocation3 + $0x160] ss:$16 sps:$4 sm:$0xff]   ;;  %v5134_v56 = vld [vmem:[#allocation3 + $0x168] ss:$16 sps:$4 sm:$0xff]  }
  0x4a   :  { %v6091_v50 = vsub.s32 %v654_v44, %v6088_v43  ;;  %v6096_v53 = vld [vmem:[%s6208_s0] sm:$0xff]  ;;  %v5140_v62 = vld [vmem:[#allocation3 + $0x188] ss:$16 sps:$4 sm:$0xff]   ;;  %vm4383_vm1 = vcmask 1041408  }
  0x4b   :  { %3601 = vmatpush1.bf16.msra.mxu0 %v5091_v19  ;;  %3970 = vmatpush1.bf16.msra.mxu1 %v5092_v20  ;;  %v5135_v57 = vld [vmem:[#allocation3 + $0x184] ss:$16 sps:$4 sm:$0xff]   ;;  %v5137_v58 = vld [vmem:[#allocation3 + $0x18c] ss:$16 sps:$4 sm:$0xff]   ;;  %v5139_v60 = vld [vmem:[#allocation3 + $0x180] ss:$16 sps:$4 sm:$0xff]  }
  0x4c   :  { %3602 = vmatprep.subr.bf16.mxu0 %v5093_v21  ;;  %3971 = vmatprep.subr.bf16.mxu1 %v5095_v22  ;;  %v658_v55 = vrot.slane %v6096_v53, %v6091_v50  ;;  %v5141_v63 = vld [vmem:[#allocation3 + $0x1a4] ss:$16 sps:$4 sm:$0xff]   ;;  %v5143_v0 = vld [vmem:[#allocation3 + $0x1ac] ss:$16 sps:$4 sm:$0xff]   ;;  %v5145_v1 = vld [vmem:[#allocation3 + $0x1a0] ss:$16 sps:$4 sm:$0xff]  }
  0x4d   :  { %v5146_v2 = vld [vmem:[#allocation3 + $0x1a8] ss:$16 sps:$4 sm:$0xff]   ;;  %v5147_v3 = vld [vmem:[#allocation3 + $0x1c4] ss:$16 sps:$4 sm:$0xff]   ;;  %v5149_v4 = vld [vmem:[#allocation3 + $0x1cc] ss:$16 sps:$4 sm:$0xff]  }
  0x4e   :  { %v666_v59 = vcombine.high %v658_v55, %v658_v55  ;;  %v5151_v5 = vld [vmem:[#allocation3 + $0x1c0] ss:$16 sps:$4 sm:$0xff]   ;;  %v5152_v6 = vld [vmem:[#allocation3 + $0x1c8] ss:$16 sps:$4 sm:$0xff]   ;;  %v5153_v7 = vld [vmem:[#allocation3 + $0x1e4] ss:$16 sps:$4 sm:$0xff]   ;;  %v6102_v14 = vrot.slane %v658_v55, %v6091_v50 }
  0x4f   :  { %3603 = vmatpush1.bf16.msra.mxu0 %v5097_v23  ;;  %3972 = vmatpush1.bf16.msra.mxu1 %v5098_v24  ;;  %v5155_v8 = vld [vmem:[#allocation3 + $0x1ec] ss:$16 sps:$4 sm:$0xff]   ;;  %v5157_v9 = vld [vmem:[#allocation3 + $0x1e0] ss:$16 sps:$4 sm:$0xff]   ;;  %v5158_v10 = vld [vmem:[#allocation3 + $0x1e8] ss:$16 sps:$4 sm:$0xff]  }
  0x50   :  { %3604 = vmatprep.subr.bf16.mxu0 %v5099_v25  ;;  %3973 = vmatprep.subr.bf16.mxu1 %v5101_v26  ;;  %v688_v61 = vrot.slane %v666_v59, %v6091_v50  ;;  %v5161_v11 = vld [vmem:[#allocation3 + $0x204] ss:$16 sps:$4 sm:$0xff]   ;;  %v5164_v12 = vld [vmem:[#allocation3 + $0x20c] ss:$16 sps:$4 sm:$0xff]   ;;  %v5159_v13 = vld [vmem:[#allocation3 + $0x200] ss:$16 sps:$4 sm:$0xff]  }
  0x51   :  { %v5162_v15 = vld [vmem:[#allocation3 + $0x208] ss:$16 sps:$4 sm:$0xff]   ;;  %v5167_v16 = vld [vmem:[#allocation3 + $0x224] ss:$16 sps:$4 sm:$0xff]   ;;  %v5170_v17 = vld [vmem:[#allocation3 + $0x22c] ss:$16 sps:$4 sm:$0xff]  }
  0x52   :  { %3624 = vmatprep.mubr.bf16.mxu0 %v688_v61  ;;  %3993 = vmatprep.mubr.bf16.mxu1 %v688_v61  ;;  %v698_v18 = vcombine.high %v688_v61, %v688_v61  ;;  %v5165_v19 = vld [vmem:[#allocation3 + $0x220] ss:$16 sps:$4 sm:$0xff]   ;;  %v5168_v20 = vld [vmem:[#allocation3 + $0x228] ss:$16 sps:$4 sm:$0xff]   ;;  %v5173_v21 = vld [vmem:[#allocation3 + $0x244] ss:$16 sps:$4 sm:$0xff]  }
  0x53   :  { %3605 = vmatpush1.bf16.msra.mxu0 %v5103_v27  ;;  %3974 = vmatpush1.bf16.msra.mxu1 %v5104_v28  ;;  %v5176_v22 = vld [vmem:[#allocation3 + $0x24c] ss:$16 sps:$4 sm:$0xff]   ;;  %v5171_v23 = vld [vmem:[#allocation3 + $0x240] ss:$16 sps:$4 sm:$0xff]   ;;  %v5174_v24 = vld [vmem:[#allocation3 + $0x248] ss:$16 sps:$4 sm:$0xff]  }
  0x54   :  { %3606 = vmatprep.subr.bf16.mxu0 %v5105_v29  ;;  %3975 = vmatprep.subr.bf16.mxu1 %v5107_v30  ;;  %v5179_v25 = vld [vmem:[#allocation3 + $0x264] ss:$16 sps:$4 sm:$0xff]   ;;  %v5182_v26 = vld [vmem:[#allocation3 + $0x26c] ss:$16 sps:$4 sm:$0xff]   ;;  %v5177_v27 = vld [vmem:[#allocation3 + $0x260] ss:$16 sps:$4 sm:$0xff]  }
  0x55   :  { %v5180_v28 = vld [vmem:[#allocation3 + $0x268] ss:$16 sps:$4 sm:$0xff]   ;;  %v5185_v29 = vld [vmem:[#allocation3 + $0x284] ss:$16 sps:$4 sm:$0xff]   ;;  %v5188_v30 = vld [vmem:[#allocation3 + $0x28c] ss:$16 sps:$4 sm:$0xff]  }
  0x56   :  { %v5197_v37 = vld [vmem:[#allocation3 + $0x2c4] ss:$16 sps:$4 sm:$0xff]   ;;  %v5200_v38 = vld [vmem:[#allocation3 + $0x2cc] ss:$16 sps:$4 sm:$0xff]   ;;  %v5195_v39 = vld [vmem:[#allocation3 + $0x2c0] ss:$16 sps:$4 sm:$0xff]  }
  0x57   :  { %3607 = vmatpush1.bf16.msra.mxu0 %v5109_v31  ;;  %3976 = vmatpush1.bf16.msra.mxu1 %v5110_v32  ;;  %v5183_v31 = vld [vmem:[#allocation3 + $0x280] ss:$16 sps:$4 sm:$0xff]   ;;  %v5186_v32 = vld [vmem:[#allocation3 + $0x288] ss:$16 sps:$4 sm:$0xff]   ;;  %v5230_v61 = vld [vmem:[#allocation3 + $0x36c] ss:$16 sps:$4 sm:$0xff]  }
  0x58   :  { %3608 = vmatprep.subr.bf16.mxu0 %v5111_v33  ;;  %3977 = vmatprep.subr.bf16.mxu1 %v5113_v34  ;;  %v5191_v33 = vld [vmem:[#allocation3 + $0x2a4] ss:$16 sps:$4 sm:$0xff]   ;;  %v5194_v34 = vld [vmem:[#allocation3 + $0x2ac] ss:$16 sps:$4 sm:$0xff]   ;;  %v5201_v44 = vld [vmem:[#allocation3 + $0x2e0] ss:$16 sps:$4 sm:$0xff]  }
  0x59   :  { %v5216_v55 = vld [vmem:[#allocation3 + $0x328] ss:$16 sps:$4 sm:$0xff]  }
  0x5a   :  { %v5222_v59 = vld [vmem:[#allocation3 + $0x348] ss:$16 sps:$4 sm:$0xff]  }
  0x5b   :  { %3609 = vmatpush1.bf16.msra.mxu0 %v5115_v35  ;;  %3978 = vmatpush1.bf16.msra.mxu1 %v5116_v36  ;;  %v5189_v35 = vld [vmem:[#allocation3 + $0x2a0] ss:$16 sps:$4 sm:$0xff]   ;;  %v5192_v36 = vld [vmem:[#allocation3 + $0x2a8] ss:$16 sps:$4 sm:$0xff]  }
  0x5c   :  { %3610 = vmatprep.subr.bf16.mxu0 %v5117_v40  ;;  %3979 = vmatprep.subr.bf16.mxu1 %v5119_v41  ;;  %v5198_v40 = vld [vmem:[#allocation3 + $0x2c8] ss:$16 sps:$4 sm:$0xff]   ;;  %v5203_v41 = vld [vmem:[#allocation3 + $0x2e4] ss:$16 sps:$4 sm:$0xff]  }
  0x5f   :  { %3611 = vmatpush1.bf16.msra.mxu0 %v5121_v42  ;;  %3980 = vmatpush1.bf16.msra.mxu1 %v5122_v45  ;;  %v5206_v42 = vld [vmem:[#allocation3 + $0x2ec] ss:$16 sps:$4 sm:$0xff]   ;;  %v5204_v45 = vld [vmem:[#allocation3 + $0x2e8] ss:$16 sps:$4 sm:$0xff]  }
  0x60   :  { %3612 = vmatprep.subr.bf16.mxu0 %v5123_v46  ;;  %3981 = vmatprep.subr.bf16.mxu1 %v5125_v47  ;;  %v5209_v46 = vld [vmem:[#allocation3 + $0x304] ss:$16 sps:$4 sm:$0xff]   ;;  %v5212_v47 = vld [vmem:[#allocation3 + $0x30c] ss:$16 sps:$4 sm:$0xff]  }
  0x63   :  { %3613 = vmatpush1.bf16.msra.mxu0 %v5127_v48  ;;  %3982 = vmatpush1.bf16.msra.mxu1 %v5128_v49  ;;  %v5207_v48 = vld [vmem:[#allocation3 + $0x300] ss:$16 sps:$4 sm:$0xff]   ;;  %v5210_v49 = vld [vmem:[#allocation3 + $0x308] ss:$16 sps:$4 sm:$0xff]  }
  0x64   :  { %3614 = vmatprep.subr.bf16.mxu0 %v5129_v51  ;;  %3983 = vmatprep.subr.bf16.mxu1 %v5131_v52  ;;  %v5215_v51 = vld [vmem:[#allocation3 + $0x324] ss:$16 sps:$4 sm:$0xff]   ;;  %v5218_v52 = vld [vmem:[#allocation3 + $0x32c] ss:$16 sps:$4 sm:$0xff]  }
  0x67   :  { %3615 = vmatpush1.bf16.msra.mxu0 %v5133_v54  ;;  %3984 = vmatpush1.bf16.msra.mxu1 %v5134_v56  ;;  %v5213_v54 = vld [vmem:[#allocation3 + $0x320] ss:$16 sps:$4 sm:$0xff]   ;;  %v5221_v56 = vld [vmem:[#allocation3 + $0x344] ss:$16 sps:$4 sm:$0xff]  }
  0x68   :  { %3616 = vmatprep.subr.bf16.mxu0 %v5135_v57  ;;  %3985 = vmatprep.subr.bf16.mxu1 %v5137_v58  ;;  %v5224_v57 = vld [vmem:[#allocation3 + $0x34c] ss:$16 sps:$4 sm:$0xff]   ;;  %v5219_v58 = vld [vmem:[#allocation3 + $0x340] ss:$16 sps:$4 sm:$0xff]  }
  0x6b   :  { %3617 = vmatpush1.bf16.msra.mxu0 %v5139_v60  ;;  %3986 = vmatpush1.bf16.msra.mxu1 %v5140_v62  ;;  %v5227_v60 = vld [vmem:[#allocation3 + $0x364] ss:$16 sps:$4 sm:$0xff]   ;;  %v5225_v62 = vld [vmem:[#allocation3 + $0x360] ss:$16 sps:$4 sm:$0xff]  }
  0x6c   :  { %3618 = vmatprep.subr.bf16.mxu0 %v5141_v63  ;;  %3987 = vmatprep.subr.bf16.mxu1 %v5143_v0  ;;  %v5228_v63 = vld [vmem:[#allocation3 + $0x368] ss:$16 sps:$4 sm:$0xff]   ;;  %v5233_v0 = vld [vmem:[#allocation3 + $0x384] ss:$16 sps:$4 sm:$0xff]  }
  0x6f   :  { %3619 = vmatpush1.bf16.msra.mxu0 %v5145_v1  ;;  %3988 = vmatpush1.bf16.msra.mxu1 %v5146_v2  ;;  %v5236_v1 = vld [vmem:[#allocation3 + $0x38c] ss:$16 sps:$4 sm:$0xff]   ;;  %v5231_v2 = vld [vmem:[#allocation3 + $0x380] ss:$16 sps:$4 sm:$0xff]  }
  0x70   :  { %3620 = vmatprep.subr.bf16.mxu0 %v5147_v3  ;;  %3989 = vmatprep.subr.bf16.mxu1 %v5149_v4  ;;  %v5234_v3 = vld [vmem:[#allocation3 + $0x388] ss:$16 sps:$4 sm:$0xff]   ;;  %v5239_v4 = vld [vmem:[#allocation3 + $0x3a4] ss:$16 sps:$4 sm:$0xff]  }
  0x73   :  { %3621 = vmatpush1.bf16.msra.mxu0 %v5151_v5  ;;  %3990 = vmatpush1.bf16.msra.mxu1 %v5152_v6  ;;  %v5242_v5 = vld [vmem:[#allocation3 + $0x3ac] ss:$16 sps:$4 sm:$0xff]   ;;  %v5237_v6 = vld [vmem:[#allocation3 + $0x3a0] ss:$16 sps:$4 sm:$0xff]  }
  0x74   :  { %3622 = vmatprep.subr.bf16.mxu0 %v5153_v7  ;;  %3991 = vmatprep.subr.bf16.mxu1 %v5155_v8  ;;  %v5240_v7 = vld [vmem:[#allocation3 + $0x3a8] ss:$16 sps:$4 sm:$0xff]   ;;  %v5245_v8 = vld [vmem:[#allocation3 + $0x3c4] ss:$16 sps:$4 sm:$0xff]  }
  0x77   :  { %3623 = vmatpush1.bf16.msra.mxu0 %v5157_v9  ;;  %3992 = vmatpush1.bf16.msra.mxu1 %v5158_v10  ;;  %v5248_v9 = vld [vmem:[#allocation3 + $0x3cc] ss:$16 sps:$4 sm:$0xff]   ;;  %v651_v10 = vcombine.high %v6096_v53, %v6096_v53 }
  0x78   :  { %3633 = vmatprep.subr.bf16.mxu0 %v5161_v11  ;;  %4002 = vmatprep.subr.bf16.mxu1 %v5164_v12  ;;  %v5243_v11 = vld [vmem:[#allocation3 + $0x3c0] ss:$16 sps:$4 sm:$0xff]   ;;  %v5246_v12 = vld [vmem:[#allocation3 + $0x3c8] ss:$16 sps:$4 sm:$0xff]  }
  0x7a   :  { %3625 = vmatmul.mubr.bf16.vlgmr.msra.gmra.mrb[0].mxu0 %v6102_v14  ;;  %3994 = vmatmul.mubr.bf16.vlgmr.msra.gmra.mrb[0].mxu1 %v6102_v14 }
  0x7b   :  { %3634 = vmatpush1.bf16.msra.mxu0 %v5159_v13  ;;  %4003 = vmatpush1.bf16.msra.mxu1 %v5162_v15  ;;  %v5251_v13 = vld [vmem:[#allocation3 + $0x3e4] ss:$16 sps:$4 sm:$0xff]   ;;  %v5254_v15 = vld [vmem:[#allocation3 + $0x3ec] ss:$16 sps:$4 sm:$0xff]  }
  0x7c   :  { %3635 = vmatprep.subr.bf16.mxu0 %v5167_v16  ;;  %4004 = vmatprep.subr.bf16.mxu1 %v5170_v17  ;;  %v6109_v16 = vrot.slane %v651_v10, %v6091_v50  ;;  %v5249_v17 = vld [vmem:[#allocation3 + $0x3e0] ss:$16 sps:$4 sm:$0xff]   ;;  %v5330_v10 = vld [vmem:[#allocation3 + $0x588] ss:$16 sps:$4 sm:$0xff]  }
  0x7d   :  { %3665 = vmatprep.mubr.bf16.mxu0 %v698_v18  ;;  %4034 = vmatprep.mubr.bf16.mxu1 %v698_v18  ;;  %v5252_v18 = vld [vmem:[#allocation3 + $0x3e8] ss:$16 sps:$4 sm:$0xff]  }
  0x7e   :  { %v667_v53 = vcombine.high %v6109_v16, %v6109_v16 }
  0x7f   :  { %3636 = vmatpush1.bf16.msra.mxu0 %v5165_v19  ;;  %4005 = vmatpush1.bf16.msra.mxu1 %v5168_v20  ;;  %v5257_v19 = vld [vmem:[#allocation3 + $0x404] ss:$16 sps:$4 sm:$0xff]   ;;  %v5260_v20 = vld [vmem:[#allocation3 + $0x40c] ss:$16 sps:$4 sm:$0xff]  }
  0x80   :  { %3637 = vmatprep.subr.bf16.mxu0 %v5173_v21  ;;  %4006 = vmatprep.subr.bf16.mxu1 %v5176_v22  ;;  %v5255_v21 = vld [vmem:[#allocation3 + $0x400] ss:$16 sps:$4 sm:$0xff]   ;;  %v696_v22 = vcombine.high %v6102_v14, %v6102_v14  ;;  %v5272_v14 = vld [vmem:[#allocation3 + $0x44c] ss:$16 sps:$4 sm:$0xff]  }
  0x83   :  { %3638 = vmatpush1.bf16.msra.mxu0 %v5171_v23  ;;  %4007 = vmatpush1.bf16.msra.mxu1 %v5174_v24  ;;  %v5258_v23 = vld [vmem:[#allocation3 + $0x408] ss:$16 sps:$4 sm:$0xff]   ;;  %v5263_v24 = vld [vmem:[#allocation3 + $0x424] ss:$16 sps:$4 sm:$0xff]  }
  0x84   :  { %3639 = vmatprep.subr.bf16.mxu0 %v5179_v25  ;;  %4008 = vmatprep.subr.bf16.mxu1 %v5182_v26  ;;  %v5266_v25 = vld [vmem:[#allocation3 + $0x42c] ss:$16 sps:$4 sm:$0xff]   ;;  %v6116_v26 = vrot.slane %v667_v53, %v6091_v50  ;;  %v5347_v53 = vld [vmem:[#allocation3 + $0x5e4] ss:$16 sps:$4 sm:$0xff]  }
  0x87   :  { %3640 = vmatpush1.bf16.msra.mxu0 %v5177_v27  ;;  %4009 = vmatpush1.bf16.msra.mxu1 %v5180_v28  ;;  %v5261_v27 = vld [vmem:[#allocation3 + $0x420] ss:$16 sps:$4 sm:$0xff]   ;;  %v5264_v28 = vld [vmem:[#allocation3 + $0x428] ss:$16 sps:$4 sm:$0xff]  }
  0x88   :  { %3641 = vmatprep.subr.bf16.mxu0 %v5185_v29  ;;  %4010 = vmatprep.subr.bf16.mxu1 %v5188_v30  ;;  %v5269_v29 = vld [vmem:[#allocation3 + $0x444] ss:$16 sps:$4 sm:$0xff]   ;;  %v5267_v30 = vld [vmem:[#allocation3 + $0x440] ss:$16 sps:$4 sm:$0xff]  }
  0x8b   :  { %3642 = vmatpush1.bf16.msra.mxu0 %v5183_v31  ;;  %4011 = vmatpush1.bf16.msra.mxu1 %v5186_v32  ;;  %v5270_v31 = vld [vmem:[#allocation3 + $0x448] ss:$16 sps:$4 sm:$0xff]   ;;  %v5275_v32 = vld [vmem:[#allocation3 + $0x464] ss:$16 sps:$4 sm:$0xff]  }
  0x8c   :  { %3643 = vmatprep.subr.bf16.mxu0 %v5191_v33  ;;  %4012 = vmatprep.subr.bf16.mxu1 %v5194_v34  ;;  %v5278_v33 = vld [vmem:[#allocation3 + $0x46c] ss:$16 sps:$4 sm:$0xff]   ;;  %v5273_v34 = vld [vmem:[#allocation3 + $0x460] ss:$16 sps:$4 sm:$0xff]  }
  0x8f   :  { %3644 = vmatpush1.bf16.msra.mxu0 %v5189_v35  ;;  %4013 = vmatpush1.bf16.msra.mxu1 %v5192_v36  ;;  %v5276_v35 = vld [vmem:[#allocation3 + $0x468] ss:$16 sps:$4 sm:$0xff]   ;;  %v5281_v36 = vld [vmem:[#allocation3 + $0x484] ss:$16 sps:$4 sm:$0xff]  }
  0x90   :  { %3645 = vmatprep.subr.bf16.mxu0 %v5197_v37  ;;  %4014 = vmatprep.subr.bf16.mxu1 %v5200_v38  ;;  %v5284_v37 = vld [vmem:[#allocation3 + $0x48c] ss:$16 sps:$4 sm:$0xff]   ;;  %v5279_v38 = vld [vmem:[#allocation3 + $0x480] ss:$16 sps:$4 sm:$0xff]  }
  0x93   :  { %3646 = vmatpush1.bf16.msra.mxu0 %v5195_v39  ;;  %4015 = vmatpush1.bf16.msra.mxu1 %v5198_v40  ;;  %v5282_v39 = vld [vmem:[#allocation3 + $0x488] ss:$16 sps:$4 sm:$0xff]   ;;  %v5287_v40 = vld [vmem:[#allocation3 + $0x4a4] ss:$16 sps:$4 sm:$0xff]  }
  0x94   :  { %3647 = vmatprep.subr.bf16.mxu0 %v5203_v41  ;;  %4016 = vmatprep.subr.bf16.mxu1 %v5206_v42  ;;  %v5290_v41 = vld [vmem:[#allocation3 + $0x4ac] ss:$16 sps:$4 sm:$0xff]   ;;  %v5285_v42 = vld [vmem:[#allocation3 + $0x4a0] ss:$16 sps:$4 sm:$0xff]  }
  0x97   :  { %3648 = vmatpush1.bf16.msra.mxu0 %v5201_v44  ;;  %4017 = vmatpush1.bf16.msra.mxu1 %v5204_v45  ;;  %v5288_v44 = vld [vmem:[#allocation3 + $0x4a8] ss:$16 sps:$4 sm:$0xff]   ;;  %v5293_v45 = vld [vmem:[#allocation3 + $0x4c4] ss:$16 sps:$4 sm:$0xff]  }
  0x98   :  { %3649 = vmatprep.subr.bf16.mxu0 %v5209_v46  ;;  %4018 = vmatprep.subr.bf16.mxu1 %v5212_v47  ;;  %v5296_v46 = vld [vmem:[#allocation3 + $0x4cc] ss:$16 sps:$4 sm:$0xff]   ;;  %v5291_v47 = vld [vmem:[#allocation3 + $0x4c0] ss:$16 sps:$4 sm:$0xff]  }
  0x9b   :  { %3650 = vmatpush1.bf16.msra.mxu0 %v5207_v48  ;;  %4019 = vmatpush1.bf16.msra.mxu1 %v5210_v49  ;;  %v5294_v48 = vld [vmem:[#allocation3 + $0x4c8] ss:$16 sps:$4 sm:$0xff]   ;;  %v5299_v49 = vld [vmem:[#allocation3 + $0x4e4] ss:$16 sps:$4 sm:$0xff]  }
  0x9c   :  { %3651 = vmatprep.subr.bf16.mxu0 %v5215_v51  ;;  %4020 = vmatprep.subr.bf16.mxu1 %v5218_v52  ;;  %v5302_v51 = vld [vmem:[#allocation3 + $0x4ec] ss:$16 sps:$4 sm:$0xff]   ;;  %v5297_v52 = vld [vmem:[#allocation3 + $0x4e0] ss:$16 sps:$4 sm:$0xff]  }
  0x9f   :  { %3652 = vmatpush1.bf16.msra.mxu0 %v5213_v54  ;;  %4021 = vmatpush1.bf16.msra.mxu1 %v5216_v55  ;;  %v5300_v54 = vld [vmem:[#allocation3 + $0x4e8] ss:$16 sps:$4 sm:$0xff]   ;;  %v5305_v55 = vld [vmem:[#allocation3 + $0x504] ss:$16 sps:$4 sm:$0xff]  }
  0xa0   :  { %3653 = vmatprep.subr.bf16.mxu0 %v5221_v56  ;;  %4022 = vmatprep.subr.bf16.mxu1 %v5224_v57  ;;  %v5308_v56 = vld [vmem:[#allocation3 + $0x50c] ss:$16 sps:$4 sm:$0xff]   ;;  %v5303_v57 = vld [vmem:[#allocation3 + $0x500] ss:$16 sps:$4 sm:$0xff]  }
  0xa3   :  { %3654 = vmatpush1.bf16.msra.mxu0 %v5219_v58  ;;  %4023 = vmatpush1.bf16.msra.mxu1 %v5222_v59  ;;  %v5306_v58 = vld [vmem:[#allocation3 + $0x508] ss:$16 sps:$4 sm:$0xff]   ;;  %v5311_v59 = vld [vmem:[#allocation3 + $0x524] ss:$16 sps:$4 sm:$0xff]  }
  0xa4   :  { %3655 = vmatprep.subr.bf16.mxu0 %v5227_v60  ;;  %4024 = vmatprep.subr.bf16.mxu1 %v5230_v61  ;;  %v5314_v60 = vld [vmem:[#allocation3 + $0x52c] ss:$16 sps:$4 sm:$0xff]   ;;  %v5309_v61 = vld [vmem:[#allocation3 + $0x520] ss:$16 sps:$4 sm:$0xff]  }
  0xa7   :  { %3656 = vmatpush1.bf16.msra.mxu0 %v5225_v62  ;;  %4025 = vmatpush1.bf16.msra.mxu1 %v5228_v63  ;;  %v5312_v62 = vld [vmem:[#allocation3 + $0x528] ss:$16 sps:$4 sm:$0xff]   ;;  %v5317_v63 = vld [vmem:[#allocation3 + $0x544] ss:$16 sps:$4 sm:$0xff]  }
  0xa8   :  { %3657 = vmatprep.subr.bf16.mxu0 %v5233_v0  ;;  %4026 = vmatprep.subr.bf16.mxu1 %v5236_v1  ;;  %v5320_v0 = vld [vmem:[#allocation3 + $0x54c] ss:$16 sps:$4 sm:$0xff]   ;;  %v5315_v1 = vld [vmem:[#allocation3 + $0x540] ss:$16 sps:$4 sm:$0xff]  }
  0xab   :  { %3658 = vmatpush1.bf16.msra.mxu0 %v5231_v2  ;;  %4027 = vmatpush1.bf16.msra.mxu1 %v5234_v3  ;;  %v5318_v2 = vld [vmem:[#allocation3 + $0x548] ss:$16 sps:$4 sm:$0xff]   ;;  %v5323_v3 = vld [vmem:[#allocation3 + $0x564] ss:$16 sps:$4 sm:$0xff]  }
  0xac   :  { %3659 = vmatprep.subr.bf16.mxu0 %v5239_v4  ;;  %4028 = vmatprep.subr.bf16.mxu1 %v5242_v5  ;;  %v5326_v4 = vld [vmem:[#allocation3 + $0x56c] ss:$16 sps:$4 sm:$0xff]   ;;  %v5321_v5 = vld [vmem:[#allocation3 + $0x560] ss:$16 sps:$4 sm:$0xff]  }
  0xaf   :  { %3660 = vmatpush1.bf16.msra.mxu0 %v5237_v6  ;;  %4029 = vmatpush1.bf16.msra.mxu1 %v5240_v7  ;;  %v5324_v6 = vld [vmem:[#allocation3 + $0x568] ss:$16 sps:$4 sm:$0xff]   ;;  %v5329_v7 = vld [vmem:[#allocation3 + $0x584] ss:$16 sps:$4 sm:$0xff]  }
  0xb0   :  { %3661 = vmatprep.subr.bf16.mxu0 %v5245_v8  ;;  %4030 = vmatprep.subr.bf16.mxu1 %v5248_v9  ;;  %v5332_v8 = vld [vmem:[#allocation3 + $0x58c] ss:$16 sps:$4 sm:$0xff]   ;;  %v5327_v9 = vld [vmem:[#allocation3 + $0x580] ss:$16 sps:$4 sm:$0xff]  }
  0xb3   :  { %3662 = vmatpush1.bf16.msra.mxu0 %v5243_v11  ;;  %4031 = vmatpush1.bf16.msra.mxu1 %v5246_v12  ;;  %v5335_v11 = vld [vmem:[#allocation3 + $0x5a4] ss:$16 sps:$4 sm:$0xff]   ;;  %v5338_v12 = vld [vmem:[#allocation3 + $0x5ac] ss:$16 sps:$4 sm:$0xff]  }
  0xb4   :  { %3663 = vmatprep.subr.bf16.mxu0 %v5251_v13  ;;  %4032 = vmatprep.subr.bf16.mxu1 %v5254_v15  ;;  %v5333_v13 = vld [vmem:[#allocation3 + $0x5a0] ss:$16 sps:$4 sm:$0xff]   ;;  %v5336_v15 = vld [vmem:[#allocation3 + $0x5a8] ss:$16 sps:$4 sm:$0xff]  }
  0xb7   :  { %3664 = vmatpush1.bf16.msra.mxu0 %v5249_v17  ;;  %4033 = vmatpush1.bf16.msra.mxu1 %v5252_v18  ;;  %v5341_v17 = vld [vmem:[#allocation3 + $0x5c4] ss:$16 sps:$4 sm:$0xff]   ;;  %v5344_v18 = vld [vmem:[#allocation3 + $0x5cc] ss:$16 sps:$4 sm:$0xff]  }
  0xb8   :  { %3674 = vmatprep.subr.bf16.mxu0 %v5257_v19  ;;  %4043 = vmatprep.subr.bf16.mxu1 %v5260_v20  ;;  %v5339_v19 = vld [vmem:[#allocation3 + $0x5c0] ss:$16 sps:$4 sm:$0xff]   ;;  %v5342_v20 = vld [vmem:[#allocation3 + $0x5c8] ss:$16 sps:$4 sm:$0xff]  }
  0xba   :  { %3666 = vmatmul.mubr.bf16.vlgmr.msra.gmra.mrb[0].mxu0 %v696_v22  ;;  %4035 = vmatmul.mubr.bf16.vlgmr.msra.gmra.mrb[0].mxu1 %v696_v22  ;;  %v5345_v22 = vld [vmem:[#allocation3 + $0x5e0] ss:$16 sps:$4 sm:$0xff]  }
  0xbb   :  { %3675 = vmatpush1.bf16.msra.mxu0 %v5255_v21  ;;  %4044 = vmatpush1.bf16.msra.mxu1 %v5258_v23  ;;  %v5350_v21 = vld [vmem:[#allocation3 + $0x5ec] ss:$16 sps:$4 sm:$0xff]   ;;  %v5348_v23 = vld [vmem:[#allocation3 + $0x5e8] ss:$16 sps:$4 sm:$0xff]  }
  0xbc   :  { %3676 = vmatprep.subr.bf16.mxu0 %v5263_v24  ;;  %4045 = vmatprep.subr.bf16.mxu1 %v5266_v25  ;;  %v5354_v24 = vld [vmem:[#allocation3 + $0x604] ss:$16 sps:$4 sm:$0xff]   ;;  %v5357_v25 = vld [vmem:[#allocation3 + $0x60c] ss:$16 sps:$4 sm:$0xff]  }
  0xbd   :  { %3706 = vmatprep.mubr.bf16.mxu0 %v6116_v26  ;;  %4075 = vmatprep.mubr.bf16.mxu1 %v6116_v26 }
  0xbf   :  { %3677 = vmatpush1.bf16.msra.mxu0 %v5261_v27  ;;  %4046 = vmatpush1.bf16.msra.mxu1 %v5264_v28  ;;  %v5352_v27 = vld [vmem:[#allocation3 + $0x600] ss:$16 sps:$4 sm:$0xff]   ;;  %v6122_v28 = vrot.slane %v6109_v16, %v6091_v50  ;;  %v5366_v16 = vld [vmem:[#allocation3 + $0x644] ss:$16 sps:$4 sm:$0xff]  }
  0xc0   :  { %3678 = vmatprep.subr.bf16.mxu0 %v5269_v29  ;;  %4047 = vmatprep.subr.bf16.mxu1 %v5272_v14  ;;  %v5355_v29 = vld [vmem:[#allocation3 + $0x608] ss:$16 sps:$4 sm:$0xff]   ;;  %v5360_v14 = vld [vmem:[#allocation3 + $0x624] ss:$16 sps:$4 sm:$0xff]  }
  0xc3   :  { %3679 = vmatpush1.bf16.msra.mxu0 %v5267_v30  ;;  %4048 = vmatpush1.bf16.msra.mxu1 %v5270_v31  ;;  %v5363_v30 = vld [vmem:[#allocation3 + $0x62c] ss:$16 sps:$4 sm:$0xff]   ;;  %v699_v31 = vcombine.high %v6116_v26, %v6116_v26  ;;  %v5372_v26 = vld [vmem:[#allocation3 + $0x664] ss:$16 sps:$4 sm:$0xff]  }
  0xc4   :  { %3680 = vmatprep.subr.bf16.mxu0 %v5275_v32  ;;  %4049 = vmatprep.subr.bf16.mxu1 %v5278_v33  ;;  %v5358_v32 = vld [vmem:[#allocation3 + $0x620] ss:$16 sps:$4 sm:$0xff]   ;;  %v5361_v33 = vld [vmem:[#allocation3 + $0x628] ss:$16 sps:$4 sm:$0xff]  }
  0xc7   :  { %3681 = vmatpush1.bf16.msra.mxu0 %v5273_v34  ;;  %4050 = vmatpush1.bf16.msra.mxu1 %v5276_v35  ;;  %v5369_v34 = vld [vmem:[#allocation3 + $0x64c] ss:$16 sps:$4 sm:$0xff]   ;;  %v5364_v35 = vld [vmem:[#allocation3 + $0x640] ss:$16 sps:$4 sm:$0xff]  }
  0xc8   :  { %3682 = vmatprep.subr.bf16.mxu0 %v5281_v36  ;;  %4051 = vmatprep.subr.bf16.mxu1 %v5284_v37  ;;  %v5367_v36 = vld [vmem:[#allocation3 + $0x648] ss:$16 sps:$4 sm:$0xff]   ;;  %v5375_v37 = vld [vmem:[#allocation3 + $0x66c] ss:$16 sps:$4 sm:$0xff]  }
  0xcb   :  { %3683 = vmatpush1.bf16.msra.mxu0 %v5279_v38  ;;  %4052 = vmatpush1.bf16.msra.mxu1 %v5282_v39  ;;  %v5370_v38 = vld [vmem:[#allocation3 + $0x660] ss:$16 sps:$4 sm:$0xff]   ;;  %v5373_v39 = vld [vmem:[#allocation3 + $0x668] ss:$16 sps:$4 sm:$0xff]  }
  0xcc   :  { %3684 = vmatprep.subr.bf16.mxu0 %v5287_v40  ;;  %4053 = vmatprep.subr.bf16.mxu1 %v5290_v41  ;;  %v5378_v40 = vld [vmem:[#allocation3 + $0x684] ss:$16 sps:$4 sm:$0xff]   ;;  %v5381_v41 = vld [vmem:[#allocation3 + $0x68c] ss:$16 sps:$4 sm:$0xff]  }
  0xcf   :  { %3685 = vmatpush1.bf16.msra.mxu0 %v5285_v42  ;;  %4054 = vmatpush1.bf16.msra.mxu1 %v5288_v44  ;;  %v5376_v42 = vld [vmem:[#allocation3 + $0x680] ss:$16 sps:$4 sm:$0xff]   ;;  %v5379_v44 = vld [vmem:[#allocation3 + $0x688] ss:$16 sps:$4 sm:$0xff]  }
  0xd0   :  { %3686 = vmatprep.subr.bf16.mxu0 %v5293_v45  ;;  %4055 = vmatprep.subr.bf16.mxu1 %v5296_v46  ;;  %v5384_v45 = vld [vmem:[#allocation3 + $0x6a4] ss:$16 sps:$4 sm:$0xff]   ;;  %v5387_v46 = vld [vmem:[#allocation3 + $0x6ac] ss:$16 sps:$4 sm:$0xff]  }
  0xd3   :  { %3687 = vmatpush1.bf16.msra.mxu0 %v5291_v47  ;;  %4056 = vmatpush1.bf16.msra.mxu1 %v5294_v48  ;;  %v5382_v47 = vld [vmem:[#allocation3 + $0x6a0] ss:$16 sps:$4 sm:$0xff]   ;;  %v5385_v48 = vld [vmem:[#allocation3 + $0x6a8] ss:$16 sps:$4 sm:$0xff]  }
  0xd4   :  { %3688 = vmatprep.subr.bf16.mxu0 %v5299_v49  ;;  %4057 = vmatprep.subr.bf16.mxu1 %v5302_v51  ;;  %v5390_v49 = vld [vmem:[#allocation3 + $0x6c4] ss:$16 sps:$4 sm:$0xff]   ;;  %v5393_v51 = vld [vmem:[#allocation3 + $0x6cc] ss:$16 sps:$4 sm:$0xff]  }
  0xd7   :  { %3689 = vmatpush1.bf16.msra.mxu0 %v5297_v52  ;;  %4058 = vmatpush1.bf16.msra.mxu1 %v5300_v54  ;;  %v5388_v52 = vld [vmem:[#allocation3 + $0x6c0] ss:$16 sps:$4 sm:$0xff]   ;;  %v5391_v54 = vld [vmem:[#allocation3 + $0x6c8] ss:$16 sps:$4 sm:$0xff]  }
  0xd8   :  { %3690 = vmatprep.subr.bf16.mxu0 %v5305_v55  ;;  %4059 = vmatprep.subr.bf16.mxu1 %v5308_v56  ;;  %v5396_v55 = vld [vmem:[#allocation3 + $0x6e4] ss:$16 sps:$4 sm:$0xff]   ;;  %v5399_v56 = vld [vmem:[#allocation3 + $0x6ec] ss:$16 sps:$4 sm:$0xff]  }
  0xdb   :  { %3691 = vmatpush1.bf16.msra.mxu0 %v5303_v57  ;;  %4060 = vmatpush1.bf16.msra.mxu1 %v5306_v58  ;;  %v5394_v57 = vld [vmem:[#allocation3 + $0x6e0] ss:$16 sps:$4 sm:$0xff]   ;;  %v5397_v58 = vld [vmem:[#allocation3 + $0x6e8] ss:$16 sps:$4 sm:$0xff]  }
  0xdc   :  { %3692 = vmatprep.subr.bf16.mxu0 %v5311_v59  ;;  %4061 = vmatprep.subr.bf16.mxu1 %v5314_v60  ;;  %v5402_v59 = vld [vmem:[#allocation3 + $0x704] ss:$16 sps:$4 sm:$0xff]   ;;  %v5405_v60 = vld [vmem:[#allocation3 + $0x70c] ss:$16 sps:$4 sm:$0xff]  }
  0xdf   :  { %3693 = vmatpush1.bf16.msra.mxu0 %v5309_v61  ;;  %4062 = vmatpush1.bf16.msra.mxu1 %v5312_v62  ;;  %v5400_v61 = vld [vmem:[#allocation3 + $0x700] ss:$16 sps:$4 sm:$0xff]   ;;  %v5403_v62 = vld [vmem:[#allocation3 + $0x708] ss:$16 sps:$4 sm:$0xff]  }
  0xe0   :  { %3694 = vmatprep.subr.bf16.mxu0 %v5317_v63  ;;  %4063 = vmatprep.subr.bf16.mxu1 %v5320_v0  ;;  %v5408_v63 = vld [vmem:[#allocation3 + $0x724] ss:$16 sps:$4 sm:$0xff]   ;;  %v5411_v0 = vld [vmem:[#allocation3 + $0x72c] ss:$16 sps:$4 sm:$0xff]  }
  0xe3   :  { %3695 = vmatpush1.bf16.msra.mxu0 %v5315_v1  ;;  %4064 = vmatpush1.bf16.msra.mxu1 %v5318_v2  ;;  %v5406_v1 = vld [vmem:[#allocation3 + $0x720] ss:$16 sps:$4 sm:$0xff]   ;;  %v5409_v2 = vld [vmem:[#allocation3 + $0x728] ss:$16 sps:$4 sm:$0xff]  }
  0xe4   :  { %3696 = vmatprep.subr.bf16.mxu0 %v5323_v3  ;;  %4065 = vmatprep.subr.bf16.mxu1 %v5326_v4  ;;  %v5414_v3 = vld [vmem:[#allocation3 + $0x744] ss:$16 sps:$4 sm:$0xff]   ;;  %v5417_v4 = vld [vmem:[#allocation3 + $0x74c] ss:$16 sps:$4 sm:$0xff]  }
  0xe7   :  { %3697 = vmatpush1.bf16.msra.mxu0 %v5321_v5  ;;  %4066 = vmatpush1.bf16.msra.mxu1 %v5324_v6  ;;  %v5412_v5 = vld [vmem:[#allocation3 + $0x740] ss:$16 sps:$4 sm:$0xff]   ;;  %v5415_v6 = vld [vmem:[#allocation3 + $0x748] ss:$16 sps:$4 sm:$0xff]  }
  0xe8   :  { %3698 = vmatprep.subr.bf16.mxu0 %v5329_v7  ;;  %4067 = vmatprep.subr.bf16.mxu1 %v5332_v8  ;;  %v5420_v7 = vld [vmem:[#allocation3 + $0x764] ss:$16 sps:$4 sm:$0xff]   ;;  %v5423_v8 = vld [vmem:[#allocation3 + $0x76c] ss:$16 sps:$4 sm:$0xff]  }
  0xeb   :  { %3699 = vmatpush1.bf16.msra.mxu0 %v5327_v9  ;;  %4068 = vmatpush1.bf16.msra.mxu1 %v5330_v10  ;;  %v5418_v9 = vld [vmem:[#allocation3 + $0x760] ss:$16 sps:$4 sm:$0xff]   ;;  %v5421_v10 = vld [vmem:[#allocation3 + $0x768] ss:$16 sps:$4 sm:$0xff]  }
  0xec   :  { %3700 = vmatprep.subr.bf16.mxu0 %v5335_v11  ;;  %4069 = vmatprep.subr.bf16.mxu1 %v5338_v12  ;;  %v5426_v11 = vld [vmem:[#allocation3 + $0x784] ss:$16 sps:$4 sm:$0xff]   ;;  %v5429_v12 = vld [vmem:[#allocation3 + $0x78c] ss:$16 sps:$4 sm:$0xff]  }
  0xef   :  { %3701 = vmatpush1.bf16.msra.mxu0 %v5333_v13  ;;  %4070 = vmatpush1.bf16.msra.mxu1 %v5336_v15  ;;  %v5424_v13 = vld [vmem:[#allocation3 + $0x780] ss:$16 sps:$4 sm:$0xff]   ;;  %v5427_v15 = vld [vmem:[#allocation3 + $0x788] ss:$16 sps:$4 sm:$0xff]  }
  0xf0   :  { %3702 = vmatprep.subr.bf16.mxu0 %v5341_v17  ;;  %4071 = vmatprep.subr.bf16.mxu1 %v5344_v18  ;;  %v5432_v17 = vld [vmem:[#allocation3 + $0x7a4] ss:$16 sps:$4 sm:$0xff]   ;;  %v5435_v18 = vld [vmem:[#allocation3 + $0x7ac] ss:$16 sps:$4 sm:$0xff]  }
  0xf3   :  { %3703 = vmatpush1.bf16.msra.mxu0 %v5339_v19  ;;  %4072 = vmatpush1.bf16.msra.mxu1 %v5342_v20  ;;  %v5430_v19 = vld [vmem:[#allocation3 + $0x7a0] ss:$16 sps:$4 sm:$0xff]   ;;  %v5433_v20 = vld [vmem:[#allocation3 + $0x7a8] ss:$16 sps:$4 sm:$0xff]  }
  0xf4   :  { %3704 = vmatprep.subr.bf16.mxu0 %v5347_v53  ;;  %4073 = vmatprep.subr.bf16.mxu1 %v5350_v21  ;;  %v5438_v53 = vld [vmem:[#allocation3 + $0x7c4] ss:$16 sps:$4 sm:$0xff]   ;;  %v5441_v21 = vld [vmem:[#allocation3 + $0x7cc] ss:$16 sps:$4 sm:$0xff]  }
  0xf7   :  { %3705 = vmatpush1.bf16.msra.mxu0 %v5345_v22  ;;  %4074 = vmatpush1.bf16.msra.mxu1 %v5348_v23  ;;  %v6131_v22 = vld [vmem:[%s6208_s0 + $0x8] sm:$0xff]  ;;  %v5436_v23 = vld [vmem:[#allocation3 + $0x7c0] ss:$16 sps:$4 sm:$0xff]  }
  0xf8   :  { %3715 = vmatprep.subr.bf16.mxu0 %v5354_v24  ;;  %4084 = vmatprep.subr.bf16.mxu1 %v5357_v25  ;;  %v5439_v24 = vld [vmem:[#allocation3 + $0x7c8] ss:$16 sps:$4 sm:$0xff]   ;;  %v5444_v25 = vld [vmem:[#allocation3 + $0x7e4] ss:$16 sps:$4 sm:$0xff]  }
  0xfa   :  { %3707 = vmatmul.mubr.bf16.vlgmr.msra.gmra.mrb[0].mxu0 %v6122_v28  ;;  %4076 = vmatmul.mubr.bf16.vlgmr.msra.gmra.mrb[0].mxu1 %v6122_v28 }
  0xfb   :  { %3716 = vmatpush1.bf16.msra.mxu0 %v5352_v27  ;;  %4085 = vmatpush1.bf16.msra.mxu1 %v5355_v29  ;;  %v5447_v27 = vld [vmem:[#allocation3 + $0x7ec] ss:$16 sps:$4 sm:$0xff]   ;;  %v6135_v29 = vrot.slane %v6131_v22, %v6091_v50 }
  0xfc   :  { %3717 = vmatprep.subr.bf16.mxu0 %v5360_v14  ;;  %4086 = vmatprep.subr.bf16.mxu1 %v5363_v30  ;;  %v5442_v14 = vld [vmem:[#allocation3 + $0x7e0] ss:$16 sps:$4 sm:$0xff]   ;;  %v5445_v30 = vld [vmem:[#allocation3 + $0x7e8] ss:$16 sps:$4 sm:$0xff]  }
  0xfd   :  { %3747 = vmatprep.mubr.bf16.mxu0 %v699_v31  ;;  %4116 = vmatprep.mubr.bf16.mxu1 %v699_v31  ;;  %v5450_v31 = vld [vmem:[#allocation3 + $0x804] ss:$16 sps:$4 sm:$0xff]  }
  0xff   :  { %3718 = vmatpush1.bf16.msra.mxu0 %v5358_v32  ;;  %4087 = vmatpush1.bf16.msra.mxu1 %v5361_v33  ;;  %v5453_v32 = vld [vmem:[#allocation3 + $0x80c] ss:$16 sps:$4 sm:$0xff]   ;;  %v715_v33 = vcombine.high %v6135_v29, %v6135_v29 }
 0x100   :  { %3719 = vmatprep.subr.bf16.mxu0 %v5366_v16  ;;  %4088 = vmatprep.subr.bf16.mxu1 %v5369_v34  ;;  %v697_v16 = vcombine.high %v6122_v28, %v6122_v28  ;;  %v5448_v34 = vld [vmem:[#allocation3 + $0x800] ss:$16 sps:$4 sm:$0xff]   ;;  %v5462_v28 = vld [vmem:[#allocation3 + $0x844] ss:$16 sps:$4 sm:$0xff]  }
 0x103   :  { %3720 = vmatpush1.bf16.msra.mxu0 %v5364_v35  ;;  %4089 = vmatpush1.bf16.msra.mxu1 %v5367_v36  ;;  %v5451_v35 = vld [vmem:[#allocation3 + $0x808] ss:$16 sps:$4 sm:$0xff]   ;;  %v5456_v36 = vld [vmem:[#allocation3 + $0x824] ss:$16 sps:$4 sm:$0xff]  }
 0x104   :  { %3721 = vmatprep.subr.bf16.mxu0 %v5372_v26  ;;  %4090 = vmatprep.subr.bf16.mxu1 %v5375_v37  ;;  %v5459_v26 = vld [vmem:[#allocation3 + $0x82c] ss:$16 sps:$4 sm:$0xff]   ;;  %v6142_v37 = vrot.slane %v715_v33, %v6091_v50  ;;  %v5535_v33 = vld [vmem:[#allocation3 + $0x9c8] ss:$16 sps:$4 sm:$0xff]  }
 0x107   :  { %3722 = vmatpush1.bf16.msra.mxu0 %v5370_v38  ;;  %4091 = vmatpush1.bf16.msra.mxu1 %v5373_v39  ;;  %v5454_v38 = vld [vmem:[#allocation3 + $0x820] ss:$16 sps:$4 sm:$0xff]   ;;  %v5457_v39 = vld [vmem:[#allocation3 + $0x828] ss:$16 sps:$4 sm:$0xff]  }
 0x108   :  { %3723 = vmatprep.subr.bf16.mxu0 %v5378_v40  ;;  %4092 = vmatprep.subr.bf16.mxu1 %v5381_v41  ;;  %v5465_v40 = vld [vmem:[#allocation3 + $0x84c] ss:$16 sps:$4 sm:$0xff]   ;;  %v5460_v41 = vld [vmem:[#allocation3 + $0x840] ss:$16 sps:$4 sm:$0xff]  }
 0x10b   :  { %3724 = vmatpush1.bf16.msra.mxu0 %v5376_v42  ;;  %4093 = vmatpush1.bf16.msra.mxu1 %v5379_v44  ;;  %v5463_v42 = vld [vmem:[#allocation3 + $0x848] ss:$16 sps:$4 sm:$0xff]   ;;  %v5468_v44 = vld [vmem:[#allocation3 + $0x864] ss:$16 sps:$4 sm:$0xff]  }
 0x10c   :  { %3725 = vmatprep.subr.bf16.mxu0 %v5384_v45  ;;  %4094 = vmatprep.subr.bf16.mxu1 %v5387_v46  ;;  %v5471_v45 = vld [vmem:[#allocation3 + $0x86c] ss:$16 sps:$4 sm:$0xff]   ;;  %v5466_v46 = vld [vmem:[#allocation3 + $0x860] ss:$16 sps:$4 sm:$0xff]  }
 0x10f   :  { %3726 = vmatpush1.bf16.msra.mxu0 %v5382_v47  ;;  %4095 = vmatpush1.bf16.msra.mxu1 %v5385_v48  ;;  %v5469_v47 = vld [vmem:[#allocation3 + $0x868] ss:$16 sps:$4 sm:$0xff]   ;;  %v5474_v48 = vld [vmem:[#allocation3 + $0x884] ss:$16 sps:$4 sm:$0xff]  }
 0x110   :  { %3727 = vmatprep.subr.bf16.mxu0 %v5390_v49  ;;  %4096 = vmatprep.subr.bf16.mxu1 %v5393_v51  ;;  %v5477_v49 = vld [vmem:[#allocation3 + $0x88c] ss:$16 sps:$4 sm:$0xff]   ;;  %v5472_v51 = vld [vmem:[#allocation3 + $0x880] ss:$16 sps:$4 sm:$0xff]  }
 0x113   :  { %3728 = vmatpush1.bf16.msra.mxu0 %v5388_v52  ;;  %4097 = vmatpush1.bf16.msra.mxu1 %v5391_v54  ;;  %v5475_v52 = vld [vmem:[#allocation3 + $0x888] ss:$16 sps:$4 sm:$0xff]   ;;  %v5480_v54 = vld [vmem:[#allocation3 + $0x8a4] ss:$16 sps:$4 sm:$0xff]  }
 0x114   :  { %3729 = vmatprep.subr.bf16.mxu0 %v5396_v55  ;;  %4098 = vmatprep.subr.bf16.mxu1 %v5399_v56  ;;  %v5483_v55 = vld [vmem:[#allocation3 + $0x8ac] ss:$16 sps:$4 sm:$0xff]   ;;  %v5478_v56 = vld [vmem:[#allocation3 + $0x8a0] ss:$16 sps:$4 sm:$0xff]  }
 0x117   :  { %3730 = vmatpush1.bf16.msra.mxu0 %v5394_v57  ;;  %4099 = vmatpush1.bf16.msra.mxu1 %v5397_v58  ;;  %v5481_v57 = vld [vmem:[#allocation3 + $0x8a8] ss:$16 sps:$4 sm:$0xff]   ;;  %v5486_v58 = vld [vmem:[#allocation3 + $0x8c4] ss:$16 sps:$4 sm:$0xff]  }
 0x118   :  { %3731 = vmatprep.subr.bf16.mxu0 %v5402_v59  ;;  %4100 = vmatprep.subr.bf16.mxu1 %v5405_v60  ;;  %v5489_v59 = vld [vmem:[#allocation3 + $0x8cc] ss:$16 sps:$4 sm:$0xff]   ;;  %v5484_v60 = vld [vmem:[#allocation3 + $0x8c0] ss:$16 sps:$4 sm:$0xff]  }
 0x11b   :  { %3732 = vmatpush1.bf16.msra.mxu0 %v5400_v61  ;;  %4101 = vmatpush1.bf16.msra.mxu1 %v5403_v62  ;;  %v5487_v61 = vld [vmem:[#allocation3 + $0x8c8] ss:$16 sps:$4 sm:$0xff]   ;;  %v5492_v62 = vld [vmem:[#allocation3 + $0x8e4] ss:$16 sps:$4 sm:$0xff]  }
 0x11c   :  { %3733 = vmatprep.subr.bf16.mxu0 %v5408_v63  ;;  %4102 = vmatprep.subr.bf16.mxu1 %v5411_v0  ;;  %v5495_v63 = vld [vmem:[#allocation3 + $0x8ec] ss:$16 sps:$4 sm:$0xff]   ;;  %v5490_v0 = vld [vmem:[#allocation3 + $0x8e0] ss:$16 sps:$4 sm:$0xff]  }
 0x11f   :  { %3734 = vmatpush1.bf16.msra.mxu0 %v5406_v1  ;;  %4103 = vmatpush1.bf16.msra.mxu1 %v5409_v2  ;;  %v5493_v1 = vld [vmem:[#allocation3 + $0x8e8] ss:$16 sps:$4 sm:$0xff]   ;;  %v5498_v2 = vld [vmem:[#allocation3 + $0x904] ss:$16 sps:$4 sm:$0xff]  }
 0x120   :  { %3735 = vmatprep.subr.bf16.mxu0 %v5414_v3  ;;  %4104 = vmatprep.subr.bf16.mxu1 %v5417_v4  ;;  %v5501_v3 = vld [vmem:[#allocation3 + $0x90c] ss:$16 sps:$4 sm:$0xff]   ;;  %v5496_v4 = vld [vmem:[#allocation3 + $0x900] ss:$16 sps:$4 sm:$0xff]  }
 0x123   :  { %3736 = vmatpush1.bf16.msra.mxu0 %v5412_v5  ;;  %4105 = vmatpush1.bf16.msra.mxu1 %v5415_v6  ;;  %v5499_v5 = vld [vmem:[#allocation3 + $0x908] ss:$16 sps:$4 sm:$0xff]   ;;  %v5504_v6 = vld [vmem:[#allocation3 + $0x924] ss:$16 sps:$4 sm:$0xff]  }
 0x124   :  { %3737 = vmatprep.subr.bf16.mxu0 %v5420_v7  ;;  %4106 = vmatprep.subr.bf16.mxu1 %v5423_v8  ;;  %v5507_v7 = vld [vmem:[#allocation3 + $0x92c] ss:$16 sps:$4 sm:$0xff]   ;;  %v5502_v8 = vld [vmem:[#allocation3 + $0x920] ss:$16 sps:$4 sm:$0xff]  }
 0x127   :  { %3738 = vmatpush1.bf16.msra.mxu0 %v5418_v9  ;;  %4107 = vmatpush1.bf16.msra.mxu1 %v5421_v10  ;;  %v5505_v9 = vld [vmem:[#allocation3 + $0x928] ss:$16 sps:$4 sm:$0xff]   ;;  %v5510_v10 = vld [vmem:[#allocation3 + $0x944] ss:$16 sps:$4 sm:$0xff]  }
 0x128   :  { %3739 = vmatprep.subr.bf16.mxu0 %v5426_v11  ;;  %4108 = vmatprep.subr.bf16.mxu1 %v5429_v12  ;;  %v5513_v11 = vld [vmem:[#allocation3 + $0x94c] ss:$16 sps:$4 sm:$0xff]   ;;  %v5508_v12 = vld [vmem:[#allocation3 + $0x940] ss:$16 sps:$4 sm:$0xff]  }
 0x12b   :  { %3740 = vmatpush1.bf16.msra.mxu0 %v5424_v13  ;;  %4109 = vmatpush1.bf16.msra.mxu1 %v5427_v15  ;;  %v5511_v13 = vld [vmem:[#allocation3 + $0x948] ss:$16 sps:$4 sm:$0xff]   ;;  %v5516_v15 = vld [vmem:[#allocation3 + $0x964] ss:$16 sps:$4 sm:$0xff]  }
 0x12c   :  { %3741 = vmatprep.subr.bf16.mxu0 %v5432_v17  ;;  %4110 = vmatprep.subr.bf16.mxu1 %v5435_v18  ;;  %v5519_v17 = vld [vmem:[#allocation3 + $0x96c] ss:$16 sps:$4 sm:$0xff]   ;;  %v5514_v18 = vld [vmem:[#allocation3 + $0x960] ss:$16 sps:$4 sm:$0xff]  }
 0x12f   :  { %3742 = vmatpush1.bf16.msra.mxu0 %v5430_v19  ;;  %4111 = vmatpush1.bf16.msra.mxu1 %v5433_v20  ;;  %v5517_v19 = vld [vmem:[#allocation3 + $0x968] ss:$16 sps:$4 sm:$0xff]   ;;  %v5522_v20 = vld [vmem:[#allocation3 + $0x984] ss:$16 sps:$4 sm:$0xff]  }
 0x130   :  { %3743 = vmatprep.subr.bf16.mxu0 %v5438_v53  ;;  %4112 = vmatprep.subr.bf16.mxu1 %v5441_v21  ;;  %v5525_v53 = vld [vmem:[#allocation3 + $0x98c] ss:$16 sps:$4 sm:$0xff]   ;;  %v5520_v21 = vld [vmem:[#allocation3 + $0x980] ss:$16 sps:$4 sm:$0xff]  }
 0x133   :  { %3744 = vmatpush1.bf16.msra.mxu0 %v5436_v23  ;;  %4113 = vmatpush1.bf16.msra.mxu1 %v5439_v24  ;;  %v5523_v23 = vld [vmem:[#allocation3 + $0x988] ss:$16 sps:$4 sm:$0xff]   ;;  %v5528_v24 = vld [vmem:[#allocation3 + $0x9a4] ss:$16 sps:$4 sm:$0xff]  }
 0x134   :  { %3745 = vmatprep.subr.bf16.mxu0 %v5444_v25  ;;  %4114 = vmatprep.subr.bf16.mxu1 %v5447_v27  ;;  %v5531_v25 = vld [vmem:[#allocation3 + $0x9ac] ss:$16 sps:$4 sm:$0xff]   ;;  %v5526_v27 = vld [vmem:[#allocation3 + $0x9a0] ss:$16 sps:$4 sm:$0xff]  }
 0x137   :  { %3746 = vmatpush1.bf16.msra.mxu0 %v5442_v14  ;;  %4115 = vmatpush1.bf16.msra.mxu1 %v5445_v30  ;;  %v5529_v14 = vld [vmem:[#allocation3 + $0x9a8] ss:$16 sps:$4 sm:$0xff]   ;;  %v5534_v30 = vld [vmem:[#allocation3 + $0x9c4] ss:$16 sps:$4 sm:$0xff]  }
 0x138   :  { %3756 = vmatprep.subr.bf16.mxu0 %v5450_v31  ;;  %4125 = vmatprep.subr.bf16.mxu1 %v5453_v32  ;;  %v5537_v31 = vld [vmem:[#allocation3 + $0x9cc] ss:$16 sps:$4 sm:$0xff]   ;;  %v5532_v32 = vld [vmem:[#allocation3 + $0x9c0] ss:$16 sps:$4 sm:$0xff]  }
 0x13a   :  { %3748 = vmatmul.mubr.bf16.vlgmr.msra.gmra.mrb[0].mxu0 %v697_v16  ;;  %4117 = vmatmul.mubr.bf16.vlgmr.msra.gmra.mrb[0].mxu1 %v697_v16  ;;  %v5540_v16 = vld [vmem:[#allocation3 + $0x9e4] ss:$16 sps:$4 sm:$0xff]  }
 0x13b   :  { %3757 = vmatpush1.bf16.msra.mxu0 %v5448_v34  ;;  %4126 = vmatpush1.bf16.msra.mxu1 %v5451_v35  ;;  %v5543_v34 = vld [vmem:[#allocation3 + $0x9ec] ss:$16 sps:$4 sm:$0xff]   ;;  %v5538_v35 = vld [vmem:[#allocation3 + $0x9e0] ss:$16 sps:$4 sm:$0xff]  }
 0x13c   :  { %3758 = vmatprep.subr.bf16.mxu0 %v5456_v36  ;;  %4127 = vmatprep.subr.bf16.mxu1 %v5459_v26  ;;  %v5541_v36 = vld [vmem:[#allocation3 + $0x9e8] ss:$16 sps:$4 sm:$0xff]   ;;  %v5546_v26 = vld [vmem:[#allocation3 + $0xa04] ss:$16 sps:$4 sm:$0xff]  }
 0x13d   :  { %3788 = vmatprep.mubr.bf16.mxu0 %v6142_v37  ;;  %4157 = vmatprep.mubr.bf16.mxu1 %v6142_v37 }
 0x13f   :  { %3759 = vmatpush1.bf16.msra.mxu0 %v5454_v38  ;;  %4128 = vmatpush1.bf16.msra.mxu1 %v5457_v39  ;;  %v5549_v38 = vld [vmem:[#allocation3 + $0xa0c] ss:$16 sps:$4 sm:$0xff]   ;;  %v6148_v39 = vrot.slane %v6135_v29, %v6091_v50  ;;  %v5553_v29 = vld [vmem:[#allocation3 + $0xa28] ss:$16 sps:$4 sm:$0xff]  }
 0x140   :  { %3760 = vmatprep.subr.bf16.mxu0 %v5462_v28  ;;  %4129 = vmatprep.subr.bf16.mxu1 %v5465_v40  ;;  %v5544_v28 = vld [vmem:[#allocation3 + $0xa00] ss:$16 sps:$4 sm:$0xff]   ;;  %v5547_v40 = vld [vmem:[#allocation3 + $0xa08] ss:$16 sps:$4 sm:$0xff]  }
 0x143   :  { %3761 = vmatpush1.bf16.msra.mxu0 %v5460_v41  ;;  %4130 = vmatpush1.bf16.msra.mxu1 %v5463_v42  ;;  %v5552_v41 = vld [vmem:[#allocation3 + $0xa24] ss:$16 sps:$4 sm:$0xff]   ;;  %v5555_v42 = vld [vmem:[#allocation3 + $0xa2c] ss:$16 sps:$4 sm:$0xff]  }
 0x144   :  { %3762 = vmatprep.subr.bf16.mxu0 %v5468_v44  ;;  %4131 = vmatprep.subr.bf16.mxu1 %v5471_v45  ;;  %v747_v44 = vcombine.high %v6142_v37, %v6142_v37  ;;  %v5550_v45 = vld [vmem:[#allocation3 + $0xa20] ss:$16 sps:$4 sm:$0xff]   ;;  %v5564_v37 = vld [vmem:[#allocation3 + $0xa64] ss:$16 sps:$4 sm:$0xff]  }
 0x147   :  { %3763 = vmatpush1.bf16.msra.mxu0 %v5466_v46  ;;  %4132 = vmatpush1.bf16.msra.mxu1 %v5469_v47  ;;  %v5558_v46 = vld [vmem:[#allocation3 + $0xa44] ss:$16 sps:$4 sm:$0xff]   ;;  %v5561_v47 = vld [vmem:[#allocation3 + $0xa4c] ss:$16 sps:$4 sm:$0xff]  }
 0x148   :  { %3764 = vmatprep.subr.bf16.mxu0 %v5474_v48  ;;  %4133 = vmatprep.subr.bf16.mxu1 %v5477_v49  ;;  %v5556_v48 = vld [vmem:[#allocation3 + $0xa40] ss:$16 sps:$4 sm:$0xff]   ;;  %v5559_v49 = vld [vmem:[#allocation3 + $0xa48] ss:$16 sps:$4 sm:$0xff]  }
 0x14b   :  { %3765 = vmatpush1.bf16.msra.mxu0 %v5472_v51  ;;  %4134 = vmatpush1.bf16.msra.mxu1 %v5475_v52  ;;  %v5567_v51 = vld [vmem:[#allocation3 + $0xa6c] ss:$16 sps:$4 sm:$0xff]   ;;  %v5562_v52 = vld [vmem:[#allocation3 + $0xa60] ss:$16 sps:$4 sm:$0xff]  }
 0x14c   :  { %3766 = vmatprep.subr.bf16.mxu0 %v5480_v54  ;;  %4135 = vmatprep.subr.bf16.mxu1 %v5483_v55  ;;  %v5565_v54 = vld [vmem:[#allocation3 + $0xa68] ss:$16 sps:$4 sm:$0xff]   ;;  %v5570_v55 = vld [vmem:[#allocation3 + $0xa84] ss:$16 sps:$4 sm:$0xff]  }
 0x14f   :  { %3767 = vmatpush1.bf16.msra.mxu0 %v5478_v56  ;;  %4136 = vmatpush1.bf16.msra.mxu1 %v5481_v57  ;;  %v5573_v56 = vld [vmem:[#allocation3 + $0xa8c] ss:$16 sps:$4 sm:$0xff]   ;;  %v5568_v57 = vld [vmem:[#allocation3 + $0xa80] ss:$16 sps:$4 sm:$0xff]  }
 0x150   :  { %3768 = vmatprep.subr.bf16.mxu0 %v5486_v58  ;;  %4137 = vmatprep.subr.bf16.mxu1 %v5489_v59  ;;  %v5571_v58 = vld [vmem:[#allocation3 + $0xa88] ss:$16 sps:$4 sm:$0xff]   ;;  %v5576_v59 = vld [vmem:[#allocation3 + $0xaa4] ss:$16 sps:$4 sm:$0xff]  }
 0x153   :  { %3769 = vmatpush1.bf16.msra.mxu0 %v5484_v60  ;;  %4138 = vmatpush1.bf16.msra.mxu1 %v5487_v61  ;;  %v5579_v60 = vld [vmem:[#allocation3 + $0xaac] ss:$16 sps:$4 sm:$0xff]   ;;  %v5574_v61 = vld [vmem:[#allocation3 + $0xaa0] ss:$16 sps:$4 sm:$0xff]  }
 0x154   :  { %3770 = vmatprep.subr.bf16.mxu0 %v5492_v62  ;;  %4139 = vmatprep.subr.bf16.mxu1 %v5495_v63  ;;  %v5577_v62 = vld [vmem:[#allocation3 + $0xaa8] ss:$16 sps:$4 sm:$0xff]   ;;  %v5582_v63 = vld [vmem:[#allocation3 + $0xac4] ss:$16 sps:$4 sm:$0xff]  }
 0x157   :  { %3771 = vmatpush1.bf16.msra.mxu0 %v5490_v0  ;;  %4140 = vmatpush1.bf16.msra.mxu1 %v5493_v1  ;;  %v5585_v0 = vld [vmem:[#allocation3 + $0xacc] ss:$16 sps:$4 sm:$0xff]   ;;  %v5580_v1 = vld [vmem:[#allocation3 + $0xac0] ss:$16 sps:$4 sm:$0xff]  }
 0x158   :  { %3772 = vmatprep.subr.bf16.mxu0 %v5498_v2  ;;  %4141 = vmatprep.subr.bf16.mxu1 %v5501_v3  ;;  %v5583_v2 = vld [vmem:[#allocation3 + $0xac8] ss:$16 sps:$4 sm:$0xff]   ;;  %v5588_v3 = vld [vmem:[#allocation3 + $0xae4] ss:$16 sps:$4 sm:$0xff]  }
 0x15b   :  { %3773 = vmatpush1.bf16.msra.mxu0 %v5496_v4  ;;  %4142 = vmatpush1.bf16.msra.mxu1 %v5499_v5  ;;  %v5591_v4 = vld [vmem:[#allocation3 + $0xaec] ss:$16 sps:$4 sm:$0xff]   ;;  %v5586_v5 = vld [vmem:[#allocation3 + $0xae0] ss:$16 sps:$4 sm:$0xff]  }
 0x15c   :  { %3774 = vmatprep.subr.bf16.mxu0 %v5504_v6  ;;  %4143 = vmatprep.subr.bf16.mxu1 %v5507_v7  ;;  %v5589_v6 = vld [vmem:[#allocation3 + $0xae8] ss:$16 sps:$4 sm:$0xff]   ;;  %v5594_v7 = vld [vmem:[#allocation3 + $0xb04] ss:$16 sps:$4 sm:$0xff]  }
 0x15f   :  { %3775 = vmatpush1.bf16.msra.mxu0 %v5502_v8  ;;  %4144 = vmatpush1.bf16.msra.mxu1 %v5505_v9  ;;  %v5597_v8 = vld [vmem:[#allocation3 + $0xb0c] ss:$16 sps:$4 sm:$0xff]   ;;  %v5592_v9 = vld [vmem:[#allocation3 + $0xb00] ss:$16 sps:$4 sm:$0xff]  }
 0x160   :  { %3776 = vmatprep.subr.bf16.mxu0 %v5510_v10  ;;  %4145 = vmatprep.subr.bf16.mxu1 %v5513_v11  ;;  %v5595_v10 = vld [vmem:[#allocation3 + $0xb08] ss:$16 sps:$4 sm:$0xff]   ;;  %v5600_v11 = vld [vmem:[#allocation3 + $0xb24] ss:$16 sps:$4 sm:$0xff]  }
 0x163   :  { %3777 = vmatpush1.bf16.msra.mxu0 %v5508_v12  ;;  %4146 = vmatpush1.bf16.msra.mxu1 %v5511_v13  ;;  %v5603_v12 = vld [vmem:[#allocation3 + $0xb2c] ss:$16 sps:$4 sm:$0xff]   ;;  %v5598_v13 = vld [vmem:[#allocation3 + $0xb20] ss:$16 sps:$4 sm:$0xff]  }
 0x164   :  { %3778 = vmatprep.subr.bf16.mxu0 %v5516_v15  ;;  %4147 = vmatprep.subr.bf16.mxu1 %v5519_v17  ;;  %v5601_v15 = vld [vmem:[#allocation3 + $0xb28] ss:$16 sps:$4 sm:$0xff]   ;;  %v5606_v17 = vld [vmem:[#allocation3 + $0xb44] ss:$16 sps:$4 sm:$0xff]  }
 0x167   :  { %3779 = vmatpush1.bf16.msra.mxu0 %v5514_v18  ;;  %4148 = vmatpush1.bf16.msra.mxu1 %v5517_v19  ;;  %v5609_v18 = vld [vmem:[#allocation3 + $0xb4c] ss:$16 sps:$4 sm:$0xff]   ;;  %v5604_v19 = vld [vmem:[#allocation3 + $0xb40] ss:$16 sps:$4 sm:$0xff]  }
 0x168   :  { %3780 = vmatprep.subr.bf16.mxu0 %v5522_v20  ;;  %4149 = vmatprep.subr.bf16.mxu1 %v5525_v53  ;;  %v5607_v20 = vld [vmem:[#allocation3 + $0xb48] ss:$16 sps:$4 sm:$0xff]   ;;  %v5612_v53 = vld [vmem:[#allocation3 + $0xb64] ss:$16 sps:$4 sm:$0xff]  }
 0x16b   :  { %3781 = vmatpush1.bf16.msra.mxu0 %v5520_v21  ;;  %4150 = vmatpush1.bf16.msra.mxu1 %v5523_v23  ;;  %v5615_v21 = vld [vmem:[#allocation3 + $0xb6c] ss:$16 sps:$4 sm:$0xff]   ;;  %v5610_v23 = vld [vmem:[#allocation3 + $0xb60] ss:$16 sps:$4 sm:$0xff]  }
 0x16c   :  { %3782 = vmatprep.subr.bf16.mxu0 %v5528_v24  ;;  %4151 = vmatprep.subr.bf16.mxu1 %v5531_v25  ;;  %v5613_v24 = vld [vmem:[#allocation3 + $0xb68] ss:$16 sps:$4 sm:$0xff]   ;;  %v5618_v25 = vld [vmem:[#allocation3 + $0xb84] ss:$16 sps:$4 sm:$0xff]  }
 0x16f   :  { %3783 = vmatpush1.bf16.msra.mxu0 %v5526_v27  ;;  %4152 = vmatpush1.bf16.msra.mxu1 %v5529_v14  ;;  %v5621_v27 = vld [vmem:[#allocation3 + $0xb8c] ss:$16 sps:$4 sm:$0xff]   ;;  %v5616_v14 = vld [vmem:[#allocation3 + $0xb80] ss:$16 sps:$4 sm:$0xff]  }
 0x170   :  { %3784 = vmatprep.subr.bf16.mxu0 %v5534_v30  ;;  %4153 = vmatprep.subr.bf16.mxu1 %v5537_v31  ;;  %v5619_v30 = vld [vmem:[#allocation3 + $0xb88] ss:$16 sps:$4 sm:$0xff]   ;;  %v5624_v31 = vld [vmem:[#allocation3 + $0xba4] ss:$16 sps:$4 sm:$0xff]  }
 0x173   :  { %3785 = vmatpush1.bf16.msra.mxu0 %v5532_v32  ;;  %4154 = vmatpush1.bf16.msra.mxu1 %v5535_v33  ;;  %v5627_v32 = vld [vmem:[#allocation3 + $0xbac] ss:$16 sps:$4 sm:$0xff]   ;;  %v5622_v33 = vld [vmem:[#allocation3 + $0xba0] ss:$16 sps:$4 sm:$0xff]  }
 0x174   :  { %3786 = vmatprep.subr.bf16.mxu0 %v5540_v16  ;;  %4155 = vmatprep.subr.bf16.mxu1 %v5543_v34  ;;  %v5625_v16 = vld [vmem:[#allocation3 + $0xba8] ss:$16 sps:$4 sm:$0xff]   ;;  %v5630_v34 = vld [vmem:[#allocation3 + $0xbc4] ss:$16 sps:$4 sm:$0xff]  }
 0x177   :  { %3787 = vmatpush1.bf16.msra.mxu0 %v5538_v35  ;;  %4156 = vmatpush1.bf16.msra.mxu1 %v5541_v36  ;;  %v5633_v35 = vld [vmem:[#allocation3 + $0xbcc] ss:$16 sps:$4 sm:$0xff]   ;;  %v700_v36 = vcombine.high %v6131_v22, %v6131_v22 }
 0x178   :  { %3797 = vmatprep.subr.bf16.mxu0 %v5546_v26  ;;  %4166 = vmatprep.subr.bf16.mxu1 %v5549_v38  ;;  %v5628_v26 = vld [vmem:[#allocation3 + $0xbc0] ss:$16 sps:$4 sm:$0xff]   ;;  %v5631_v38 = vld [vmem:[#allocation3 + $0xbc8] ss:$16 sps:$4 sm:$0xff]  }
 0x17a   :  { %3789 = vmatmul.mubr.bf16.vlgmr.msra.gmra.mrb[0].mxu0 %v6148_v39  ;;  %4158 = vmatmul.mubr.bf16.vlgmr.msra.gmra.mrb[0].mxu1 %v6148_v39 }
 0x17b   :  { %3798 = vmatpush1.bf16.msra.mxu0 %v5544_v28  ;;  %4167 = vmatpush1.bf16.msra.mxu1 %v5547_v40  ;;  %v5636_v28 = vld [vmem:[#allocation3 + $0xbe4] ss:$16 sps:$4 sm:$0xff]   ;;  %v5639_v40 = vld [vmem:[#allocation3 + $0xbec] ss:$16 sps:$4 sm:$0xff]  }
 0x17c   :  { %3799 = vmatprep.subr.bf16.mxu0 %v5552_v41  ;;  %4168 = vmatprep.subr.bf16.mxu1 %v5555_v42  ;;  %v6157_v41 = vrot.slane %v700_v36, %v6091_v50  ;;  %v5634_v42 = vld [vmem:[#allocation3 + $0xbe0] ss:$16 sps:$4 sm:$0xff]   ;;  %v5715_v36 = vld [vmem:[#allocation3 + $0xd88] ss:$16 sps:$4 sm:$0xff]  }
 0x17d   :  { %3829 = vmatprep.mubr.bf16.mxu0 %v747_v44  ;;  %4198 = vmatprep.mubr.bf16.mxu1 %v747_v44  ;;  %v5637_v44 = vld [vmem:[#allocation3 + $0xbe8] ss:$16 sps:$4 sm:$0xff]  }
 0x17e   :  { %v716_v22 = vcombine.high %v6157_v41, %v6157_v41 }
 0x17f   :  { %3800 = vmatpush1.bf16.msra.mxu0 %v5550_v45  ;;  %4169 = vmatpush1.bf16.msra.mxu1 %v5553_v29  ;;  %v5642_v45 = vld [vmem:[#allocation3 + $0xc04] ss:$16 sps:$4 sm:$0xff]   ;;  %v5645_v29 = vld [vmem:[#allocation3 + $0xc0c] ss:$16 sps:$4 sm:$0xff]  }
 0x180   :  { %3801 = vmatprep.subr.bf16.mxu0 %v5558_v46  ;;  %4170 = vmatprep.subr.bf16.mxu1 %v5561_v47  ;;  %v745_v46 = vcombine.high %v6148_v39, %v6148_v39  ;;  %v5640_v47 = vld [vmem:[#allocation3 + $0xc00] ss:$16 sps:$4 sm:$0xff]   ;;  %v5654_v39 = vld [vmem:[#allocation3 + $0xc44] ss:$16 sps:$4 sm:$0xff]  }
 0x183   :  { %3802 = vmatpush1.bf16.msra.mxu0 %v5556_v48  ;;  %4171 = vmatpush1.bf16.msra.mxu1 %v5559_v49  ;;  %v5643_v48 = vld [vmem:[#allocation3 + $0xc08] ss:$16 sps:$4 sm:$0xff]   ;;  %v5648_v49 = vld [vmem:[#allocation3 + $0xc24] ss:$16 sps:$4 sm:$0xff]  }
 0x184   :  { %3803 = vmatprep.subr.bf16.mxu0 %v5564_v37  ;;  %4172 = vmatprep.subr.bf16.mxu1 %v5567_v51  ;;  %v5651_v37 = vld [vmem:[#allocation3 + $0xc2c] ss:$16 sps:$4 sm:$0xff]   ;;  %v6164_v51 = vrot.slane %v716_v22, %v6091_v50  ;;  %v5732_v22 = vld [vmem:[#allocation3 + $0xde4] ss:$16 sps:$4 sm:$0xff]  }
 0x187   :  { %3804 = vmatpush1.bf16.msra.mxu0 %v5562_v52  ;;  %4173 = vmatpush1.bf16.msra.mxu1 %v5565_v54  ;;  %v5646_v52 = vld [vmem:[#allocation3 + $0xc20] ss:$16 sps:$4 sm:$0xff]   ;;  %v5649_v54 = vld [vmem:[#allocation3 + $0xc28] ss:$16 sps:$4 sm:$0xff]  }
 0x188   :  { %3805 = vmatprep.subr.bf16.mxu0 %v5570_v55  ;;  %4174 = vmatprep.subr.bf16.mxu1 %v5573_v56  ;;  %v5657_v55 = vld [vmem:[#allocation3 + $0xc4c] ss:$16 sps:$4 sm:$0xff]   ;;  %v5652_v56 = vld [vmem:[#allocation3 + $0xc40] ss:$16 sps:$4 sm:$0xff]  }
 0x18b   :  { %3806 = vmatpush1.bf16.msra.mxu0 %v5568_v57  ;;  %4175 = vmatpush1.bf16.msra.mxu1 %v5571_v58  ;;  %v5655_v57 = vld [vmem:[#allocation3 + $0xc48] ss:$16 sps:$4 sm:$0xff]   ;;  %v5660_v58 = vld [vmem:[#allocation3 + $0xc64] ss:$16 sps:$4 sm:$0xff]  }
 0x18c   :  { %3807 = vmatprep.subr.bf16.mxu0 %v5576_v59  ;;  %4176 = vmatprep.subr.bf16.mxu1 %v5579_v60  ;;  %v5663_v59 = vld [vmem:[#allocation3 + $0xc6c] ss:$16 sps:$4 sm:$0xff]   ;;  %v5658_v60 = vld [vmem:[#allocation3 + $0xc60] ss:$16 sps:$4 sm:$0xff]  }
 0x18f   :  { %3808 = vmatpush1.bf16.msra.mxu0 %v5574_v61  ;;  %4177 = vmatpush1.bf16.msra.mxu1 %v5577_v62  ;;  %v5661_v61 = vld [vmem:[#allocation3 + $0xc68] ss:$16 sps:$4 sm:$0xff]   ;;  %v5666_v62 = vld [vmem:[#allocation3 + $0xc84] ss:$16 sps:$4 sm:$0xff]  }
 0x190   :  { %3809 = vmatprep.subr.bf16.mxu0 %v5582_v63  ;;  %4178 = vmatprep.subr.bf16.mxu1 %v5585_v0  ;;  %v5669_v63 = vld [vmem:[#allocation3 + $0xc8c] ss:$16 sps:$4 sm:$0xff]   ;;  %v5664_v0 = vld [vmem:[#allocation3 + $0xc80] ss:$16 sps:$4 sm:$0xff]  }
 0x193   :  { %3810 = vmatpush1.bf16.msra.mxu0 %v5580_v1  ;;  %4179 = vmatpush1.bf16.msra.mxu1 %v5583_v2  ;;  %v5667_v1 = vld [vmem:[#allocation3 + $0xc88] ss:$16 sps:$4 sm:$0xff]   ;;  %v5672_v2 = vld [vmem:[#allocation3 + $0xca4] ss:$16 sps:$4 sm:$0xff]  }
 0x194   :  { %3811 = vmatprep.subr.bf16.mxu0 %v5588_v3  ;;  %4180 = vmatprep.subr.bf16.mxu1 %v5591_v4  ;;  %v5675_v3 = vld [vmem:[#allocation3 + $0xcac] ss:$16 sps:$4 sm:$0xff]   ;;  %v5670_v4 = vld [vmem:[#allocation3 + $0xca0] ss:$16 sps:$4 sm:$0xff]  }
 0x197   :  { %3812 = vmatpush1.bf16.msra.mxu0 %v5586_v5  ;;  %4181 = vmatpush1.bf16.msra.mxu1 %v5589_v6  ;;  %v5673_v5 = vld [vmem:[#allocation3 + $0xca8] ss:$16 sps:$4 sm:$0xff]   ;;  %v5678_v6 = vld [vmem:[#allocation3 + $0xcc4] ss:$16 sps:$4 sm:$0xff]  }
 0x198   :  { %3813 = vmatprep.subr.bf16.mxu0 %v5594_v7  ;;  %4182 = vmatprep.subr.bf16.mxu1 %v5597_v8  ;;  %v5681_v7 = vld [vmem:[#allocation3 + $0xccc] ss:$16 sps:$4 sm:$0xff]   ;;  %v5676_v8 = vld [vmem:[#allocation3 + $0xcc0] ss:$16 sps:$4 sm:$0xff]  }
 0x19b   :  { %3814 = vmatpush1.bf16.msra.mxu0 %v5592_v9  ;;  %4183 = vmatpush1.bf16.msra.mxu1 %v5595_v10  ;;  %v5679_v9 = vld [vmem:[#allocation3 + $0xcc8] ss:$16 sps:$4 sm:$0xff]   ;;  %v5684_v10 = vld [vmem:[#allocation3 + $0xce4] ss:$16 sps:$4 sm:$0xff]  }
 0x19c   :  { %3815 = vmatprep.subr.bf16.mxu0 %v5600_v11  ;;  %4184 = vmatprep.subr.bf16.mxu1 %v5603_v12  ;;  %v5687_v11 = vld [vmem:[#allocation3 + $0xcec] ss:$16 sps:$4 sm:$0xff]   ;;  %v5682_v12 = vld [vmem:[#allocation3 + $0xce0] ss:$16 sps:$4 sm:$0xff]  }
 0x19f   :  { %3816 = vmatpush1.bf16.msra.mxu0 %v5598_v13  ;;  %4185 = vmatpush1.bf16.msra.mxu1 %v5601_v15  ;;  %v5685_v13 = vld [vmem:[#allocation3 + $0xce8] ss:$16 sps:$4 sm:$0xff]   ;;  %v5690_v15 = vld [vmem:[#allocation3 + $0xd04] ss:$16 sps:$4 sm:$0xff]  }
 0x1a0   :  { %3817 = vmatprep.subr.bf16.mxu0 %v5606_v17  ;;  %4186 = vmatprep.subr.bf16.mxu1 %v5609_v18  ;;  %v5693_v17 = vld [vmem:[#allocation3 + $0xd0c] ss:$16 sps:$4 sm:$0xff]   ;;  %v5688_v18 = vld [vmem:[#allocation3 + $0xd00] ss:$16 sps:$4 sm:$0xff]  }
 0x1a3   :  { %3818 = vmatpush1.bf16.msra.mxu0 %v5604_v19  ;;  %4187 = vmatpush1.bf16.msra.mxu1 %v5607_v20  ;;  %v5691_v19 = vld [vmem:[#allocation3 + $0xd08] ss:$16 sps:$4 sm:$0xff]   ;;  %v5696_v20 = vld [vmem:[#allocation3 + $0xd24] ss:$16 sps:$4 sm:$0xff]  }
 0x1a4   :  { %3819 = vmatprep.subr.bf16.mxu0 %v5612_v53  ;;  %4188 = vmatprep.subr.bf16.mxu1 %v5615_v21  ;;  %v5699_v53 = vld [vmem:[#allocation3 + $0xd2c] ss:$16 sps:$4 sm:$0xff]   ;;  %v5694_v21 = vld [vmem:[#allocation3 + $0xd20] ss:$16 sps:$4 sm:$0xff]  }
 0x1a7   :  { %3820 = vmatpush1.bf16.msra.mxu0 %v5610_v23  ;;  %4189 = vmatpush1.bf16.msra.mxu1 %v5613_v24  ;;  %v5697_v23 = vld [vmem:[#allocation3 + $0xd28] ss:$16 sps:$4 sm:$0xff]   ;;  %v5702_v24 = vld [vmem:[#allocation3 + $0xd44] ss:$16 sps:$4 sm:$0xff]  }
 0x1a8   :  { %3821 = vmatprep.subr.bf16.mxu0 %v5618_v25  ;;  %4190 = vmatprep.subr.bf16.mxu1 %v5621_v27  ;;  %v5705_v25 = vld [vmem:[#allocation3 + $0xd4c] ss:$16 sps:$4 sm:$0xff]   ;;  %v5700_v27 = vld [vmem:[#allocation3 + $0xd40] ss:$16 sps:$4 sm:$0xff]  }
 0x1ab   :  { %3822 = vmatpush1.bf16.msra.mxu0 %v5616_v14  ;;  %4191 = vmatpush1.bf16.msra.mxu1 %v5619_v30  ;;  %v5703_v14 = vld [vmem:[#allocation3 + $0xd48] ss:$16 sps:$4 sm:$0xff]   ;;  %v5708_v30 = vld [vmem:[#allocation3 + $0xd64] ss:$16 sps:$4 sm:$0xff]  }
 0x1ac   :  { %3823 = vmatprep.subr.bf16.mxu0 %v5624_v31  ;;  %4192 = vmatprep.subr.bf16.mxu1 %v5627_v32  ;;  %v5711_v31 = vld [vmem:[#allocation3 + $0xd6c] ss:$16 sps:$4 sm:$0xff]   ;;  %v5706_v32 = vld [vmem:[#allocation3 + $0xd60] ss:$16 sps:$4 sm:$0xff]  }
 0x1af   :  { %3824 = vmatpush1.bf16.msra.mxu0 %v5622_v33  ;;  %4193 = vmatpush1.bf16.msra.mxu1 %v5625_v16  ;;  %v5709_v33 = vld [vmem:[#allocation3 + $0xd68] ss:$16 sps:$4 sm:$0xff]   ;;  %v5714_v16 = vld [vmem:[#allocation3 + $0xd84] ss:$16 sps:$4 sm:$0xff]  }
 0x1b0   :  { %3825 = vmatprep.subr.bf16.mxu0 %v5630_v34  ;;  %4194 = vmatprep.subr.bf16.mxu1 %v5633_v35  ;;  %v5717_v34 = vld [vmem:[#allocation3 + $0xd8c] ss:$16 sps:$4 sm:$0xff]   ;;  %v5712_v35 = vld [vmem:[#allocation3 + $0xd80] ss:$16 sps:$4 sm:$0xff]  }
 0x1b3   :  { %3826 = vmatpush1.bf16.msra.mxu0 %v5628_v26  ;;  %4195 = vmatpush1.bf16.msra.mxu1 %v5631_v38  ;;  %v5720_v26 = vld [vmem:[#allocation3 + $0xda4] ss:$16 sps:$4 sm:$0xff]   ;;  %v5723_v38 = vld [vmem:[#allocation3 + $0xdac] ss:$16 sps:$4 sm:$0xff]  }
 0x1b4   :  { %3827 = vmatprep.subr.bf16.mxu0 %v5636_v28  ;;  %4196 = vmatprep.subr.bf16.mxu1 %v5639_v40  ;;  %v5718_v28 = vld [vmem:[#allocation3 + $0xda0] ss:$16 sps:$4 sm:$0xff]   ;;  %v5721_v40 = vld [vmem:[#allocation3 + $0xda8] ss:$16 sps:$4 sm:$0xff]  }
 0x1b7   :  { %3828 = vmatpush1.bf16.msra.mxu0 %v5634_v42  ;;  %4197 = vmatpush1.bf16.msra.mxu1 %v5637_v44  ;;  %v5726_v42 = vld [vmem:[#allocation3 + $0xdc4] ss:$16 sps:$4 sm:$0xff]   ;;  %v5729_v44 = vld [vmem:[#allocation3 + $0xdcc] ss:$16 sps:$4 sm:$0xff]  }
 0x1b8   :  { %3838 = vmatprep.subr.bf16.mxu0 %v5642_v45  ;;  %4207 = vmatprep.subr.bf16.mxu1 %v5645_v29  ;;  %v5724_v45 = vld [vmem:[#allocation3 + $0xdc0] ss:$16 sps:$4 sm:$0xff]   ;;  %v5727_v29 = vld [vmem:[#allocation3 + $0xdc8] ss:$16 sps:$4 sm:$0xff]  }
 0x1ba   :  { %3830 = vmatmul.mubr.bf16.vlgmr.msra.gmra.mrb[0].mxu0 %v745_v46  ;;  %4199 = vmatmul.mubr.bf16.vlgmr.msra.gmra.mrb[0].mxu1 %v745_v46  ;;  %v5735_v46 = vld [vmem:[#allocation3 + $0xdec] ss:$16 sps:$4 sm:$0xff]  }
 0x1bb   :  { %3839 = vmatpush1.bf16.msra.mxu0 %v5640_v47  ;;  %4208 = vmatpush1.bf16.msra.mxu1 %v5643_v48  ;;  %v5730_v47 = vld [vmem:[#allocation3 + $0xde0] ss:$16 sps:$4 sm:$0xff]   ;;  %v5733_v48 = vld [vmem:[#allocation3 + $0xde8] ss:$16 sps:$4 sm:$0xff]  }
 0x1bc   :  { %3840 = vmatprep.subr.bf16.mxu0 %v5648_v49  ;;  %4209 = vmatprep.subr.bf16.mxu1 %v5651_v37  ;;  %v5739_v49 = vld [vmem:[#allocation3 + $0xe04] ss:$16 sps:$4 sm:$0xff]   ;;  %v5742_v37 = vld [vmem:[#allocation3 + $0xe0c] ss:$16 sps:$4 sm:$0xff]  }
 0x1bd   :  { %3870 = vmatprep.mubr.bf16.mxu0 %v6164_v51  ;;  %4239 = vmatprep.mubr.bf16.mxu1 %v6164_v51 }
 0x1bf   :  { %3841 = vmatpush1.bf16.msra.mxu0 %v5646_v52  ;;  %4210 = vmatpush1.bf16.msra.mxu1 %v5649_v54  ;;  %v6170_v52 = vrot.slane %v6157_v41, %v6091_v50  ;;  %v5737_v54 = vld [vmem:[#allocation3 + $0xe00] ss:$16 sps:$4 sm:$0xff]   ;;  %v5746_v41 = vld [vmem:[#allocation3 + $0xe28] ss:$16 sps:$4 sm:$0xff]  }
 0x1c0   :  { %3842 = vmatprep.subr.bf16.mxu0 %v5654_v39  ;;  %4211 = vmatprep.subr.bf16.mxu1 %v5657_v55  ;;  %v5740_v39 = vld [vmem:[#allocation3 + $0xe08] ss:$16 sps:$4 sm:$0xff]   ;;  %v5745_v55 = vld [vmem:[#allocation3 + $0xe24] ss:$16 sps:$4 sm:$0xff]  }
 0x1c3   :  { %3843 = vmatpush1.bf16.msra.mxu0 %v5652_v56  ;;  %4212 = vmatpush1.bf16.msra.mxu1 %v5655_v57  ;;  %v5748_v56 = vld [vmem:[#allocation3 + $0xe2c] ss:$16 sps:$4 sm:$0xff]   ;;  %v748_v57 = vcombine.high %v6164_v51, %v6164_v51  ;;  %v5757_v51 = vld [vmem:[#allocation3 + $0xe64] ss:$16 sps:$4 sm:$0xff]  }
 0x1c4   :  { %3844 = vmatprep.subr.bf16.mxu0 %v5660_v58  ;;  %4213 = vmatprep.subr.bf16.mxu1 %v5663_v59  ;;  %v5743_v58 = vld [vmem:[#allocation3 + $0xe20] ss:$16 sps:$4 sm:$0xff]   ;;  %v5751_v59 = vld [vmem:[#allocation3 + $0xe44] ss:$16 sps:$4 sm:$0xff]  }
 0x1c7   :  { %3845 = vmatpush1.bf16.msra.mxu0 %v5658_v60  ;;  %4214 = vmatpush1.bf16.msra.mxu1 %v5661_v61  ;;  %v5754_v60 = vld [vmem:[#allocation3 + $0xe4c] ss:$16 sps:$4 sm:$0xff]   ;;  %v5749_v61 = vld [vmem:[#allocation3 + $0xe40] ss:$16 sps:$4 sm:$0xff]  }
 0x1c8   :  { %3846 = vmatprep.subr.bf16.mxu0 %v5666_v62  ;;  %4215 = vmatprep.subr.bf16.mxu1 %v5669_v63  ;;  %v5752_v62 = vld [vmem:[#allocation3 + $0xe48] ss:$16 sps:$4 sm:$0xff]   ;;  %v5760_v63 = vld [vmem:[#allocation3 + $0xe6c] ss:$16 sps:$4 sm:$0xff]  }
 0x1cb   :  { %3847 = vmatpush1.bf16.msra.mxu0 %v5664_v0  ;;  %4216 = vmatpush1.bf16.msra.mxu1 %v5667_v1  ;;  %v5755_v0 = vld [vmem:[#allocation3 + $0xe60] ss:$16 sps:$4 sm:$0xff]   ;;  %v5758_v1 = vld [vmem:[#allocation3 + $0xe68] ss:$16 sps:$4 sm:$0xff]  }
 0x1cc   :  { %3848 = vmatprep.subr.bf16.mxu0 %v5672_v2  ;;  %4217 = vmatprep.subr.bf16.mxu1 %v5675_v3  ;;  %v5763_v2 = vld [vmem:[#allocation3 + $0xe84] ss:$16 sps:$4 sm:$0xff]   ;;  %v5766_v3 = vld [vmem:[#allocation3 + $0xe8c] ss:$16 sps:$4 sm:$0xff]  }
 0x1cf   :  { %3849 = vmatpush1.bf16.msra.mxu0 %v5670_v4  ;;  %4218 = vmatpush1.bf16.msra.mxu1 %v5673_v5  ;;  %v5761_v4 = vld [vmem:[#allocation3 + $0xe80] ss:$16 sps:$4 sm:$0xff]   ;;  %v5764_v5 = vld [vmem:[#allocation3 + $0xe88] ss:$16 sps:$4 sm:$0xff]  }
 0x1d0   :  { %3850 = vmatprep.subr.bf16.mxu0 %v5678_v6  ;;  %4219 = vmatprep.subr.bf16.mxu1 %v5681_v7  ;;  %v5769_v6 = vld [vmem:[#allocation3 + $0xea4] ss:$16 sps:$4 sm:$0xff]   ;;  %v5772_v7 = vld [vmem:[#allocation3 + $0xeac] ss:$16 sps:$4 sm:$0xff]  }
 0x1d3   :  { %3851 = vmatpush1.bf16.msra.mxu0 %v5676_v8  ;;  %4220 = vmatpush1.bf16.msra.mxu1 %v5679_v9  ;;  %v5767_v8 = vld [vmem:[#allocation3 + $0xea0] ss:$16 sps:$4 sm:$0xff]   ;;  %v5770_v9 = vld [vmem:[#allocation3 + $0xea8] ss:$16 sps:$4 sm:$0xff]  }
 0x1d4   :  { %3852 = vmatprep.subr.bf16.mxu0 %v5684_v10  ;;  %4221 = vmatprep.subr.bf16.mxu1 %v5687_v11  ;;  %v5775_v10 = vld [vmem:[#allocation3 + $0xec4] ss:$16 sps:$4 sm:$0xff]   ;;  %v5778_v11 = vld [vmem:[#allocation3 + $0xecc] ss:$16 sps:$4 sm:$0xff]  }
 0x1d7   :  { %3853 = vmatpush1.bf16.msra.mxu0 %v5682_v12  ;;  %4222 = vmatpush1.bf16.msra.mxu1 %v5685_v13  ;;  %v5773_v12 = vld [vmem:[#allocation3 + $0xec0] ss:$16 sps:$4 sm:$0xff]   ;;  %v5776_v13 = vld [vmem:[#allocation3 + $0xec8] ss:$16 sps:$4 sm:$0xff]  }
 0x1d8   :  { %3854 = vmatprep.subr.bf16.mxu0 %v5690_v15  ;;  %4223 = vmatprep.subr.bf16.mxu1 %v5693_v17  ;;  %v5781_v15 = vld [vmem:[#allocation3 + $0xee4] ss:$16 sps:$4 sm:$0xff]   ;;  %v5784_v17 = vld [vmem:[#allocation3 + $0xeec] ss:$16 sps:$4 sm:$0xff]  }
 0x1db   :  { %3855 = vmatpush1.bf16.msra.mxu0 %v5688_v18  ;;  %4224 = vmatpush1.bf16.msra.mxu1 %v5691_v19  ;;  %v5779_v18 = vld [vmem:[#allocation3 + $0xee0] ss:$16 sps:$4 sm:$0xff]   ;;  %v5782_v19 = vld [vmem:[#allocation3 + $0xee8] ss:$16 sps:$4 sm:$0xff]  }
 0x1dc   :  { %3856 = vmatprep.subr.bf16.mxu0 %v5696_v20  ;;  %4225 = vmatprep.subr.bf16.mxu1 %v5699_v53  ;;  %v5787_v20 = vld [vmem:[#allocation3 + $0xf04] ss:$16 sps:$4 sm:$0xff]   ;;  %v5790_v53 = vld [vmem:[#allocation3 + $0xf0c] ss:$16 sps:$4 sm:$0xff]  }
 0x1df   :  { %3857 = vmatpush1.bf16.msra.mxu0 %v5694_v21  ;;  %4226 = vmatpush1.bf16.msra.mxu1 %v5697_v23  ;;  %v5785_v21 = vld [vmem:[#allocation3 + $0xf00] ss:$16 sps:$4 sm:$0xff]   ;;  %v5788_v23 = vld [vmem:[#allocation3 + $0xf08] ss:$16 sps:$4 sm:$0xff]  }
 0x1e0   :  { %3858 = vmatprep.subr.bf16.mxu0 %v5702_v24  ;;  %4227 = vmatprep.subr.bf16.mxu1 %v5705_v25  ;;  %v5793_v24 = vld [vmem:[#allocation3 + $0xf24] ss:$16 sps:$4 sm:$0xff]   ;;  %v5796_v25 = vld [vmem:[#allocation3 + $0xf2c] ss:$16 sps:$4 sm:$0xff]  }
 0x1e3   :  { %3859 = vmatpush1.bf16.msra.mxu0 %v5700_v27  ;;  %4228 = vmatpush1.bf16.msra.mxu1 %v5703_v14  ;;  %v5791_v27 = vld [vmem:[#allocation3 + $0xf20] ss:$16 sps:$4 sm:$0xff]   ;;  %v5794_v14 = vld [vmem:[#allocation3 + $0xf28] ss:$16 sps:$4 sm:$0xff]  }
 0x1e4   :  { %3860 = vmatprep.subr.bf16.mxu0 %v5708_v30  ;;  %4229 = vmatprep.subr.bf16.mxu1 %v5711_v31  ;;  %v5799_v30 = vld [vmem:[#allocation3 + $0xf44] ss:$16 sps:$4 sm:$0xff]   ;;  %v5802_v31 = vld [vmem:[#allocation3 + $0xf4c] ss:$16 sps:$4 sm:$0xff]  }
 0x1e7   :  { %3861 = vmatpush1.bf16.msra.mxu0 %v5706_v32  ;;  %4230 = vmatpush1.bf16.msra.mxu1 %v5709_v33  ;;  %v5797_v32 = vld [vmem:[#allocation3 + $0xf40] ss:$16 sps:$4 sm:$0xff]   ;;  %v5800_v33 = vld [vmem:[#allocation3 + $0xf48] ss:$16 sps:$4 sm:$0xff]  }
 0x1e8   :  { %3862 = vmatprep.subr.bf16.mxu0 %v5714_v16  ;;  %4231 = vmatprep.subr.bf16.mxu1 %v5717_v34  ;;  %v5805_v16 = vld [vmem:[#allocation3 + $0xf64] ss:$16 sps:$4 sm:$0xff]   ;;  %v5808_v34 = vld [vmem:[#allocation3 + $0xf6c] ss:$16 sps:$4 sm:$0xff]  }
 0x1eb   :  { %3863 = vmatpush1.bf16.msra.mxu0 %v5712_v35  ;;  %4232 = vmatpush1.bf16.msra.mxu1 %v5715_v36  ;;  %v5803_v35 = vld [vmem:[#allocation3 + $0xf60] ss:$16 sps:$4 sm:$0xff]   ;;  %v5806_v36 = vld [vmem:[#allocation3 + $0xf68] ss:$16 sps:$4 sm:$0xff]  }
 0x1ec   :  { %3864 = vmatprep.subr.bf16.mxu0 %v5720_v26  ;;  %4233 = vmatprep.subr.bf16.mxu1 %v5723_v38  ;;  %v5811_v26 = vld [vmem:[#allocation3 + $0xf84] ss:$16 sps:$4 sm:$0xff]   ;;  %v5814_v38 = vld [vmem:[#allocation3 + $0xf8c] ss:$16 sps:$4 sm:$0xff]  }
 0x1ef   :  { %3865 = vmatpush1.bf16.msra.mxu0 %v5718_v28  ;;  %4234 = vmatpush1.bf16.msra.mxu1 %v5721_v40  ;;  %v5809_v28 = vld [vmem:[#allocation3 + $0xf80] ss:$16 sps:$4 sm:$0xff]   ;;  %v5812_v40 = vld [vmem:[#allocation3 + $0xf88] ss:$16 sps:$4 sm:$0xff]  }
 0x1f0   :  { %3866 = vmatprep.subr.bf16.mxu0 %v5726_v42  ;;  %4235 = vmatprep.subr.bf16.mxu1 %v5729_v44  ;;  %v5817_v42 = vld [vmem:[#allocation3 + $0xfa4] ss:$16 sps:$4 sm:$0xff]   ;;  %v5820_v44 = vld [vmem:[#allocation3 + $0xfac] ss:$16 sps:$4 sm:$0xff]  }
 0x1f3   :  { %3867 = vmatpush1.bf16.msra.mxu0 %v5724_v45  ;;  %4236 = vmatpush1.bf16.msra.mxu1 %v5727_v29  ;;  %v5815_v45 = vld [vmem:[#allocation3 + $0xfa0] ss:$16 sps:$4 sm:$0xff]   ;;  %v5818_v29 = vld [vmem:[#allocation3 + $0xfa8] ss:$16 sps:$4 sm:$0xff]  }
 0x1f4   :  { %3868 = vmatprep.subr.bf16.mxu0 %v5732_v22  ;;  %4237 = vmatprep.subr.bf16.mxu1 %v5735_v46  ;;  %v5823_v22 = vld [vmem:[#allocation3 + $0xfc4] ss:$16 sps:$4 sm:$0xff]   ;;  %v5826_v46 = vld [vmem:[#allocation3 + $0xfcc] ss:$16 sps:$4 sm:$0xff]  }
 0x1f7   :  { %3869 = vmatpush1.bf16.msra.mxu0 %v5730_v47  ;;  %4238 = vmatpush1.bf16.msra.mxu1 %v5733_v48  ;;  %v5821_v47 = vld [vmem:[#allocation3 + $0xfc0] ss:$16 sps:$4 sm:$0xff]   ;;  %v5824_v48 = vld [vmem:[#allocation3 + $0xfc8] ss:$16 sps:$4 sm:$0xff]  }
 0x1f8   :  { %3879 = vmatprep.subr.bf16.mxu0 %v5739_v49  ;;  %4248 = vmatprep.subr.bf16.mxu1 %v5742_v37  ;;  %v5829_v49 = vld [vmem:[#allocation3 + $0xfe4] ss:$16 sps:$4 sm:$0xff]   ;;  %v5832_v37 = vld [vmem:[#allocation3 + $0xfec] ss:$16 sps:$4 sm:$0xff]  }
 0x1fa   :  { %3871 = vmatmul.mubr.bf16.vlgmr.msra.gmra.mrb[0].mxu0 %v6170_v52  ;;  %4240 = vmatmul.mubr.bf16.vlgmr.msra.gmra.mrb[0].mxu1 %v6170_v52 }
 0x1fb   :  { %3880 = vmatpush1.bf16.msra.mxu0 %v5737_v54  ;;  %4249 = vmatpush1.bf16.msra.mxu1 %v5740_v39  ;;  %v6179_v54 = vld.sshfl [vmem:[%s6208_s0 + $0x10] sm:$0x11 pattern:$0x75316420]  ;;  %s6006_s0 = smov [#allocation9]  }
 0x1fc   :  { %3881 = vmatprep.subr.bf16.mxu0 %v5745_v55  ;;  %4250 = vmatprep.subr.bf16.mxu1 %v5748_v56  ;;  %v5827_v39 = vld [vmem:[#allocation3 + $0xfe0] ss:$16 sps:$4 sm:$0xff]   ;;  %v5830_v55 = vld [vmem:[#allocation3 + $0xfe8] ss:$16 sps:$4 sm:$0xff]   ;;  %v5835_v56 = vld [vmem:[#allocation3 + $0x1004] ss:$16 sps:$4 sm:$0xff]  }
 0x1fd   :  { %3911 = vmatprep.mubr.bf16.mxu0 %v748_v57  ;;  %4280 = vmatprep.mubr.bf16.mxu1 %v748_v57  ;;  %v5838_v57 = vld [vmem:[#allocation3 + $0x100c] ss:$16 sps:$4 sm:$0xff]   ;;  %s4409_s14 = sshll.u32 %s6006_s0, 4  ;;  %s4410_s14 = int_to_ptr.vmem [resolvable:$true] %s4409_s14 }
 0x1fe   :  { %s5971_s15 = scalar_lea.vmem %s4410_s14, 128  ;;  %p5976_p11 = scmp.lt.s32.totalorder %s4410_s14, %s4410_s14 }
 0x1ff   :  { %3882 = vmatpush1.bf16.msra.mxu0 %v5743_v58  ;;  %4251 = vmatpush1.bf16.msra.mxu1 %v5746_v41  ;;  %v756_v58 = vcombine.high %v6179_v54, %v6179_v54  ;;  %v746_v41 = vcombine.high %v6170_v52, %v6170_v52  ;;  %v5847_v52 = vld [vmem:[#allocation3 + $0x1044] ss:$16 sps:$4 sm:$0xff]   ;;  %p5972_p10 = scmp.ne.s32.totalorder %s4410_s14, %s5971_s15  ;;  %p5977_p12 = scmp.lt.s32.totalorder %s5971_s15, %s5971_s15 }
 0x200   :  { %3883 = vmatprep.subr.bf16.mxu0 %v5751_v59  ;;  %4252 = vmatprep.subr.bf16.mxu1 %v5754_v60  ;;  %v5833_v59 = vld [vmem:[#allocation3 + $0x1000] ss:$16 sps:$4 sm:$0xff]   ;;  %v5836_v60 = vld [vmem:[#allocation3 + $0x1008] ss:$16 sps:$4 sm:$0xff]  }
 0x201   :  { %p5978_p13 = por %p5977_p12, %p5976_p11 }
 0x203   :  { %3884 = vmatpush1.bf16.msra.mxu0 %v5749_v61  ;;  %4253 = vmatpush1.bf16.msra.mxu1 %v5752_v62  ;;  %v5841_v61 = vld [vmem:[#allocation3 + $0x1024] ss:$16 sps:$4 sm:$0xff]   ;;  %v5844_v62 = vld [vmem:[#allocation3 + $0x102c] ss:$16 sps:$4 sm:$0xff]   ;;  %p5979_p0 = pnand %p5978_p13, %p5972_p10 }
 0x204   :  { %3885 = vmatprep.subr.bf16.mxu0 %v5757_v51  ;;  %4254 = vmatprep.subr.bf16.mxu1 %v5760_v63  ;;  %v770_v51 = vrot.slane %v756_v58, %v6091_v50  ;;  %v5839_v63 = vld [vmem:[#allocation3 + $0x1020] ss:$16 sps:$4 sm:$0xff]  }
 0x207   :  { %3886 = vmatpush1.bf16.msra.mxu0 %v5755_v0  ;;  %4255 = vmatpush1.bf16.msra.mxu1 %v5758_v1  ;;  %v5842_v0 = vld [vmem:[#allocation3 + $0x1028] ss:$16 sps:$4 sm:$0xff]   ;;  %v5850_v1 = vld [vmem:[#allocation3 + $0x104c] ss:$16 sps:$4 sm:$0xff]  }
 0x208   :  { %3887 = vmatprep.subr.bf16.mxu0 %v5763_v2  ;;  %4256 = vmatprep.subr.bf16.mxu1 %v5766_v3  ;;  %v5845_v2 = vld [vmem:[#allocation3 + $0x1040] ss:$16 sps:$4 sm:$0xff]   ;;  %v5848_v3 = vld [vmem:[#allocation3 + $0x1048] ss:$16 sps:$4 sm:$0xff]  }
 0x20b   :  { %3888 = vmatpush1.bf16.msra.mxu0 %v5761_v4  ;;  %4257 = vmatpush1.bf16.msra.mxu1 %v5764_v5  ;;  %v5853_v4 = vld [vmem:[#allocation3 + $0x1064] ss:$16 sps:$4 sm:$0xff]   ;;  %v5856_v5 = vld [vmem:[#allocation3 + $0x106c] ss:$16 sps:$4 sm:$0xff]  }
 0x20c   :  { %3889 = vmatprep.subr.bf16.mxu0 %v5769_v6  ;;  %4258 = vmatprep.subr.bf16.mxu1 %v5772_v7  ;;  %v5851_v6 = vld [vmem:[#allocation3 + $0x1060] ss:$16 sps:$4 sm:$0xff]   ;;  %v5854_v7 = vld [vmem:[#allocation3 + $0x1068] ss:$16 sps:$4 sm:$0xff]  }
 0x20f   :  { %3890 = vmatpush1.bf16.msra.mxu0 %v5767_v8  ;;  %4259 = vmatpush1.bf16.msra.mxu1 %v5770_v9  ;;  %v5859_v8 = vld [vmem:[#allocation3 + $0x1084] ss:$16 sps:$4 sm:$0xff]   ;;  %v5862_v9 = vld [vmem:[#allocation3 + $0x108c] ss:$16 sps:$4 sm:$0xff]  }
 0x210   :  { %3891 = vmatprep.subr.bf16.mxu0 %v5775_v10  ;;  %4260 = vmatprep.subr.bf16.mxu1 %v5778_v11  ;;  %v5857_v10 = vld [vmem:[#allocation3 + $0x1080] ss:$16 sps:$4 sm:$0xff]   ;;  %v5860_v11 = vld [vmem:[#allocation3 + $0x1088] ss:$16 sps:$4 sm:$0xff]  }
 0x213   :  { %3892 = vmatpush1.bf16.msra.mxu0 %v5773_v12  ;;  %4261 = vmatpush1.bf16.msra.mxu1 %v5776_v13  ;;  %v5865_v12 = vld [vmem:[#allocation3 + $0x10a4] ss:$16 sps:$4 sm:$0xff]   ;;  %v5868_v13 = vld [vmem:[#allocation3 + $0x10ac] ss:$16 sps:$4 sm:$0xff]  }
 0x214   :  { %3893 = vmatprep.subr.bf16.mxu0 %v5781_v15  ;;  %4262 = vmatprep.subr.bf16.mxu1 %v5784_v17  ;;  %v5863_v15 = vld [vmem:[#allocation3 + $0x10a0] ss:$16 sps:$4 sm:$0xff]   ;;  %v5866_v17 = vld [vmem:[#allocation3 + $0x10a8] ss:$16 sps:$4 sm:$0xff]  }
 0x217   :  { %3894 = vmatpush1.bf16.msra.mxu0 %v5779_v18  ;;  %4263 = vmatpush1.bf16.msra.mxu1 %v5782_v19  ;;  %v5871_v18 = vld [vmem:[#allocation3 + $0x10c4] ss:$16 sps:$4 sm:$0xff]   ;;  %v5874_v19 = vld [vmem:[#allocation3 + $0x10cc] ss:$16 sps:$4 sm:$0xff]  }
 0x218   :  { %3895 = vmatprep.subr.bf16.mxu0 %v5787_v20  ;;  %4264 = vmatprep.subr.bf16.mxu1 %v5790_v53  ;;  %v5869_v20 = vld [vmem:[#allocation3 + $0x10c0] ss:$16 sps:$4 sm:$0xff]   ;;  %v5872_v53 = vld [vmem:[#allocation3 + $0x10c8] ss:$16 sps:$4 sm:$0xff]  }
 0x21b   :  { %3896 = vmatpush1.bf16.msra.mxu0 %v5785_v21  ;;  %4265 = vmatpush1.bf16.msra.mxu1 %v5788_v23  ;;  %v5877_v21 = vld [vmem:[#allocation3 + $0x10e4] ss:$16 sps:$4 sm:$0xff]   ;;  %v5880_v23 = vld [vmem:[#allocation3 + $0x10ec] ss:$16 sps:$4 sm:$0xff]  }
 0x21c   :  { %3897 = vmatprep.subr.bf16.mxu0 %v5793_v24  ;;  %4266 = vmatprep.subr.bf16.mxu1 %v5796_v25  ;;  %v5875_v24 = vld [vmem:[#allocation3 + $0x10e0] ss:$16 sps:$4 sm:$0xff]   ;;  %v5878_v25 = vld [vmem:[#allocation3 + $0x10e8] ss:$16 sps:$4 sm:$0xff]  }
 0x21f   :  { %3898 = vmatpush1.bf16.msra.mxu0 %v5791_v27  ;;  %4267 = vmatpush1.bf16.msra.mxu1 %v5794_v14  ;;  %v5883_v27 = vld [vmem:[#allocation3 + $0x1104] ss:$16 sps:$4 sm:$0xff]   ;;  %v5886_v14 = vld [vmem:[#allocation3 + $0x110c] ss:$16 sps:$4 sm:$0xff]  }
 0x220   :  { %3899 = vmatprep.subr.bf16.mxu0 %v5799_v30  ;;  %4268 = vmatprep.subr.bf16.mxu1 %v5802_v31  ;;  %v5881_v30 = vld [vmem:[#allocation3 + $0x1100] ss:$16 sps:$4 sm:$0xff]   ;;  %v5884_v31 = vld [vmem:[#allocation3 + $0x1108] ss:$16 sps:$4 sm:$0xff]  }
 0x223   :  { %3900 = vmatpush1.bf16.msra.mxu0 %v5797_v32  ;;  %4269 = vmatpush1.bf16.msra.mxu1 %v5800_v33  ;;  %v5889_v32 = vld [vmem:[#allocation3 + $0x1124] ss:$16 sps:$4 sm:$0xff]   ;;  %v5892_v33 = vld [vmem:[#allocation3 + $0x112c] ss:$16 sps:$4 sm:$0xff]  }
 0x224   :  { %3901 = vmatprep.subr.bf16.mxu0 %v5805_v16  ;;  %4270 = vmatprep.subr.bf16.mxu1 %v5808_v34  ;;  %v5887_v16 = vld [vmem:[#allocation3 + $0x1120] ss:$16 sps:$4 sm:$0xff]   ;;  %v5890_v34 = vld [vmem:[#allocation3 + $0x1128] ss:$16 sps:$4 sm:$0xff]  }
 0x227   :  { %3902 = vmatpush1.bf16.msra.mxu0 %v5803_v35  ;;  %4271 = vmatpush1.bf16.msra.mxu1 %v5806_v36  ;;  %v5895_v35 = vld [vmem:[#allocation3 + $0x1144] ss:$16 sps:$4 sm:$0xff]   ;;  %v5898_v36 = vld [vmem:[#allocation3 + $0x114c] ss:$16 sps:$4 sm:$0xff]  }
 0x228   :  { %3903 = vmatprep.subr.bf16.mxu0 %v5811_v26  ;;  %4272 = vmatprep.subr.bf16.mxu1 %v5814_v38  ;;  %v5893_v26 = vld [vmem:[#allocation3 + $0x1140] ss:$16 sps:$4 sm:$0xff]   ;;  %v5896_v38 = vld [vmem:[#allocation3 + $0x1148] ss:$16 sps:$4 sm:$0xff]  }
 0x22b   :  { %3904 = vmatpush1.bf16.msra.mxu0 %v5809_v28  ;;  %4273 = vmatpush1.bf16.msra.mxu1 %v5812_v40  ;;  %v5901_v28 = vld [vmem:[#allocation3 + $0x1164] ss:$16 sps:$4 sm:$0xff]   ;;  %v5904_v40 = vld [vmem:[#allocation3 + $0x116c] ss:$16 sps:$4 sm:$0xff]  }
 0x22c   :  { %3905 = vmatprep.subr.bf16.mxu0 %v5817_v42  ;;  %4274 = vmatprep.subr.bf16.mxu1 %v5820_v44  ;;  %v5899_v42 = vld [vmem:[#allocation3 + $0x1160] ss:$16 sps:$4 sm:$0xff]   ;;  %v5902_v44 = vld [vmem:[#allocation3 + $0x1168] ss:$16 sps:$4 sm:$0xff]  }
 0x22f   :  { %3906 = vmatpush1.bf16.msra.mxu0 %v5815_v45  ;;  %4275 = vmatpush1.bf16.msra.mxu1 %v5818_v29  ;;  %v763_v45 = vrot.slane %v6179_v54, %v6091_v50  ;;  %v630_v29 = vsub.s32 0, %v6088_v43 }
 0x230   :  { %3907 = vmatprep.subr.bf16.mxu0 %v5823_v22  ;;  %4276 = vmatprep.subr.bf16.mxu1 %v5826_v46  ;;  %v638_v22 = vsub.s32 2, %v6088_v43  ;;  %v626_v46 = vld [vmem:[#allocation6] sm:$0xf] }
 0x233   :  { %3908 = vmatpush1.bf16.msra.mxu0 %v5821_v47  ;;  %4277 = vmatpush1.bf16.msra.mxu1 %v5824_v48  ;;  %v634_v47 = vsub.s32 1, %v6088_v43  ;;  %v642_v48 = vsub.s32 3, %v6088_v43 }
 0x234   :  { %3909 = vmatprep.subr.bf16.mxu0 %v5829_v49  ;;  %4278 = vmatprep.subr.bf16.mxu1 %v5832_v37  ;;  %v6005_v49 = vmov 1983009808  }
 0x235   :  { %v4341_v37 = vunpack.c.l.s4 %v6005_v49  ;;  %v643_v50 = vrot.slane %v626_v46, %v642_v48 }
 0x237   :  { %3910 = vmatpush1.bf16.msra.mxu0 %v5827_v39  ;;  %4279 = vmatpush1.bf16.msra.mxu1 %v5830_v55  ;;  %v631_v39 = vrot.slane %v626_v46, %v630_v29  ;;  %v639_v55 = vrot.slane %v626_v46, %v638_v22 }
 0x238   :  { %3920 = vmatprep.subr.bf16.mxu0 %v5835_v56  ;;  %4289 = vmatprep.subr.bf16.mxu1 %v5838_v57  ;;  %v4357_v56 = vld [vmem:[#allocation8] sm:$0xf]  ;;  %v635_v57 = vrot.slane %v626_v46, %v634_v47 }
 0x23a   :  { %3912 = vmatmul.mubr.bf16.vlgmr.msra.gmra.mrb[0].mxu0 %v746_v41  ;;  %4281 = vmatmul.mubr.bf16.vlgmr.msra.gmra.mrb[0].mxu1 %v746_v41  ;;  %v4342_v41 = vunpack.c.0.s8 %v4341_v37 }
 0x23b   :  { %3921 = vmatpush1.bf16.msra.mxu0 %v5833_v59  ;;  %4290 = vmatpush1.bf16.msra.mxu1 %v5836_v60  ;;  %v4362_v60 = vrot.slane %v4357_v56, %v630_v29 }
 0x23c   :  { %3922 = vmatprep.subr.bf16.mxu0 %v5841_v61  ;;  %4291 = vmatprep.subr.bf16.mxu1 %v5844_v62 }
 0x23d   :  { %4984 = vmatprep.mubr.msk.bf16.mxu0 %vm3588_vm0, %v770_v51  ;;  %4985 = vmatprep.mubr.msk.bf16.mxu1 %vm3588_vm0, %v770_v51 }
 0x23f   :  { %3923 = vmatpush1.bf16.msra.mxu0 %v5839_v63  ;;  %4292 = vmatpush1.bf16.msra.mxu1 %v5842_v0  ;;  %v4370_v63 = vrot.slane %v4357_v56, %v638_v22 }
 0x240   :  { %3924 = vmatprep.subr.bf16.mxu0 %v5847_v52  ;;  %4293 = vmatprep.subr.bf16.mxu1 %v5850_v1  ;;  %v4366_v52 = vrot.slane %v4357_v56, %v634_v47 }
 0x243   :  { %3925 = vmatpush1.bf16.msra.mxu0 %v5845_v2  ;;  %4294 = vmatpush1.bf16.msra.mxu1 %v5848_v3 }
 0x244   :  { %3926 = vmatprep.subr.bf16.mxu0 %v5853_v4  ;;  %4295 = vmatprep.subr.bf16.mxu1 %v5856_v5 }
 0x247   :  { %3927 = vmatpush1.bf16.msra.mxu0 %v5851_v6  ;;  %4296 = vmatpush1.bf16.msra.mxu1 %v5854_v7 }
 0x248   :  { %3928 = vmatprep.subr.bf16.mxu0 %v5859_v8  ;;  %4297 = vmatprep.subr.bf16.mxu1 %v5862_v9  ;;  %v4374_v8 = vrot.slane %v4357_v56, %v642_v48 }
 0x24b   :  { %3929 = vmatpush1.bf16.msra.mxu0 %v5857_v10  ;;  %4298 = vmatpush1.bf16.msra.mxu1 %v5860_v11  ;;  %v4345_v10 = vsub.s32 %v4342_v41, %v6088_v43 }
 0x24c   :  { %3930 = vmatprep.subr.bf16.mxu0 %v5865_v12  ;;  %4299 = vmatprep.subr.bf16.mxu1 %v5868_v13 }
 0x24f   :  { %3931 = vmatpush1.bf16.msra.mxu0 %v5863_v15  ;;  %4300 = vmatpush1.bf16.msra.mxu1 %v5866_v17 }
 0x250   :  { %3932 = vmatprep.subr.bf16.mxu0 %v5871_v18  ;;  %4301 = vmatprep.subr.bf16.mxu1 %v5874_v19 }
 0x253   :  { %3933 = vmatpush1.bf16.msra.mxu0 %v5869_v20  ;;  %4302 = vmatpush1.bf16.msra.mxu1 %v5872_v53 }
 0x254   :  { %3934 = vmatprep.subr.bf16.mxu0 %v5877_v21  ;;  %4303 = vmatprep.subr.bf16.mxu1 %v5880_v23 }
 0x257   :  { %3935 = vmatpush1.bf16.msra.mxu0 %v5875_v24  ;;  %4304 = vmatpush1.bf16.msra.mxu1 %v5878_v25 }
 0x258   :  { %3936 = vmatprep.subr.bf16.mxu0 %v5883_v27  ;;  %4305 = vmatprep.subr.bf16.mxu1 %v5886_v14 }
 0x25b   :  { %3937 = vmatpush1.bf16.msra.mxu0 %v5881_v30  ;;  %4306 = vmatpush1.bf16.msra.mxu1 %v5884_v31 }
 0x25c   :  { %3938 = vmatprep.subr.bf16.mxu0 %v5889_v32  ;;  %4307 = vmatprep.subr.bf16.mxu1 %v5892_v33 }
 0x25f   :  { %3939 = vmatpush1.bf16.msra.mxu0 %v5887_v16  ;;  %4308 = vmatpush1.bf16.msra.mxu1 %v5890_v34 }
 0x260   :  { %3940 = vmatprep.subr.bf16.mxu0 %v5895_v35  ;;  %4309 = vmatprep.subr.bf16.mxu1 %v5898_v36 }
 0x263   :  { %3941 = vmatpush1.bf16.msra.mxu0 %v5893_v26  ;;  %4310 = vmatpush1.bf16.msra.mxu1 %v5896_v38 }
 0x264   :  { %3942 = vmatprep.subr.bf16.mxu0 %v5901_v28  ;;  %4311 = vmatprep.subr.bf16.mxu1 %v5904_v40 }
 0x267   :  { %3943 = vmatpush1.bf16.msra.mxu0 %v5899_v42  ;;  %4312 = vmatpush1.bf16.msra.mxu1 %v5902_v44 }
 0x26a   :  { %3953 = vmatmul.mubr.bf16.vlgmr.msra.gmra.mrb[0].mxu0 %v763_v45  ;;  %4322 = vmatmul.mubr.bf16.vlgmr.msra.gmra.mrb[0].mxu1 %v763_v45 }
 0x33d   :  { %v3954_v54 = vpop.f32.mrb[0].mxu0  ;;  %v4323_v58 = vpop.f32.mrb[0].mxu1 }
 0x33e   :  { %v4987_v59 = vadd.f32 %v3954_v54, %v631_v39  ;;  %v4989_v61 = vadd.f32 %v4323_v58, %v639_v55  ;;  %v3956_v62 = vpop.f32.mrb[1].mxu0  ;;  %v4325_v51 = vpop.f32.mrb[1].mxu1 }
 0x33f   :  { %v4988_v0 = vadd.f32 %v3956_v62, %v635_v57  ;;  %v4990_v1 = vadd.f32 %v4325_v51, %v643_v50  ;;  %v3958_v2 = vpop.f32.mrb[2].mxu0  ;;  %v4327_v3 = vpop.f32.mrb[2].mxu1 }
 0x340   :  { %v4330_v4 = vmax.f32 %v4987_v59, 0.0  ;;  %v4332_v5 = vmax.f32 %v4989_v61, 0.0  ;;  %v3959_v6 = vpop.f32.mrb[3].mxu0  ;;  %v4328_v7 = vpop.f32.mrb[3].mxu1 }
 0x341   :  { %v4331_v9 = vmax.f32 %v4988_v0, 0.0  ;;  %v4333_v11 = vmax.f32 %v4990_v1, 0.0 }
 0x342   :  { %v4379_v12 = vmul.f32 %v4362_v60, %v4330_v4  ;;  %v4381_v13 = vmul.f32 %v4370_v63, %v4332_v5 }
 0x343   :  { %v4338_v15 = vcombine.low %v4330_v4, %v4331_v9  ;;  %v4380_v17 = vmul.f32 %v4366_v52, %v4331_v9  ;;  %v4339_v18 = vcombine.low %v4332_v5, %v4333_v11  ;;  %v4382_v21 = vmul.f32 %v4374_v8, %v4333_v11 }
 0x344   :  { %v4384_v19 = vsel %vm4383_vm1, %v4379_v12, 0.0  ;;  %v4387_v25 = vsel %vm4383_vm1, %v4381_v13, 0.0 }
 0x345   :  { %v4346_v20 = vrot.slane %v4338_v15, %v4345_v10  ;;  %v4353_v53 = vrot.slane %v4339_v18, %v4345_v10  ;;  %v4385_v23 = vsel %vm4383_vm1, %v4380_v17, 0.0  ;;  %v4389_v30 = vsel %vm4383_vm1, %v4382_v21, 0.0 }
 0x346   :  { %v4386_v24 = vadd.f32 %v4385_v23, %v4384_v19 }
 0x347   :  { %v4354_v27 = vcombine.low %v4346_v20, %v4353_v53 }
 0x348   :  { %v4388_v14 = vadd.f32 %v4387_v25, %v4386_v24 }
 0x349   :  { %4356 = vst [vmem:[#allocation9] sm:$0xff] %v4354_v27 }
 0x34a   :  { %v4390_v31 = vadd.f32 %v4389_v30, %v4388_v14 }
 0x34c   :  { %4391 = vadd.xlane.f32.xlu0 %v4390_v31 }
 0x34d   :  { %5982 = shalt.err (!%p5979_p0)
}
 0x34e   :  { %s5983_s18 = scalar_lea.hbm %s6213_s5, 128 }
 0x34f   :  { %p5984_p1 = scmp.ne.s32.totalorder %s6213_s5, %s5983_s18  ;;  %p5987_p2 = scmp.lt.u32.totalorder %s5983_s18, %s6213_s5 }
 0x351   :  { %p5989_p3 = pnand %p5987_p2, %p5984_p1 }
 0x353   :  { %5992 = shalt.err (!%p5989_p3)
}
 0x354   :  { %4412 = dma.vmem_to_hbm [thread:$0]  %s4410_s14, 128, %s6213_s5, [#allocation5]   ;;  %v4986_v43 = vld [vmem:[#allocation2] ss:$0 sm:$0xff]  ;;  %vm4401_vm2 = vcmask 1024  }
 0x3d9   :  { %v4392_v32 = vpop.xlane.xlu0 %4391 }
 0x3da   :  { %v4400_v33 = vadd.f32 %v4986_v43, %v4392_v32 }
 0x3dc   :  { %4402 = vst.msk [vmem:[%s6214_s6] sm:$0x3] %vm4401_vm2, %v4400_v33 }
 0x3dd   :  { %5997 = dma.done.wait [#allocation5], 128  }
 0x3de   :  { %5998 = vsyncadd [#allocation5], 4294967168 }
 0x3df   :  { %4420 = vsyncpa [#allocation4], 1 }
 0x3e0   :  { %4421 = vsyncpa [#allocation7], 1 }
 0x3e1   :  { %4422 = vsyncpa [#allocation5], 1 }

</bundles_post_ra>
